<compile_context>
chip_gen: v7x
topology: tpu7x:2x2x1
jax: 0.10.0
libtpu: 0.0.40
codegen_flags: <defaults>
</compile_context>

<pallas_src>
import functools

import jax
import jax.numpy as jnp
from jax.experimental import pallas as pl
from jax.experimental.pallas import tpu as pltpu


# ------------------------------ Pallas kernel -------------------------------

def _bottleneck_kernel(mask_ref, x_ref, w1sc_ref, b1_ref, wqkvt_ref, bqkv_ref,
                       et_ref, pool_ref, s2_ref, b2_ref, w3t_ref, bfin_ref,
                       o_ref, *, heads, kk, vv, bt, npos):
    """Fused LambdaBottleneck forward for one tile of `bt` images."""
    planes = heads * vv
    hk = heads * kk
    f32 = jnp.float32
    bf16 = jnp.bfloat16

    # ---- batch-in-lanes activation slab: (Cin, Bt*Np), lane order (b, n) ----
    if bt > 1:
        xl = jnp.concatenate([x_ref[b] for b in range(bt)], axis=-1)
    else:
        xl = x_ref[0]
    xl = xl.astype(bf16)

    # conv1+bn1 and shortcut conv+bn fused into ONE matmul over Bt*Np lanes.
    hsc = jnp.dot(w1sc_ref[...], xl, preferred_element_type=f32)   # (planes+4p, Bt*Np)
    h1 = jnp.maximum(hsc[:planes, :] + b1_ref[...], 0.0)           # (planes, Bt*Np)
    sc = hsc[planes:, :]                                           # (4p,     Bt*Np)

    # fused q/k/v 1x1 projections: ONE matmul + per-channel affine.
    qkv = (jnp.dot(wqkvt_ref[...], h1.astype(bf16), preferred_element_type=f32)
           + bqkv_ref[...])                                        # (hk+K+VV, Bt*Np)

    # relayout batch from lanes to sublanes for the lambda stage.
    mask3 = mask_ref[...][None, :, :]                              # (1, 1, Np)
    q4 = qkv[:hk, :].reshape(heads, kk, bt, npos)                  # (H, K, Bt, Np)
    keys = qkv[hk:hk + kk, :].reshape(kk, bt, npos)                # (K, Bt, Np)
    vals = qkv[hk + kk:hk + kk + vv, :].reshape(vv, bt, npos) * mask3   # (VV, Bt, Np)

    # masked softmax over positions (lane axis), per image.
    ksm = jnp.where(mask3 > 0.5, keys, jnp.float32(-1e30))
    kmax = jnp.max(ksm, axis=-1, keepdims=True)
    ex = jnp.exp(ksm - kmax)
    inv = pl.reciprocal(jnp.sum(ex, axis=-1, keepdims=True), approx=True)
    sm = ex * inv                                                  # (K, Bt, Np)

    # positional lambda: ONE batch-stacked matmul (M = Bt*VV) against the shared Et.
    vals_st = vals.reshape(vv * bt, npos).astype(bf16)             # rows ordered (v, b)
    lp = jnp.dot(vals_st, et_ref[...], preferred_element_type=f32)  # (VV*Bt, K*Np)

    # y[h, v, b, n] = sum_k q[h,k,b,n] * (lambda_p[k,v,b,n] + lambda_c[k,v,b])
    # unrolled, lane-aligned k loop: pure VALU MACs, no big temp, no XLU reduce.
    y = jnp.zeros((heads, vv, bt, npos), f32)
    for k in range(kk):
        lam_p = lp[:, k * npos:(k + 1) * npos].reshape(vv, bt, npos)
        lam_c = jnp.sum(sm[k][None, :, :] * vals, axis=-1, keepdims=True)  # (VV, Bt, 1)
        lam = lam_p + lam_c
        y = y + q4[:, k][:, None, :, :] * lam[None, :, :, :]
    y2 = y.reshape(planes * bt, npos)                              # rows ordered (c, b)

    # 3x3 avg-pool (stride 1, pad 1, count_include_pad) as a batch-stacked matmul,
    # then bn2 + relu.
    pooled = jnp.dot(y2.astype(bf16), pool_ref[...], preferred_element_type=f32)
    h2 = jnp.maximum(pooled.reshape(planes, bt, npos) * s2_ref[...][:, :, None]
                     + b2_ref[...][:, :, None], 0.0)               # (planes, Bt, Np)

    # back to batch-in-lanes: conv3+bn3, residual add (shortcut), final ReLU.
    h2l = h2.reshape(planes, bt * npos).astype(bf16)
    main = jnp.dot(w3t_ref[...], h2l, preferred_element_type=f32)  # (4p, Bt*Np)
    out = jnp.maximum(main + sc + bfin_ref[...], 0.0)

    # per-image writes: lane-aligned static slices (free views).
    for b in range(bt):
        o_ref[b] = out[:, b * npos:(b + 1) * npos].astype(o_ref.dtype)


# ------------------------------ glue / setup --------------------------------

def _bn_affine(gamma, beta, eps=1e-5):
    # eval-mode BatchNorm with default running stats (mean=0, var=1)
    return gamma / jnp.sqrt(1.0 + eps), beta


def _build_geometry(emb, H, W, Np):
    """Relative-position matrix Et (flattened for one matmul), 3x3 pooling matrix
    and valid-lane mask, zero-padded from N = H*W to Np lanes.  Built ONCE."""
    K, U, _, m, _ = emb.shape
    assert U == 1, "kernel implements the default u=1 of LambdaConv"
    pad = (m - 1) // 2
    N = H * W
    n = jnp.arange(N)
    rr, cc = n // W, n % W
    dr = rr[:, None] - rr[None, :]                 # indexed [m_pos, n_pos]
    dc = cc[:, None] - cc[None, :]
    inside = ((jnp.abs(dr) <= pad) & (jnp.abs(dc) <= pad)).astype(jnp.float32)
    dri = jnp.clip(dr + pad, 0, m - 1)
    dci = jnp.clip(dc + pad, 0, m - 1)
    et = emb[:, 0, 0][:, dri, dci] * inside        # (K, N, N), et[k, m, n]
    et = jnp.pad(et, ((0, 0), (0, Np - N), (0, Np - N)))
    et_flat = jnp.transpose(et, (1, 0, 2)).reshape(Np, K * Np)   # [m, k*Np + n]

    near = ((jnp.abs(dr) <= 1) & (jnp.abs(dc) <= 1)).astype(jnp.float32) / 9.0
    pool = jnp.pad(near, ((0, Np - N), (0, Np - N)))

    mask = jnp.pad(jnp.ones((1, N), jnp.float32), ((0, 0), (0, Np - N)))
    return et_flat, pool, mask


def _pick_batch_tile(B, vv, target_rows=256):
    """Bt so that Bt*VV approaches the MXU row height, Bt | B, and (when cheap)
    at least two grid steps remain so both v7x TensorCores get work."""
    bt = min(B, max(1, target_rows // max(vv, 1)))
    while B % bt:
        bt -= 1
    if B // bt < 2 and bt % 2 == 0 and (bt // 2) * vv >= 64:
        bt //= 2
    return bt


def init_params(key, in_planes, planes, heads=4, k=16, u=1, m=23):
    vv = planes // heads
    ks = jax.random.split(key, 20)

    def nrm(kk_, shape, s=0.1):
        return s * jax.random.normal(kk_, shape, jnp.float32)

    p = {}
    p['w1'] = nrm(ks[0], (in_planes, planes))
    p['bn1_g'] = 1.0 + nrm(ks[1], (planes,))
    p['bn1_b'] = nrm(ks[2], (planes,))
    p['wq'] = nrm(ks[3], (planes, k * heads))
    p['bnq_g'] = 1.0 + nrm(ks[4], (k * heads,))
    p['bnq_b'] = nrm(ks[5], (k * heads,))
    p['wk'] = nrm(ks[6], (planes, k * u))
    p['wv'] = nrm(ks[7], (planes, vv * u))
    p['bnv_g'] = 1.0 + nrm(ks[8], (vv * u,))
    p['bnv_b'] = nrm(ks[9], (vv * u,))
    p['emb'] = jax.random.normal(ks[10], (k, u, 1, m, m), jnp.float32)
    p['bn2_g'] = 1.0 + nrm(ks[11], (planes,))
    p['bn2_b'] = nrm(ks[12], (planes,))
    p['w3'] = nrm(ks[13], (planes, 4 * planes))
    p['bn3_g'] = 1.0 + nrm(ks[14], (4 * planes,))
    p['bn3_b'] = nrm(ks[15], (4 * planes,))
    p['wsc'] = nrm(ks[16], (in_planes, 4 * planes))
    p['bsc_bias'] = nrm(ks[17], (4 * planes,))
    p['bnsc_g'] = 1.0 + nrm(ks[18], (4 * planes,))
    p['bnsc_b'] = nrm(ks[19], (4 * planes,))
    return p


def make_lambda_bottleneck(p, H, W, heads=4, k=16, u=1, batch_tile=None):
    """Fold BN into conv weights, build the geometry once, return a jitted forward."""
    assert u == 1, "kernel implements the default u=1 of LambdaConv"
    in_planes, planes = p['w1'].shape
    vv = planes // heads
    p4 = 4 * planes
    # This port implements the stride=1, in_planes != 4*planes configuration of the
    # PyTorch module (avg-pool stage + conv shortcut are both present).
    assert in_planes != p4
    N = H * W
    Np = 128 * pl.cdiv(N, 128)                      # lane-dense padded position count

    # ---- one-time parameter folding (eval-mode BN) ----
    s1, b1 = _bn_affine(p['bn1_g'], p['bn1_b'])
    w1t = s1[:, None] * p['w1'].T                                   # (planes, Cin)
    s3, b3 = _bn_affine(p['bn3_g'], p['bn3_b'])
    w3t = s3[:, None] * p['w3'].T                                   # (p4, planes)
    ssc, bsc = _bn_affine(p['bnsc_g'], p['bnsc_b'])
    wsct = ssc[:, None] * p['wsc'].T                                # (p4, Cin)
    bfin = b3 + ssc * p['bsc_bias'] + bsc                           # (p4,)
    w1sc = jnp.concatenate([w1t, wsct], axis=0)                     # conv1 || shortcut

    sq, bq = _bn_affine(p['bnq_g'], p['bnq_b'])
    sv, bv = _bn_affine(p['bnv_g'], p['bnv_b'])
    wqkv = jnp.concatenate([p['wq'], p['wk'], p['wv']], axis=1)     # (planes, dq)
    sqkv = jnp.concatenate([sq, jnp.ones((k * u,), jnp.float32), sv])
    bqkv = jnp.concatenate([bq, jnp.zeros((k * u,), jnp.float32), bv])
    wqkvt = sqkv[:, None] * wqkv.T                                  # (dq, planes)

    s2, b2 = _bn_affine(p['bn2_g'], p['bn2_b'])

    et_flat, pool, mask = _build_geometry(p['emb'], H, W, Np)

    bf16 = jnp.bfloat16
    col = lambda v: v.reshape(-1, 1).astype(jnp.float32)
    # MXU operands in bf16 (f32 accumulation in-kernel); scales/shifts stay f32.
    consts = [mask,
              w1sc.astype(bf16), col(b1),
              wqkvt.astype(bf16), col(bqkv),
              et_flat.astype(bf16), pool.astype(bf16),
              col(s2), col(b2),
              w3t.astype(bf16), col(bfin)]
    consts = [jnp.asarray(a) for a in consts]       # commit once; no per-call rebuild
    const_bytes = sum(int(a.size) * a.dtype.itemsize for a in consts)

    def fwd(x):
        B, Cin, Hx, Wx = x.shape
        assert (Hx, Wx) == (H, W) and Cin == in_planes
        bt = batch_tile if batch_tile is not None else _pick_batch_tile(B, vv)
        assert B % bt == 0

        xp = jnp.pad(x.reshape(B, Cin, N).astype(jnp.float32),
                     ((0, 0), (0, 0), (0, Np - N)))

        args = [consts[0], xp] + consts[1:]

        in_specs = []
        for i, a in enumerate(args):
            if i == 1:   # per-step activation block; everything else stays resident
                in_specs.append(pl.BlockSpec((bt, Cin, Np), lambda g: (g, 0, 0)))
            else:
                in_specs.append(
                    pl.BlockSpec(a.shape, lambda g, _nd=a.ndim: (0,) * _nd))

        # rough VMEM budget: resident constants (x2 for default double-buffering)
        # plus blocks and in-kernel temporaries; clamped below v7x's 64 MiB/TC.
        act_bytes = 4 * bt * Np * (Cin + 3 * p4 + 6 * planes
                                   + heads * k + k + 8 * vv + vv * k)
        vmem_limit = int(min(60 * 2**20,
                             max(24 * 2**20, 2 * const_bytes + 3 * act_bytes)))

        kern = functools.partial(_bottleneck_kernel, heads=heads, kk=k, vv=vv,
                                 bt=bt, npos=Np)
        out = pl.pallas_call(
            kern,
            out_shape=jax.ShapeDtypeStruct((B, p4, Np), jnp.float32),
            grid=(B // bt,),
            in_specs=in_specs,
            out_specs=pl.BlockSpec((bt, p4, Np), lambda g: (g, 0, 0)),
            compiler_params=pltpu.CompilerParams(
                dimension_semantics=("parallel",),
                vmem_limit_bytes=vmem_limit),
        )(*args)

        # Already NCHW-ordered; just drop the lane padding.
        return out[:, :, :N].reshape(B, p4, H, W)

    return jax.jit(fwd)


if __name__ == "__main__":
    key = jax.random.PRNGKey(0)
    kx, kp = jax.random.split(key)

    B, in_planes, H, W = 2, 8, 8, 8
    planes = 16                      # heads=4, k=16, u=1, vv=4, m=23 (defaults)

    x = jax.random.normal(kx, (B, in_planes, H, W), jnp.float32)
    params = init_params(kp, in_planes, planes)

    fwd = make_lambda_bottleneck(params, H, W)
    out = jax.block_until_ready(fwd(x))

    assert out.shape == (B, 4 * planes, H, W)
    assert bool(jnp.all(jnp.isfinite(out)))
    print("KERNEL_OK")
</pallas_src>

<mosaic_0001>
module attributes {stable_mosaic.version = 11 : i64} {
  func.func @_bottleneck_kernel(%arg0: i32, %arg1: memref<1x128xf32, #tpu.memory_space<vmem>>, %arg2: memref<2x8x128xf32, #tpu.memory_space<vmem>>, %arg3: memref<80x8xbf16, #tpu.memory_space<vmem>>, %arg4: memref<16x1xf32, #tpu.memory_space<vmem>>, %arg5: memref<84x16xbf16, #tpu.memory_space<vmem>>, %arg6: memref<84x1xf32, #tpu.memory_space<vmem>>, %arg7: memref<128x2048xbf16, #tpu.memory_space<vmem>>, %arg8: memref<128x128xbf16, #tpu.memory_space<vmem>>, %arg9: memref<16x1xf32, #tpu.memory_space<vmem>>, %arg10: memref<16x1xf32, #tpu.memory_space<vmem>>, %arg11: memref<64x16xbf16, #tpu.memory_space<vmem>>, %arg12: memref<64x1xf32, #tpu.memory_space<vmem>>, %arg13: memref<2x64x128xf32, #tpu.memory_space<vmem>>) attributes {dimension_semantics = [#tpu.dimension_semantics<parallel>], iteration_bounds = array<i64: 1>, scalar_prefetch = 0 : i64, scratch_operands = 0 : i64, tpu.core_type = #tpu.core_type<tc>, window_params = [{pipeline_mode = #tpu.pipeline_mode<synchronous>, transform_indices = @transform_0, window_bounds = array<i64: 1, 128>}, {transform_indices = @transform_1, window_bounds = array<i64: 2, 8, 128>}, {pipeline_mode = #tpu.pipeline_mode<synchronous>, transform_indices = @transform_2, window_bounds = array<i64: 80, 8>}, {pipeline_mode = #tpu.pipeline_mode<synchronous>, transform_indices = @transform_3, window_bounds = array<i64: 16, 1>}, {pipeline_mode = #tpu.pipeline_mode<synchronous>, transform_indices = @transform_4, window_bounds = array<i64: 84, 16>}, {pipeline_mode = #tpu.pipeline_mode<synchronous>, transform_indices = @transform_5, window_bounds = array<i64: 84, 1>}, {pipeline_mode = #tpu.pipeline_mode<synchronous>, transform_indices = @transform_6, window_bounds = array<i64: 128, 2048>}, {pipeline_mode = #tpu.pipeline_mode<synchronous>, transform_indices = @transform_7, window_bounds = array<i64: 128, 128>}, {pipeline_mode = #tpu.pipeline_mode<synchronous>, transform_indices = @transform_8, window_bounds = array<i64: 16, 1>}, {pipeline_mode = #tpu.pipeline_mode<synchronous>, transform_indices = @transform_9, window_bounds = array<i64: 16, 1>}, {pipeline_mode = #tpu.pipeline_mode<synchronous>, transform_indices = @transform_10, window_bounds = array<i64: 64, 16>}, {pipeline_mode = #tpu.pipeline_mode<synchronous>, transform_indices = @transform_11, window_bounds = array<i64: 64, 1>}, {transform_indices = @transform_12, window_bounds = array<i64: 2, 64, 128>}]} {
    %c0 = arith.constant 0 : index
    %c0_0 = arith.constant 0 : index
    %c0_1 = arith.constant 0 : index
    %0 = vector.load %arg2[%c0, %c0_0, %c0_1] : memref<2x8x128xf32, #tpu.memory_space<vmem>>, vector<1x8x128xf32>
    %1 = vector.shape_cast %0 : vector<1x8x128xf32> to vector<8x128xf32>
    %c1 = arith.constant 1 : index
    %c0_2 = arith.constant 0 : index
    %c0_3 = arith.constant 0 : index
    %2 = vector.load %arg2[%c1, %c0_2, %c0_3] : memref<2x8x128xf32, #tpu.memory_space<vmem>>, vector<1x8x128xf32>
    %3 = vector.shape_cast %2 : vector<1x8x128xf32> to vector<8x128xf32>
    %4 = tpu.concatenate %1, %3 in 1 : vector<8x128xf32>, vector<8x128xf32> -> vector<8x256xf32>
    %5 = arith.truncf %4 : vector<8x256xf32> to vector<8x256xbf16>
    %c0_4 = arith.constant 0 : index
    %c0_5 = arith.constant 0 : index
    %6 = vector.load %arg3[%c0_4, %c0_5] : memref<80x8xbf16, #tpu.memory_space<vmem>>, vector<80x8xbf16>
    %cst = arith.constant dense<0.000000e+00> : vector<80x256xf32>
    %7 = tpu.matmul %6, %5, %cst {dimension_numbers = #tpu.dot_dimension_numbers<[1], [0], [0], [1], [0, 0, 1, 1], [], []>} : vector<80x8xbf16>, vector<8x256xbf16>, vector<80x256xf32> -> vector<80x256xf32>
    %8 = vector.extract_strided_slice %7 {offsets = [0, 0], sizes = [16, 256], strides = [1, 1]} : vector<80x256xf32> to vector<16x256xf32>
    %c0_6 = arith.constant 0 : index
    %c0_7 = arith.constant 0 : index
    %9 = vector.load %arg4[%c0_6, %c0_7] : memref<16x1xf32, #tpu.memory_space<vmem>>, vector<16x1xf32>
    %10 = vector.broadcast %9 : vector<16x1xf32> to vector<16x256xf32>
    %11 = arith.addf %8, %10 : vector<16x256xf32>
    %cst_8 = arith.constant 0.000000e+00 : f32
    %12 = vector.broadcast %cst_8 : f32 to vector<16x256xf32>
    %13 = arith.maximumf %11, %12 : vector<16x256xf32>
    %14 = vector.extract_strided_slice %7 {offsets = [16, 0], sizes = [64, 256], strides = [1, 1]} : vector<80x256xf32> to vector<64x256xf32>
    %c0_9 = arith.constant 0 : index
    %c0_10 = arith.constant 0 : index
    %15 = vector.load %arg5[%c0_9, %c0_10] : memref<84x16xbf16, #tpu.memory_space<vmem>>, vector<84x16xbf16>
    %16 = arith.truncf %13 : vector<16x256xf32> to vector<16x256xbf16>
    %cst_11 = arith.constant dense<0.000000e+00> : vector<84x256xf32>
    %17 = tpu.matmul %15, %16, %cst_11 {dimension_numbers = #tpu.dot_dimension_numbers<[1], [0], [0], [1], [0, 0, 1, 1], [], []>} : vector<84x16xbf16>, vector<16x256xbf16>, vector<84x256xf32> -> vector<84x256xf32>
    %c0_12 = arith.constant 0 : index
    %c0_13 = arith.constant 0 : index
    %18 = vector.load %arg6[%c0_12, %c0_13] : memref<84x1xf32, #tpu.memory_space<vmem>>, vector<84x1xf32>
    %19 = vector.broadcast %18 : vector<84x1xf32> to vector<84x256xf32>
    %20 = arith.addf %17, %19 : vector<84x256xf32>
    %c0_14 = arith.constant 0 : index
    %c0_15 = arith.constant 0 : index
    %21 = vector.load %arg1[%c0_14, %c0_15] : memref<1x128xf32, #tpu.memory_space<vmem>>, vector<1x128xf32>
    %22 = vector.shape_cast %21 : vector<1x128xf32> to vector<1x1x128xf32>
    %23 = vector.extract_strided_slice %20 {offsets = [0, 0], sizes = [64, 256], strides = [1, 1]} : vector<84x256xf32> to vector<64x256xf32>
    %24 = vector.shape_cast %23 : vector<64x256xf32> to vector<4x16x2x128xf32>
    %25 = vector.extract_strided_slice %20 {offsets = [64, 0], sizes = [16, 256], strides = [1, 1]} : vector<84x256xf32> to vector<16x256xf32>
    %26 = vector.shape_cast %25 : vector<16x256xf32> to vector<16x2x128xf32>
    %27 = vector.extract_strided_slice %20 {offsets = [80, 0], sizes = [4, 256], strides = [1, 1]} : vector<84x256xf32> to vector<4x256xf32>
    %28 = vector.shape_cast %27 : vector<4x256xf32> to vector<4x2x128xf32>
    %29 = vector.broadcast %22 : vector<1x1x128xf32> to vector<4x2x128xf32>
    %30 = arith.mulf %28, %29 : vector<4x2x128xf32>
    %cst_16 = arith.constant 5.000000e-01 : f32
    %31 = vector.broadcast %cst_16 : f32 to vector<1x1x128xf32>
    %32 = arith.cmpf ogt, %22, %31 : vector<1x1x128xf32>
    %cst_17 = arith.constant -1.000000e+30 : f32
    %33 = vector.shape_cast %32 : vector<1x1x128xi1> to vector<1x1x128xi1>
    %34 = vector.broadcast %33 : vector<1x1x128xi1> to vector<16x2x128xi1>
    %35 = vector.broadcast %cst_17 : f32 to vector<16x2x128xf32>
    %36 = arith.select %34, %26, %35 : vector<16x2x128xi1>, vector<16x2x128xf32>
    %cst_18 = arith.constant dense<0xFF800000> : vector<16x2xf32>
    %37 = vector.multi_reduction <maximumf>, %36, %cst_18 [2] : vector<16x2x128xf32> to vector<16x2xf32>
    %38 = vector.shape_cast %37 : vector<16x2xf32> to vector<16x2x1xf32>
    %39 = vector.broadcast %38 : vector<16x2x1xf32> to vector<16x2x128xf32>
    %40 = arith.subf %36, %39 : vector<16x2x128xf32>
    %41 = math.exp %40 : vector<16x2x128xf32>
    %cst_19 = arith.constant dense<0.000000e+00> : vector<16x2xf32>
    %42 = vector.multi_reduction <add>, %41, %cst_19 [2] : vector<16x2x128xf32> to vector<16x2xf32>
    %43 = vector.shape_cast %42 : vector<16x2xf32> to vector<16x2x1xf32>
    %44 = tpu.reciprocal %43 {approx = true} : vector<16x2x1xf32> -> vector<16x2x1xf32>
    %45 = vector.broadcast %44 : vector<16x2x1xf32> to vector<16x2x128xf32>
    %46 = arith.mulf %41, %45 : vector<16x2x128xf32>
    %47 = vector.shape_cast %30 : vector<4x2x128xf32> to vector<8x128xf32>
    %48 = arith.truncf %47 : vector<8x128xf32> to vector<8x128xbf16>
    %c0_20 = arith.constant 0 : index
    %c0_21 = arith.constant 0 : index
    %49 = vector.load %arg7[%c0_20, %c0_21] : memref<128x2048xbf16, #tpu.memory_space<vmem>>, vector<128x2048xbf16>
    %cst_22 = arith.constant dense<0.000000e+00> : vector<8x2048xf32>
    %50 = tpu.matmul %48, %49, %cst_22 {dimension_numbers = #tpu.dot_dimension_numbers<[1], [0], [0], [1], [0, 0, 1, 1], [], []>} : vector<8x128xbf16>, vector<128x2048xbf16>, vector<8x2048xf32> -> vector<8x2048xf32>
    %cst_23 = arith.constant 0.000000e+00 : f32
    %51 = vector.broadcast %cst_23 : f32 to vector<4x4x2x128xf32>
    %52 = vector.extract_strided_slice %50 {offsets = [0, 0], sizes = [8, 128], strides = [1, 1]} : vector<8x2048xf32> to vector<8x128xf32>
    %53 = vector.shape_cast %52 : vector<8x128xf32> to vector<4x2x128xf32>
    %54 = vector.extract_strided_slice %46 {offsets = [0, 0, 0], sizes = [1, 2, 128], strides = [1, 1, 1]} : vector<16x2x128xf32> to vector<1x2x128xf32>
    %55 = vector.shape_cast %54 : vector<1x2x128xf32> to vector<2x128xf32>
    %56 = vector.shape_cast %55 : vector<2x128xf32> to vector<1x2x128xf32>
    %57 = vector.broadcast %56 : vector<1x2x128xf32> to vector<4x2x128xf32>
    %58 = arith.mulf %57, %30 : vector<4x2x128xf32>
    %cst_24 = arith.constant dense<0.000000e+00> : vector<4x2xf32>
    %59 = vector.multi_reduction <add>, %58, %cst_24 [2] : vector<4x2x128xf32> to vector<4x2xf32>
    %60 = vector.shape_cast %59 : vector<4x2xf32> to vector<4x2x1xf32>
    %61 = vector.broadcast %60 : vector<4x2x1xf32> to vector<4x2x128xf32>
    %62 = arith.addf %53, %61 : vector<4x2x128xf32>
    %63 = vector.extract_strided_slice %24 {offsets = [0, 0, 0, 0], sizes = [4, 1, 2, 128], strides = [1, 1, 1, 1]} : vector<4x16x2x128xf32> to vector<4x1x2x128xf32>
    %64 = vector.shape_cast %63 : vector<4x1x2x128xf32> to vector<4x2x128xf32>
    %65 = vector.shape_cast %64 : vector<4x2x128xf32> to vector<4x1x2x128xf32>
    %66 = vector.shape_cast %62 : vector<4x2x128xf32> to vector<1x4x2x128xf32>
    %67 = vector.broadcast %65 : vector<4x1x2x128xf32> to vector<4x4x2x128xf32>
    %68 = vector.broadcast %66 : vector<1x4x2x128xf32> to vector<4x4x2x128xf32>
    %69 = arith.mulf %67, %68 : vector<4x4x2x128xf32>
    %70 = arith.addf %51, %69 : vector<4x4x2x128xf32>
    %71 = vector.extract_strided_slice %50 {offsets = [0, 128], sizes = [8, 128], strides = [1, 1]} : vector<8x2048xf32> to vector<8x128xf32>
    %72 = vector.shape_cast %71 : vector<8x128xf32> to vector<4x2x128xf32>
    %73 = vector.extract_strided_slice %46 {offsets = [1, 0, 0], sizes = [1, 2, 128], strides = [1, 1, 1]} : vector<16x2x128xf32> to vector<1x2x128xf32>
    %74 = vector.shape_cast %73 : vector<1x2x128xf32> to vector<2x128xf32>
    %75 = vector.shape_cast %74 : vector<2x128xf32> to vector<1x2x128xf32>
    %76 = vector.broadcast %75 : vector<1x2x128xf32> to vector<4x2x128xf32>
    %77 = arith.mulf %76, %30 : vector<4x2x128xf32>
    %cst_25 = arith.constant dense<0.000000e+00> : vector<4x2xf32>
    %78 = vector.multi_reduction <add>, %77, %cst_25 [2] : vector<4x2x128xf32> to vector<4x2xf32>
    %79 = vector.shape_cast %78 : vector<4x2xf32> to vector<4x2x1xf32>
    %80 = vector.broadcast %79 : vector<4x2x1xf32> to vector<4x2x128xf32>
    %81 = arith.addf %72, %80 : vector<4x2x128xf32>
    %82 = vector.extract_strided_slice %24 {offsets = [0, 1, 0, 0], sizes = [4, 1, 2, 128], strides = [1, 1, 1, 1]} : vector<4x16x2x128xf32> to vector<4x1x2x128xf32>
    %83 = vector.shape_cast %82 : vector<4x1x2x128xf32> to vector<4x2x128xf32>
    %84 = vector.shape_cast %83 : vector<4x2x128xf32> to vector<4x1x2x128xf32>
    %85 = vector.shape_cast %81 : vector<4x2x128xf32> to vector<1x4x2x128xf32>
    %86 = vector.broadcast %84 : vector<4x1x2x128xf32> to vector<4x4x2x128xf32>
    %87 = vector.broadcast %85 : vector<1x4x2x128xf32> to vector<4x4x2x128xf32>
    %88 = arith.mulf %86, %87 : vector<4x4x2x128xf32>
    %89 = arith.addf %70, %88 : vector<4x4x2x128xf32>
    %90 = vector.extract_strided_slice %50 {offsets = [0, 256], sizes = [8, 128], strides = [1, 1]} : vector<8x2048xf32> to vector<8x128xf32>
    %91 = vector.shape_cast %90 : vector<8x128xf32> to vector<4x2x128xf32>
    %92 = vector.extract_strided_slice %46 {offsets = [2, 0, 0], sizes = [1, 2, 128], strides = [1, 1, 1]} : vector<16x2x128xf32> to vector<1x2x128xf32>
    %93 = vector.shape_cast %92 : vector<1x2x128xf32> to vector<2x128xf32>
    %94 = vector.shape_cast %93 : vector<2x128xf32> to vector<1x2x128xf32>
    %95 = vector.broadcast %94 : vector<1x2x128xf32> to vector<4x2x128xf32>
    %96 = arith.mulf %95, %30 : vector<4x2x128xf32>
    %cst_26 = arith.constant dense<0.000000e+00> : vector<4x2xf32>
    %97 = vector.multi_reduction <add>, %96, %cst_26 [2] : vector<4x2x128xf32> to vector<4x2xf32>
    %98 = vector.shape_cast %97 : vector<4x2xf32> to vector<4x2x1xf32>
    %99 = vector.broadcast %98 : vector<4x2x1xf32> to vector<4x2x128xf32>
    %100 = arith.addf %91, %99 : vector<4x2x128xf32>
    %101 = vector.extract_strided_slice %24 {offsets = [0, 2, 0, 0], sizes = [4, 1, 2, 128], strides = [1, 1, 1, 1]} : vector<4x16x2x128xf32> to vector<4x1x2x128xf32>
    %102 = vector.shape_cast %101 : vector<4x1x2x128xf32> to vector<4x2x128xf32>
    %103 = vector.shape_cast %102 : vector<4x2x128xf32> to vector<4x1x2x128xf32>
    %104 = vector.shape_cast %100 : vector<4x2x128xf32> to vector<1x4x2x128xf32>
    %105 = vector.broadcast %103 : vector<4x1x2x128xf32> to vector<4x4x2x128xf32>
    %106 = vector.broadcast %104 : vector<1x4x2x128xf32> to vector<4x4x2x128xf32>
    %107 = arith.mulf %105, %106 : vector<4x4x2x128xf32>
    %108 = arith.addf %89, %107 : vector<4x4x2x128xf32>
    %109 = vector.extract_strided_slice %50 {offsets = [0, 384], sizes = [8, 128], strides = [1, 1]} : vector<8x2048xf32> to vector<8x128xf32>
    %110 = vector.shape_cast %109 : vector<8x128xf32> to vector<4x2x128xf32>
    %111 = vector.extract_strided_slice %46 {offsets = [3, 0, 0], sizes = [1, 2, 128], strides = [1, 1, 1]} : vector<16x2x128xf32> to vector<1x2x128xf32>
    %112 = vector.shape_cast %111 : vector<1x2x128xf32> to vector<2x128xf32>
    %113 = vector.shape_cast %112 : vector<2x128xf32> to vector<1x2x128xf32>
    %114 = vector.broadcast %113 : vector<1x2x128xf32> to vector<4x2x128xf32>
    %115 = arith.mulf %114, %30 : vector<4x2x128xf32>
    %cst_27 = arith.constant dense<0.000000e+00> : vector<4x2xf32>
    %116 = vector.multi_reduction <add>, %115, %cst_27 [2] : vector<4x2x128xf32> to vector<4x2xf32>
    %117 = vector.shape_cast %116 : vector<4x2xf32> to vector<4x2x1xf32>
    %118 = vector.broadcast %117 : vector<4x2x1xf32> to vector<4x2x128xf32>
    %119 = arith.addf %110, %118 : vector<4x2x128xf32>
    %120 = vector.extract_strided_slice %24 {offsets = [0, 3, 0, 0], sizes = [4, 1, 2, 128], strides = [1, 1, 1, 1]} : vector<4x16x2x128xf32> to vector<4x1x2x128xf32>
    %121 = vector.shape_cast %120 : vector<4x1x2x128xf32> to vector<4x2x128xf32>
    %122 = vector.shape_cast %121 : vector<4x2x128xf32> to vector<4x1x2x128xf32>
    %123 = vector.shape_cast %119 : vector<4x2x128xf32> to vector<1x4x2x128xf32>
    %124 = vector.broadcast %122 : vector<4x1x2x128xf32> to vector<4x4x2x128xf32>
    %125 = vector.broadcast %123 : vector<1x4x2x128xf32> to vector<4x4x2x128xf32>
    %126 = arith.mulf %124, %125 : vector<4x4x2x128xf32>
    %127 = arith.addf %108, %126 : vector<4x4x2x128xf32>
    %128 = vector.extract_strided_slice %50 {offsets = [0, 512], sizes = [8, 128], strides = [1, 1]} : vector<8x2048xf32> to vector<8x128xf32>
    %129 = vector.shape_cast %128 : vector<8x128xf32> to vector<4x2x128xf32>
    %130 = vector.extract_strided_slice %46 {offsets = [4, 0, 0], sizes = [1, 2, 128], strides = [1, 1, 1]} : vector<16x2x128xf32> to vector<1x2x128xf32>
    %131 = vector.shape_cast %130 : vector<1x2x128xf32> to vector<2x128xf32>
    %132 = vector.shape_cast %131 : vector<2x128xf32> to vector<1x2x128xf32>
    %133 = vector.broadcast %132 : vector<1x2x128xf32> to vector<4x2x128xf32>
    %134 = arith.mulf %133, %30 : vector<4x2x128xf32>
    %cst_28 = arith.constant dense<0.000000e+00> : vector<4x2xf32>
    %135 = vector.multi_reduction <add>, %134, %cst_28 [2] : vector<4x2x128xf32> to vector<4x2xf32>
    %136 = vector.shape_cast %135 : vector<4x2xf32> to vector<4x2x1xf32>
    %137 = vector.broadcast %136 : vector<4x2x1xf32> to vector<4x2x128xf32>
    %138 = arith.addf %129, %137 : vector<4x2x128xf32>
    %139 = vector.extract_strided_slice %24 {offsets = [0, 4, 0, 0], sizes = [4, 1, 2, 128], strides = [1, 1, 1, 1]} : vector<4x16x2x128xf32> to vector<4x1x2x128xf32>
    %140 = vector.shape_cast %139 : vector<4x1x2x128xf32> to vector<4x2x128xf32>
    %141 = vector.shape_cast %140 : vector<4x2x128xf32> to vector<4x1x2x128xf32>
    %142 = vector.shape_cast %138 : vector<4x2x128xf32> to vector<1x4x2x128xf32>
    %143 = vector.broadcast %141 : vector<4x1x2x128xf32> to vector<4x4x2x128xf32>
    %144 = vector.broadcast %142 : vector<1x4x2x128xf32> to vector<4x4x2x128xf32>
    %145 = arith.mulf %143, %144 : vector<4x4x2x128xf32>
    %146 = arith.addf %127, %145 : vector<4x4x2x128xf32>
    %147 = vector.extract_strided_slice %50 {offsets = [0, 640], sizes = [8, 128], strides = [1, 1]} : vector<8x2048xf32> to vector<8x128xf32>
    %148 = vector.shape_cast %147 : vector<8x128xf32> to vector<4x2x128xf32>
    %149 = vector.extract_strided_slice %46 {offsets = [5, 0, 0], sizes = [1, 2, 128], strides = [1, 1, 1]} : vector<16x2x128xf32> to vector<1x2x128xf32>
    %150 = vector.shape_cast %149 : vector<1x2x128xf32> to vector<2x128xf32>
    %151 = vector.shape_cast %150 : vector<2x128xf32> to vector<1x2x128xf32>
    %152 = vector.broadcast %151 : vector<1x2x128xf32> to vector<4x2x128xf32>
    %153 = arith.mulf %152, %30 : vector<4x2x128xf32>
    %cst_29 = arith.constant dense<0.000000e+00> : vector<4x2xf32>
    %154 = vector.multi_reduction <add>, %153, %cst_29 [2] : vector<4x2x128xf32> to vector<4x2xf32>
    %155 = vector.shape_cast %154 : vector<4x2xf32> to vector<4x2x1xf32>
    %156 = vector.broadcast %155 : vector<4x2x1xf32> to vector<4x2x128xf32>
    %157 = arith.addf %148, %156 : vector<4x2x128xf32>
    %158 = vector.extract_strided_slice %24 {offsets = [0, 5, 0, 0], sizes = [4, 1, 2, 128], strides = [1, 1, 1, 1]} : vector<4x16x2x128xf32> to vector<4x1x2x128xf32>
    %159 = vector.shape_cast %158 : vector<4x1x2x128xf32> to vector<4x2x128xf32>
    %160 = vector.shape_cast %159 : vector<4x2x128xf32> to vector<4x1x2x128xf32>
    %161 = vector.shape_cast %157 : vector<4x2x128xf32> to vector<1x4x2x128xf32>
    %162 = vector.broadcast %160 : vector<4x1x2x128xf32> to vector<4x4x2x128xf32>
    %163 = vector.broadcast %161 : vector<1x4x2x128xf32> to vector<4x4x2x128xf32>
    %164 = arith.mulf %162, %163 : vector<4x4x2x128xf32>
    %165 = arith.addf %146, %164 : vector<4x4x2x128xf32>
    %166 = vector.extract_strided_slice %50 {offsets = [0, 768], sizes = [8, 128], strides = [1, 1]} : vector<8x2048xf32> to vector<8x128xf32>
    %167 = vector.shape_cast %166 : vector<8x128xf32> to vector<4x2x128xf32>
    %168 = vector.extract_strided_slice %46 {offsets = [6, 0, 0], sizes = [1, 2, 128], strides = [1, 1, 1]} : vector<16x2x128xf32> to vector<1x2x128xf32>
    %169 = vector.shape_cast %168 : vector<1x2x128xf32> to vector<2x128xf32>
    %170 = vector.shape_cast %169 : vector<2x128xf32> to vector<1x2x128xf32>
    %171 = vector.broadcast %170 : vector<1x2x128xf32> to vector<4x2x128xf32>
    %172 = arith.mulf %171, %30 : vector<4x2x128xf32>
    %cst_30 = arith.constant dense<0.000000e+00> : vector<4x2xf32>
    %173 = vector.multi_reduction <add>, %172, %cst_30 [2] : vector<4x2x128xf32> to vector<4x2xf32>
    %174 = vector.shape_cast %173 : vector<4x2xf32> to vector<4x2x1xf32>
    %175 = vector.broadcast %174 : vector<4x2x1xf32> to vector<4x2x128xf32>
    %176 = arith.addf %167, %175 : vector<4x2x128xf32>
    %177 = vector.extract_strided_slice %24 {offsets = [0, 6, 0, 0], sizes = [4, 1, 2, 128], strides = [1, 1, 1, 1]} : vector<4x16x2x128xf32> to vector<4x1x2x128xf32>
    %178 = vector.shape_cast %177 : vector<4x1x2x128xf32> to vector<4x2x128xf32>
    %179 = vector.shape_cast %178 : vector<4x2x128xf32> to vector<4x1x2x128xf32>
    %180 = vector.shape_cast %176 : vector<4x2x128xf32> to vector<1x4x2x128xf32>
    %181 = vector.broadcast %179 : vector<4x1x2x128xf32> to vector<4x4x2x128xf32>
    %182 = vector.broadcast %180 : vector<1x4x2x128xf32> to vector<4x4x2x128xf32>
    %183 = arith.mulf %181, %182 : vector<4x4x2x128xf32>
    %184 = arith.addf %165, %183 : vector<4x4x2x128xf32>
    %185 = vector.extract_strided_slice %50 {offsets = [0, 896], sizes = [8, 128], strides = [1, 1]} : vector<8x2048xf32> to vector<8x128xf32>
    %186 = vector.shape_cast %185 : vector<8x128xf32> to vector<4x2x128xf32>
    %187 = vector.extract_strided_slice %46 {offsets = [7, 0, 0], sizes = [1, 2, 128], strides = [1, 1, 1]} : vector<16x2x128xf32> to vector<1x2x128xf32>
    %188 = vector.shape_cast %187 : vector<1x2x128xf32> to vector<2x128xf32>
    %189 = vector.shape_cast %188 : vector<2x128xf32> to vector<1x2x128xf32>
    %190 = vector.broadcast %189 : vector<1x2x128xf32> to vector<4x2x128xf32>
    %191 = arith.mulf %190, %30 : vector<4x2x128xf32>
    %cst_31 = arith.constant dense<0.000000e+00> : vector<4x2xf32>
    %192 = vector.multi_reduction <add>, %191, %cst_31 [2] : vector<4x2x128xf32> to vector<4x2xf32>
    %193 = vector.shape_cast %192 : vector<4x2xf32> to vector<4x2x1xf32>
    %194 = vector.broadcast %193 : vector<4x2x1xf32> to vector<4x2x128xf32>
    %195 = arith.addf %186, %194 : vector<4x2x128xf32>
    %196 = vector.extract_strided_slice %24 {offsets = [0, 7, 0, 0], sizes = [4, 1, 2, 128], strides = [1, 1, 1, 1]} : vector<4x16x2x128xf32> to vector<4x1x2x128xf32>
    %197 = vector.shape_cast %196 : vector<4x1x2x128xf32> to vector<4x2x128xf32>
    %198 = vector.shape_cast %197 : vector<4x2x128xf32> to vector<4x1x2x128xf32>
    %199 = vector.shape_cast %195 : vector<4x2x128xf32> to vector<1x4x2x128xf32>
    %200 = vector.broadcast %198 : vector<4x1x2x128xf32> to vector<4x4x2x128xf32>
    %201 = vector.broadcast %199 : vector<1x4x2x128xf32> to vector<4x4x2x128xf32>
    %202 = arith.mulf %200, %201 : vector<4x4x2x128xf32>
    %203 = arith.addf %184, %202 : vector<4x4x2x128xf32>
    %204 = vector.extract_strided_slice %50 {offsets = [0, 1024], sizes = [8, 128], strides = [1, 1]} : vector<8x2048xf32> to vector<8x128xf32>
    %205 = vector.shape_cast %204 : vector<8x128xf32> to vector<4x2x128xf32>
    %206 = vector.extract_strided_slice %46 {offsets = [8, 0, 0], sizes = [1, 2, 128], strides = [1, 1, 1]} : vector<16x2x128xf32> to vector<1x2x128xf32>
    %207 = vector.shape_cast %206 : vector<1x2x128xf32> to vector<2x128xf32>
    %208 = vector.shape_cast %207 : vector<2x128xf32> to vector<1x2x128xf32>
    %209 = vector.broadcast %208 : vector<1x2x128xf32> to vector<4x2x128xf32>
    %210 = arith.mulf %209, %30 : vector<4x2x128xf32>
    %cst_32 = arith.constant dense<0.000000e+00> : vector<4x2xf32>
    %211 = vector.multi_reduction <add>, %210, %cst_32 [2] : vector<4x2x128xf32> to vector<4x2xf32>
    %212 = vector.shape_cast %211 : vector<4x2xf32> to vector<4x2x1xf32>
    %213 = vector.broadcast %212 : vector<4x2x1xf32> to vector<4x2x128xf32>
    %214 = arith.addf %205, %213 : vector<4x2x128xf32>
    %215 = vector.extract_strided_slice %24 {offsets = [0, 8, 0, 0], sizes = [4, 1, 2, 128], strides = [1, 1, 1, 1]} : vector<4x16x2x128xf32> to vector<4x1x2x128xf32>
    %216 = vector.shape_cast %215 : vector<4x1x2x128xf32> to vector<4x2x128xf32>
    %217 = vector.shape_cast %216 : vector<4x2x128xf32> to vector<4x1x2x128xf32>
    %218 = vector.shape_cast %214 : vector<4x2x128xf32> to vector<1x4x2x128xf32>
    %219 = vector.broadcast %217 : vector<4x1x2x128xf32> to vector<4x4x2x128xf32>
    %220 = vector.broadcast %218 : vector<1x4x2x128xf32> to vector<4x4x2x128xf32>
    %221 = arith.mulf %219, %220 : vector<4x4x2x128xf32>
    %222 = arith.addf %203, %221 : vector<4x4x2x128xf32>
    %223 = vector.extract_strided_slice %50 {offsets = [0, 1152], sizes = [8, 128], strides = [1, 1]} : vector<8x2048xf32> to vector<8x128xf32>
    %224 = vector.shape_cast %223 : vector<8x128xf32> to vector<4x2x128xf32>
    %225 = vector.extract_strided_slice %46 {offsets = [9, 0, 0], sizes = [1, 2, 128], strides = [1, 1, 1]} : vector<16x2x128xf32> to vector<1x2x128xf32>
    %226 = vector.shape_cast %225 : vector<1x2x128xf32> to vector<2x128xf32>
    %227 = vector.shape_cast %226 : vector<2x128xf32> to vector<1x2x128xf32>
    %228 = vector.broadcast %227 : vector<1x2x128xf32> to vector<4x2x128xf32>
    %229 = arith.mulf %228, %30 : vector<4x2x128xf32>
    %cst_33 = arith.constant dense<0.000000e+00> : vector<4x2xf32>
    %230 = vector.multi_reduction <add>, %229, %cst_33 [2] : vector<4x2x128xf32> to vector<4x2xf32>
    %231 = vector.shape_cast %230 : vector<4x2xf32> to vector<4x2x1xf32>
    %232 = vector.broadcast %231 : vector<4x2x1xf32> to vector<4x2x128xf32>
    %233 = arith.addf %224, %232 : vector<4x2x128xf32>
    %234 = vector.extract_strided_slice %24 {offsets = [0, 9, 0, 0], sizes = [4, 1, 2, 128], strides = [1, 1, 1, 1]} : vector<4x16x2x128xf32> to vector<4x1x2x128xf32>
    %235 = vector.shape_cast %234 : vector<4x1x2x128xf32> to vector<4x2x128xf32>
    %236 = vector.shape_cast %235 : vector<4x2x128xf32> to vector<4x1x2x128xf32>
    %237 = vector.shape_cast %233 : vector<4x2x128xf32> to vector<1x4x2x128xf32>
    %238 = vector.broadcast %236 : vector<4x1x2x128xf32> to vector<4x4x2x128xf32>
    %239 = vector.broadcast %237 : vector<1x4x2x128xf32> to vector<4x4x2x128xf32>
    %240 = arith.mulf %238, %239 : vector<4x4x2x128xf32>
    %241 = arith.addf %222, %240 : vector<4x4x2x128xf32>
    %242 = vector.extract_strided_slice %50 {offsets = [0, 1280], sizes = [8, 128], strides = [1, 1]} : vector<8x2048xf32> to vector<8x128xf32>
    %243 = vector.shape_cast %242 : vector<8x128xf32> to vector<4x2x128xf32>
    %244 = vector.extract_strided_slice %46 {offsets = [10, 0, 0], sizes = [1, 2, 128], strides = [1, 1, 1]} : vector<16x2x128xf32> to vector<1x2x128xf32>
    %245 = vector.shape_cast %244 : vector<1x2x128xf32> to vector<2x128xf32>
    %246 = vector.shape_cast %245 : vector<2x128xf32> to vector<1x2x128xf32>
    %247 = vector.broadcast %246 : vector<1x2x128xf32> to vector<4x2x128xf32>
    %248 = arith.mulf %247, %30 : vector<4x2x128xf32>
    %cst_34 = arith.constant dense<0.000000e+00> : vector<4x2xf32>
    %249 = vector.multi_reduction <add>, %248, %cst_34 [2] : vector<4x2x128xf32> to vector<4x2xf32>
    %250 = vector.shape_cast %249 : vector<4x2xf32> to vector<4x2x1xf32>
    %251 = vector.broadcast %250 : vector<4x2x1xf32> to vector<4x2x128xf32>
    %252 = arith.addf %243, %251 : vector<4x2x128xf32>
    %253 = vector.extract_strided_slice %24 {offsets = [0, 10, 0, 0], sizes = [4, 1, 2, 128], strides = [1, 1, 1, 1]} : vector<4x16x2x128xf32> to vector<4x1x2x128xf32>
    %254 = vector.shape_cast %253 : vector<4x1x2x128xf32> to vector<4x2x128xf32>
    %255 = vector.shape_cast %254 : vector<4x2x128xf32> to vector<4x1x2x128xf32>
    %256 = vector.shape_cast %252 : vector<4x2x128xf32> to vector<1x4x2x128xf32>
    %257 = vector.broadcast %255 : vector<4x1x2x128xf32> to vector<4x4x2x128xf32>
    %258 = vector.broadcast %256 : vector<1x4x2x128xf32> to vector<4x4x2x128xf32>
    %259 = arith.mulf %257, %258 : vector<4x4x2x128xf32>
    %260 = arith.addf %241, %259 : vector<4x4x2x128xf32>
    %261 = vector.extract_strided_slice %50 {offsets = [0, 1408], sizes = [8, 128], strides = [1, 1]} : vector<8x2048xf32> to vector<8x128xf32>
    %262 = vector.shape_cast %261 : vector<8x128xf32> to vector<4x2x128xf32>
    %263 = vector.extract_strided_slice %46 {offsets = [11, 0, 0], sizes = [1, 2, 128], strides = [1, 1, 1]} : vector<16x2x128xf32> to vector<1x2x128xf32>
    %264 = vector.shape_cast %263 : vector<1x2x128xf32> to vector<2x128xf32>
    %265 = vector.shape_cast %264 : vector<2x128xf32> to vector<1x2x128xf32>
    %266 = vector.broadcast %265 : vector<1x2x128xf32> to vector<4x2x128xf32>
    %267 = arith.mulf %266, %30 : vector<4x2x128xf32>
    %cst_35 = arith.constant dense<0.000000e+00> : vector<4x2xf32>
    %268 = vector.multi_reduction <add>, %267, %cst_35 [2] : vector<4x2x128xf32> to vector<4x2xf32>
    %269 = vector.shape_cast %268 : vector<4x2xf32> to vector<4x2x1xf32>
    %270 = vector.broadcast %269 : vector<4x2x1xf32> to vector<4x2x128xf32>
    %271 = arith.addf %262, %270 : vector<4x2x128xf32>
    %272 = vector.extract_strided_slice %24 {offsets = [0, 11, 0, 0], sizes = [4, 1, 2, 128], strides = [1, 1, 1, 1]} : vector<4x16x2x128xf32> to vector<4x1x2x128xf32>
    %273 = vector.shape_cast %272 : vector<4x1x2x128xf32> to vector<4x2x128xf32>
    %274 = vector.shape_cast %273 : vector<4x2x128xf32> to vector<4x1x2x128xf32>
    %275 = vector.shape_cast %271 : vector<4x2x128xf32> to vector<1x4x2x128xf32>
    %276 = vector.broadcast %274 : vector<4x1x2x128xf32> to vector<4x4x2x128xf32>
    %277 = vector.broadcast %275 : vector<1x4x2x128xf32> to vector<4x4x2x128xf32>
    %278 = arith.mulf %276, %277 : vector<4x4x2x128xf32>
    %279 = arith.addf %260, %278 : vector<4x4x2x128xf32>
    %280 = vector.extract_strided_slice %50 {offsets = [0, 1536], sizes = [8, 128], strides = [1, 1]} : vector<8x2048xf32> to vector<8x128xf32>
    %281 = vector.shape_cast %280 : vector<8x128xf32> to vector<4x2x128xf32>
    %282 = vector.extract_strided_slice %46 {offsets = [12, 0, 0], sizes = [1, 2, 128], strides = [1, 1, 1]} : vector<16x2x128xf32> to vector<1x2x128xf32>
    %283 = vector.shape_cast %282 : vector<1x2x128xf32> to vector<2x128xf32>
    %284 = vector.shape_cast %283 : vector<2x128xf32> to vector<1x2x128xf32>
    %285 = vector.broadcast %284 : vector<1x2x128xf32> to vector<4x2x128xf32>
    %286 = arith.mulf %285, %30 : vector<4x2x128xf32>
    %cst_36 = arith.constant dense<0.000000e+00> : vector<4x2xf32>
    %287 = vector.multi_reduction <add>, %286, %cst_36 [2] : vector<4x2x128xf32> to vector<4x2xf32>
    %288 = vector.shape_cast %287 : vector<4x2xf32> to vector<4x2x1xf32>
    %289 = vector.broadcast %288 : vector<4x2x1xf32> to vector<4x2x128xf32>
    %290 = arith.addf %281, %289 : vector<4x2x128xf32>
    %291 = vector.extract_strided_slice %24 {offsets = [0, 12, 0, 0], sizes = [4, 1, 2, 128], strides = [1, 1, 1, 1]} : vector<4x16x2x128xf32> to vector<4x1x2x128xf32>
    %292 = vector.shape_cast %291 : vector<4x1x2x128xf32> to vector<4x2x128xf32>
    %293 = vector.shape_cast %292 : vector<4x2x128xf32> to vector<4x1x2x128xf32>
    %294 = vector.shape_cast %290 : vector<4x2x128xf32> to vector<1x4x2x128xf32>
    %295 = vector.broadcast %293 : vector<4x1x2x128xf32> to vector<4x4x2x128xf32>
    %296 = vector.broadcast %294 : vector<1x4x2x128xf32> to vector<4x4x2x128xf32>
    %297 = arith.mulf %295, %296 : vector<4x4x2x128xf32>
    %298 = arith.addf %279, %297 : vector<4x4x2x128xf32>
    %299 = vector.extract_strided_slice %50 {offsets = [0, 1664], sizes = [8, 128], strides = [1, 1]} : vector<8x2048xf32> to vector<8x128xf32>
    %300 = vector.shape_cast %299 : vector<8x128xf32> to vector<4x2x128xf32>
    %301 = vector.extract_strided_slice %46 {offsets = [13, 0, 0], sizes = [1, 2, 128], strides = [1, 1, 1]} : vector<16x2x128xf32> to vector<1x2x128xf32>
    %302 = vector.shape_cast %301 : vector<1x2x128xf32> to vector<2x128xf32>
    %303 = vector.shape_cast %302 : vector<2x128xf32> to vector<1x2x128xf32>
    %304 = vector.broadcast %303 : vector<1x2x128xf32> to vector<4x2x128xf32>
    %305 = arith.mulf %304, %30 : vector<4x2x128xf32>
    %cst_37 = arith.constant dense<0.000000e+00> : vector<4x2xf32>
    %306 = vector.multi_reduction <add>, %305, %cst_37 [2] : vector<4x2x128xf32> to vector<4x2xf32>
    %307 = vector.shape_cast %306 : vector<4x2xf32> to vector<4x2x1xf32>
    %308 = vector.broadcast %307 : vector<4x2x1xf32> to vector<4x2x128xf32>
    %309 = arith.addf %300, %308 : vector<4x2x128xf32>
    %310 = vector.extract_strided_slice %24 {offsets = [0, 13, 0, 0], sizes = [4, 1, 2, 128], strides = [1, 1, 1, 1]} : vector<4x16x2x128xf32> to vector<4x1x2x128xf32>
    %311 = vector.shape_cast %310 : vector<4x1x2x128xf32> to vector<4x2x128xf32>
    %312 = vector.shape_cast %311 : vector<4x2x128xf32> to vector<4x1x2x128xf32>
    %313 = vector.shape_cast %309 : vector<4x2x128xf32> to vector<1x4x2x128xf32>
    %314 = vector.broadcast %312 : vector<4x1x2x128xf32> to vector<4x4x2x128xf32>
    %315 = vector.broadcast %313 : vector<1x4x2x128xf32> to vector<4x4x2x128xf32>
    %316 = arith.mulf %314, %315 : vector<4x4x2x128xf32>
    %317 = arith.addf %298, %316 : vector<4x4x2x128xf32>
    %318 = vector.extract_strided_slice %50 {offsets = [0, 1792], sizes = [8, 128], strides = [1, 1]} : vector<8x2048xf32> to vector<8x128xf32>
    %319 = vector.shape_cast %318 : vector<8x128xf32> to vector<4x2x128xf32>
    %320 = vector.extract_strided_slice %46 {offsets = [14, 0, 0], sizes = [1, 2, 128], strides = [1, 1, 1]} : vector<16x2x128xf32> to vector<1x2x128xf32>
    %321 = vector.shape_cast %320 : vector<1x2x128xf32> to vector<2x128xf32>
    %322 = vector.shape_cast %321 : vector<2x128xf32> to vector<1x2x128xf32>
    %323 = vector.broadcast %322 : vector<1x2x128xf32> to vector<4x2x128xf32>
    %324 = arith.mulf %323, %30 : vector<4x2x128xf32>
    %cst_38 = arith.constant dense<0.000000e+00> : vector<4x2xf32>
    %325 = vector.multi_reduction <add>, %324, %cst_38 [2] : vector<4x2x128xf32> to vector<4x2xf32>
    %326 = vector.shape_cast %325 : vector<4x2xf32> to vector<4x2x1xf32>
    %327 = vector.broadcast %326 : vector<4x2x1xf32> to vector<4x2x128xf32>
    %328 = arith.addf %319, %327 : vector<4x2x128xf32>
    %329 = vector.extract_strided_slice %24 {offsets = [0, 14, 0, 0], sizes = [4, 1, 2, 128], strides = [1, 1, 1, 1]} : vector<4x16x2x128xf32> to vector<4x1x2x128xf32>
    %330 = vector.shape_cast %329 : vector<4x1x2x128xf32> to vector<4x2x128xf32>
    %331 = vector.shape_cast %330 : vector<4x2x128xf32> to vector<4x1x2x128xf32>
    %332 = vector.shape_cast %328 : vector<4x2x128xf32> to vector<1x4x2x128xf32>
    %333 = vector.broadcast %331 : vector<4x1x2x128xf32> to vector<4x4x2x128xf32>
    %334 = vector.broadcast %332 : vector<1x4x2x128xf32> to vector<4x4x2x128xf32>
    %335 = arith.mulf %333, %334 : vector<4x4x2x128xf32>
    %336 = arith.addf %317, %335 : vector<4x4x2x128xf32>
    %337 = vector.extract_strided_slice %50 {offsets = [0, 1920], sizes = [8, 128], strides = [1, 1]} : vector<8x2048xf32> to vector<8x128xf32>
    %338 = vector.shape_cast %337 : vector<8x128xf32> to vector<4x2x128xf32>
    %339 = vector.extract_strided_slice %46 {offsets = [15, 0, 0], sizes = [1, 2, 128], strides = [1, 1, 1]} : vector<16x2x128xf32> to vector<1x2x128xf32>
    %340 = vector.shape_cast %339 : vector<1x2x128xf32> to vector<2x128xf32>
    %341 = vector.shape_cast %340 : vector<2x128xf32> to vector<1x2x128xf32>
    %342 = vector.broadcast %341 : vector<1x2x128xf32> to vector<4x2x128xf32>
    %343 = arith.mulf %342, %30 : vector<4x2x128xf32>
    %cst_39 = arith.constant dense<0.000000e+00> : vector<4x2xf32>
    %344 = vector.multi_reduction <add>, %343, %cst_39 [2] : vector<4x2x128xf32> to vector<4x2xf32>
    %345 = vector.shape_cast %344 : vector<4x2xf32> to vector<4x2x1xf32>
    %346 = vector.broadcast %345 : vector<4x2x1xf32> to vector<4x2x128xf32>
    %347 = arith.addf %338, %346 : vector<4x2x128xf32>
    %348 = vector.extract_strided_slice %24 {offsets = [0, 15, 0, 0], sizes = [4, 1, 2, 128], strides = [1, 1, 1, 1]} : vector<4x16x2x128xf32> to vector<4x1x2x128xf32>
    %349 = vector.shape_cast %348 : vector<4x1x2x128xf32> to vector<4x2x128xf32>
    %350 = vector.shape_cast %349 : vector<4x2x128xf32> to vector<4x1x2x128xf32>
    %351 = vector.shape_cast %347 : vector<4x2x128xf32> to vector<1x4x2x128xf32>
    %352 = vector.broadcast %350 : vector<4x1x2x128xf32> to vector<4x4x2x128xf32>
    %353 = vector.broadcast %351 : vector<1x4x2x128xf32> to vector<4x4x2x128xf32>
    %354 = arith.mulf %352, %353 : vector<4x4x2x128xf32>
    %355 = arith.addf %336, %354 : vector<4x4x2x128xf32>
    %356 = vector.shape_cast %355 : vector<4x4x2x128xf32> to vector<32x128xf32>
    %357 = arith.truncf %356 : vector<32x128xf32> to vector<32x128xbf16>
    %c0_40 = arith.constant 0 : index
    %c0_41 = arith.constant 0 : index
    %358 = vector.load %arg8[%c0_40, %c0_41] : memref<128x128xbf16, #tpu.memory_space<vmem>>, vector<128x128xbf16>
    %cst_42 = arith.constant dense<0.000000e+00> : vector<32x128xf32>
    %359 = tpu.matmul %357, %358, %cst_42 {dimension_numbers = #tpu.dot_dimension_numbers<[1], [0], [0], [1], [0, 0, 1, 1], [], []>} : vector<32x128xbf16>, vector<128x128xbf16>, vector<32x128xf32> -> vector<32x128xf32>
    %360 = vector.shape_cast %359 : vector<32x128xf32> to vector<16x2x128xf32>
    %c0_43 = arith.constant 0 : index
    %c0_44 = arith.constant 0 : index
    %361 = vector.load %arg9[%c0_43, %c0_44] : memref<16x1xf32, #tpu.memory_space<vmem>>, vector<16x1xf32>
    %362 = vector.shape_cast %361 : vector<16x1xf32> to vector<16x1x1xf32>
    %363 = vector.broadcast %362 : vector<16x1x1xf32> to vector<16x2x128xf32>
    %364 = arith.mulf %360, %363 : vector<16x2x128xf32>
    %c0_45 = arith.constant 0 : index
    %c0_46 = arith.constant 0 : index
    %365 = vector.load %arg10[%c0_45, %c0_46] : memref<16x1xf32, #tpu.memory_space<vmem>>, vector<16x1xf32>
    %366 = vector.shape_cast %365 : vector<16x1xf32> to vector<16x1x1xf32>
    %367 = vector.broadcast %366 : vector<16x1x1xf32> to vector<16x2x128xf32>
    %368 = arith.addf %364, %367 : vector<16x2x128xf32>
    %cst_47 = arith.constant 0.000000e+00 : f32
    %369 = vector.broadcast %cst_47 : f32 to vector<16x2x128xf32>
    %370 = arith.maximumf %368, %369 : vector<16x2x128xf32>
    %371 = vector.shape_cast %370 : vector<16x2x128xf32> to vector<16x256xf32>
    %372 = arith.truncf %371 : vector<16x256xf32> to vector<16x256xbf16>
    %c0_48 = arith.constant 0 : index
    %c0_49 = arith.constant 0 : index
    %373 = vector.load %arg11[%c0_48, %c0_49] : memref<64x16xbf16, #tpu.memory_space<vmem>>, vector<64x16xbf16>
    %cst_50 = arith.constant dense<0.000000e+00> : vector<64x256xf32>
    %374 = tpu.matmul %373, %372, %cst_50 {dimension_numbers = #tpu.dot_dimension_numbers<[1], [0], [0], [1], [0, 0, 1, 1], [], []>} : vector<64x16xbf16>, vector<16x256xbf16>, vector<64x256xf32> -> vector<64x256xf32>
    %375 = arith.addf %374, %14 : vector<64x256xf32>
    %c0_51 = arith.constant 0 : index
    %c0_52 = arith.constant 0 : index
    %376 = vector.load %arg12[%c0_51, %c0_52] : memref<64x1xf32, #tpu.memory_space<vmem>>, vector<64x1xf32>
    %377 = vector.broadcast %376 : vector<64x1xf32> to vector<64x256xf32>
    %378 = arith.addf %375, %377 : vector<64x256xf32>
    %cst_53 = arith.constant 0.000000e+00 : f32
    %379 = vector.broadcast %cst_53 : f32 to vector<64x256xf32>
    %380 = arith.maximumf %378, %379 : vector<64x256xf32>
    %381 = vector.extract_strided_slice %380 {offsets = [0, 0], sizes = [64, 128], strides = [1, 1]} : vector<64x256xf32> to vector<64x128xf32>
    %c0_54 = arith.constant 0 : index
    %c0_55 = arith.constant 0 : index
    %c0_56 = arith.constant 0 : index
    %382 = vector.load %arg13[%c0_54, %c0_55, %c0_56] : memref<2x64x128xf32, #tpu.memory_space<vmem>>, vector<1x64x128xf32>
    %383 = vector.shape_cast %382 : vector<1x64x128xf32> to vector<64x128xf32>
    %384 = vector.shape_cast %381 : vector<64x128xf32> to vector<1x64x128xf32>
    tpu.vector_store %arg13[%c0_54, %c0_55, %c0_56], %384 {strides = array<i32>} : memref<2x64x128xf32, #tpu.memory_space<vmem>>, vector<1x64x128xf32>,
    %385 = vector.extract_strided_slice %380 {offsets = [0, 128], sizes = [64, 128], strides = [1, 1]} : vector<64x256xf32> to vector<64x128xf32>
    %c1_57 = arith.constant 1 : index
    %c0_58 = arith.constant 0 : index
    %c0_59 = arith.constant 0 : index
    %386 = vector.load %arg13[%c1_57, %c0_58, %c0_59] : memref<2x64x128xf32, #tpu.memory_space<vmem>>, vector<1x64x128xf32>
    %387 = vector.shape_cast %386 : vector<1x64x128xf32> to vector<64x128xf32>
    %388 = vector.shape_cast %385 : vector<64x128xf32> to vector<1x64x128xf32>
    tpu.vector_store %arg13[%c1_57, %c0_58, %c0_59], %388 {strides = array<i32>} : memref<2x64x128xf32, #tpu.memory_space<vmem>>, vector<1x64x128xf32>,
    return
  }
  func.func @transform_0(%arg0: i32) -> (i32, i32) {
    %c0_i32 = arith.constant 0 : i32
    %c0_i32_0 = arith.constant 0 : i32
    %c0_i32_1 = arith.constant 0 : i32
    return %c0_i32, %c0_i32_0 : i32, i32
  }
  func.func @transform_1(%arg0: i32) -> (i32, i32, i32) {
    %c0_i32 = arith.constant 0 : i32
    %c0_i32_0 = arith.constant 0 : i32
    %c0_i32_1 = arith.constant 0 : i32
    return %arg0, %c0_i32, %c0_i32_0 : i32, i32, i32
  }
  func.func @transform_2(%arg0: i32) -> (i32, i32) {
    %c0_i32 = arith.constant 0 : i32
    %c0_i32_0 = arith.constant 0 : i32
    %c0_i32_1 = arith.constant 0 : i32
    return %c0_i32, %c0_i32_0 : i32, i32
  }
  func.func @transform_3(%arg0: i32) -> (i32, i32) {
    %c0_i32 = arith.constant 0 : i32
    %c0_i32_0 = arith.constant 0 : i32
    %c0_i32_1 = arith.constant 0 : i32
    return %c0_i32, %c0_i32_0 : i32, i32
  }
  func.func @transform_4(%arg0: i32) -> (i32, i32) {
    %c0_i32 = arith.constant 0 : i32
    %c0_i32_0 = arith.constant 0 : i32
    %c0_i32_1 = arith.constant 0 : i32
    return %c0_i32, %c0_i32_0 : i32, i32
  }
  func.func @transform_5(%arg0: i32) -> (i32, i32) {
    %c0_i32 = arith.constant 0 : i32
    %c0_i32_0 = arith.constant 0 : i32
    %c0_i32_1 = arith.constant 0 : i32
    return %c0_i32, %c0_i32_0 : i32, i32
  }
  func.func @transform_6(%arg0: i32) -> (i32, i32) {
    %c0_i32 = arith.constant 0 : i32
    %c0_i32_0 = arith.constant 0 : i32
    %c0_i32_1 = arith.constant 0 : i32
    return %c0_i32, %c0_i32_0 : i32, i32
  }
  func.func @transform_7(%arg0: i32) -> (i32, i32) {
    %c0_i32 = arith.constant 0 : i32
    %c0_i32_0 = arith.constant 0 : i32
    %c0_i32_1 = arith.constant 0 : i32
    return %c0_i32, %c0_i32_0 : i32, i32
  }
  func.func @transform_8(%arg0: i32) -> (i32, i32) {
    %c0_i32 = arith.constant 0 : i32
    %c0_i32_0 = arith.constant 0 : i32
    %c0_i32_1 = arith.constant 0 : i32
    return %c0_i32, %c0_i32_0 : i32, i32
  }
  func.func @transform_9(%arg0: i32) -> (i32, i32) {
    %c0_i32 = arith.constant 0 : i32
    %c0_i32_0 = arith.constant 0 : i32
    %c0_i32_1 = arith.constant 0 : i32
    return %c0_i32, %c0_i32_0 : i32, i32
  }
  func.func @transform_10(%arg0: i32) -> (i32, i32) {
    %c0_i32 = arith.constant 0 : i32
    %c0_i32_0 = arith.constant 0 : i32
    %c0_i32_1 = arith.constant 0 : i32
    return %c0_i32, %c0_i32_0 : i32, i32
  }
  func.func @transform_11(%arg0: i32) -> (i32, i32) {
    %c0_i32 = arith.constant 0 : i32
    %c0_i32_0 = arith.constant 0 : i32
    %c0_i32_1 = arith.constant 0 : i32
    return %c0_i32, %c0_i32_0 : i32, i32
  }
  func.func @transform_12(%arg0: i32) -> (i32, i32, i32) {
    %c0_i32 = arith.constant 0 : i32
    %c0_i32_0 = arith.constant 0 : i32
    %c0_i32_1 = arith.constant 0 : i32
    return %arg0, %c0_i32, %c0_i32_0 : i32, i32, i32
  }
}

</mosaic_0001>

<bundles_post_ra>
// kernel: fwd.1
= control target key start
LH: loop header
LB: loop body
LE: loop exit
PB: predicated region body
PF: predicated region fallthrough
CT: control target
= control target key end

     0   :  { %vm98_vm0 = vcmask 1043456   ;;  %v8023_v2 = vmov 0   ;;  %vm82_vm1 = vcmask 64512   ;;  %vm315_vm2 = vcmask 130048   ;;  %s8010_s1 = inlined_call_operand.vmem [shape: f32[2,8,128], index: 1, kind: input, shape index: {}]   ;;  %s8011_s2 = inlined_call_operand.vmem [shape: bf16[80,8], index: 2, kind: input, shape index: {}]   ;;  %s8012_s3 = inlined_call_operand.vmem [shape: f32[16,1], index: 3, kind: input, shape index: {}]   ;;  %s8013_s5 = inlined_call_operand.vmem [shape: f32[84,1], index: 5, kind: input, shape index: {}]   ;;  %s8014_s4 = inlined_call_operand.vmem [shape: bf16[84,16], index: 4, kind: input, shape index: {}]   ;;  %s8015_s6 = inlined_call_operand.vmem [shape: bf16[128,2048], index: 6, kind: input, shape index: {}]   ;;  %s8016_s0 = inlined_call_operand.vmem [shape: f32[1,128], index: 0, kind: input, shape index: {}]   ;;  %s8017_s8 = inlined_call_operand.vmem [shape: f32[16,1], index: 8, kind: input, shape index: {}]   ;;  %s8018_s9 = inlined_call_operand.vmem [shape: f32[16,1], index: 9, kind: input, shape index: {}]   ;;  %s8019_s7 = inlined_call_operand.vmem [shape: bf16[128,128], index: 7, kind: input, shape index: {}]   ;;  %s8020_s11 = inlined_call_operand.vmem [shape: f32[64,1], index: 11, kind: input, shape index: {}]   ;;  %s8021_s10 = inlined_call_operand.vmem [shape: bf16[64,16], index: 10, kind: input, shape index: {}]   ;;  %s8022_s12 = inlined_call_operand.vmem [shape: f32[2,64,128], index: 12, kind: output, shape index: {}]  }
   0x1   :  { %v4806_v0 = vld [vmem:[%s8010_s1 + $0x8] sm:$0xff]  ;;  %v42_v1 = vld [vmem:[%s8010_s1] sm:$0xff]  ;;  %137 = vmatprep.mubr.bf16.mxu0 %v8023_v2  ;;  %5037 = vset.pattern.permute.xlu0 %v8023_v2  ;;  %v227_v11 = vld [vmem:[%s8013_s5 + $0x30] sm:$0xff]  ;;  %vm1151_vm5 = vcmask 1041408  }
   0x2   :  { %v46_v3 = vpack.c.bf16 %v4806_v0, %v4806_v0  ;;  %v45_v4 = vpack.c.bf16 %v42_v1, %v42_v1  ;;  %v188_v5 = vld [vmem:[%s8012_s3] sm:$0xff]  ;;  %366 = vmatprep.mubr.bf16.mxu1 %v8023_v2  ;;  %5038 = vset.pattern.permute.xlu1 %v8023_v2  ;;  %v189_v8 = vld [vmem:[%s8012_s3 + $0x8] sm:$0xff]  ;;  %v231_v13 = vld [vmem:[%s8013_s5 + $0x50] sm:$0xf] }
   0x3   :  { %192 = vperm.xlu0 %5037, %v188_v5   ;;  %v5039_v7 = vld [vmem:[%s8011_s2] sm:$0xff]   ;;  %v230_v9 = vld [vmem:[%s8013_s5 + $0x48] sm:$0xff]  ;;  %284 = vperm.xlu1 %5038, %v231_v13   ;;  %v223_v15 = vld [vmem:[%s8013_s5 + $0x10] sm:$0xff] }
   0x4   :  { %4812 = vmatprep.subr.msk.bf16.mxu0 %vm98_vm0, %v46_v3  ;;  %v100_v6 = vsel %vm98_vm0, %v45_v4, 0  ;;  %v221_v10 = vld [vmem:[%s8013_s5] sm:$0xff]  ;;  %v222_v12 = vld [vmem:[%s8013_s5 + $0x8] sm:$0xff]  ;;  %v224_v17 = vld [vmem:[%s8013_s5 + $0x18] sm:$0xff] }
   0x5   :  { %106 = vmatpush1.bf16.msra.mxu0 %v100_v6  ;;  %v229_v14 = vld [vmem:[%s8013_s5 + $0x40] sm:$0xff]  ;;  %v5041_v35 = vld [vmem:[%s8014_s4 + $0x8] sm:$0xff]   ;;  %v5042_v36 = vld [vmem:[%s8014_s4 + $0x10] sm:$0xff]  }
   0x6   :  { %v225_v16 = vld [vmem:[%s8013_s5 + $0x20] sm:$0xff]  ;;  %v5043_v37 = vld [vmem:[%s8014_s4 + $0x18] sm:$0xff]   ;;  %v5045_v39 = vld [vmem:[%s8014_s4 + $0x28] ss:$0 sps:$4 sm:$0x33]  }
   0x7   :  { %197 = vperm.xlu0 %5037, %v189_v8   ;;  %274 = vperm.xlu1 %5038, %v229_v14   ;;  %v5040_v34 = vld [vmem:[%s8014_s4] sm:$0xff]   ;;  %v1353_v42 = vld [vmem:[%s8015_s6 + $0x10] sm:$0xff]  ;;  %v5046_v48 = vld [vmem:[%s8011_s2 + $0x8] sm:$0xff]  }
   0x8   :  { %4813 = vmatmul.mubr.msk.bf16.vlgmr.msra.gmra.mrb[0].mxu0 %vm82_vm1, %v5039_v7  ;;  %v5044_v38 = vld [vmem:[%s8014_s4 + $0x20] sm:$0xff]   ;;  %v1361_v44 = vld [vmem:[%s8015_s6 + $0x50] sm:$0xff] }
   0x9   :  { %147 = vmatprep.mubr.bf16.mxu0 %v8023_v2  ;;  %v1351_v40 = vld [vmem:[%s8015_s6] sm:$0xff]  ;;  %v4834_v46 = vcombine.low %v1353_v42, %v1361_v44  ;;  %v4835_v47 = vcombine.high %v1353_v42, %v1361_v44  ;;  %v1369_v51 = vld [vmem:[%s8015_s6 + $0x90] sm:$0xff] }
   0xa   :  { %v1359_v41 = vld [vmem:[%s8015_s6 + $0x40] sm:$0xff]  ;;  %v1377_v53 = vld [vmem:[%s8015_s6 + $0xd0] sm:$0xff] }
   0xb   :  { %279 = vperm.xlu0 %5037, %v230_v9   ;;  %244 = vperm.xlu1 %5038, %v223_v15   ;;  %v4831_v43 = vcombine.high %v1351_v40, %v1359_v41  ;;  %v4830_v45 = vcombine.low %v1351_v40, %v1359_v41  ;;  %v1367_v49 = vld [vmem:[%s8015_s6 + $0x80] sm:$0xff]  ;;  %v4850_v55 = vcombine.low %v1369_v51, %v1377_v53  ;;  %v1385_v59 = vld [vmem:[%s8015_s6 + $0x110] sm:$0xff] }
   0xc   :  { %2201 = vmatprep.subr.bf16.mxu0 %v4835_v47  ;;  %v1375_v50 = vld [vmem:[%s8015_s6 + $0xc0] sm:$0xff]  ;;  %v4851_v56 = vcombine.high %v1369_v51, %v1377_v53  ;;  %v1393_v61 = vld [vmem:[%s8015_s6 + $0x150] sm:$0xff] }
   0xd   :  { %2202 = vmatpush1.bf16.msra.mxu0 %v4834_v46  ;;  %v4847_v52 = vcombine.high %v1367_v49, %v1375_v50  ;;  %v4846_v54 = vcombine.low %v1367_v49, %v1375_v50  ;;  %v1383_v57 = vld [vmem:[%s8015_s6 + $0x100] sm:$0xff]  ;;  %v4866_v63 = vcombine.low %v1385_v59, %v1393_v61  ;;  %v4867_v0 = vcombine.high %v1385_v59, %v1393_v61  ;;  %v5047_v1 = vld [vmem:[%s8011_s2 + $0x10] sm:$0xff]   ;;  %v5402_v46 = vld [vmem:[%s8015_s6 + $0x48] sm:$0xff] }
   0xe   :  { %2203 = vmatprep.subr.bf16.mxu0 %v4851_v56  ;;  %v1391_v58 = vld [vmem:[%s8015_s6 + $0x140] sm:$0xff]  ;;  %v1401_v5 = vld [vmem:[%s8015_s6 + $0x190] sm:$0xff]  ;;  %v5131_v56 = vmov 1983009808  }
   0xf   :  { %234 = vperm.xlu0 %5037, %v221_v10   ;;  %254 = vperm.xlu1 %5038, %v225_v16   ;;  %v4863_v60 = vcombine.high %v1383_v57, %v1391_v58  ;;  %v4862_v62 = vcombine.low %v1383_v57, %v1391_v58  ;;  %v1399_v3 = vld [vmem:[%s8015_s6 + $0x180] sm:$0xff]  ;;  %v1409_v7 = vld [vmem:[%s8015_s6 + $0x1d0] sm:$0xff]  ;;  %v428_v57 = vunpack.c.l.s4 %v5131_v56  ;;  %v430_v58 = vlaneseq }
  0x10   :  { %4814 = vmatmul.mubr.msk.bf16.gmra.mrb[4].mxu0 %vm82_vm1, %v5046_v48  ;;  %v1407_v4 = vld [vmem:[%s8015_s6 + $0x1c0] sm:$0xff]  ;;  %v4882_v9 = vcombine.low %v1401_v5, %v1409_v7  ;;  %v4883_v10 = vcombine.high %v1401_v5, %v1409_v7  ;;  %v1417_v13 = vld [vmem:[%s8015_s6 + $0x210] sm:$0xff] }
  0x11   :  { %157 = vmatprep.mubr.bf16.mxu0 %v8023_v2  ;;  %2204 = vmatpush1.bf16.msra.mxu0 %v4850_v55  ;;  %v4879_v6 = vcombine.high %v1399_v3, %v1407_v4  ;;  %v4878_v8 = vcombine.low %v1399_v3, %v1407_v4  ;;  %v1425_v15 = vld [vmem:[%s8015_s6 + $0x250] sm:$0xff]  ;;  %v5407_v47 = vld [vmem:[%s8015_s6 + $0x20] sm:$0xff]  ;;  %v5428_v61 = vshrl.u32 %v430_v58, 7 }
  0x12   :  { %2205 = vmatprep.subr.bf16.mxu0 %v4867_v0  ;;  %v1473_v42 = vld [vmem:[%s8015_s6 + $0x3d0] sm:$0xff]  ;;  %v5416_v50 = vld [vmem:[%s8015_s6 + $0x60] sm:$0xff] }
  0x13   :  { %264 = vperm.xlu0 %5037, %v227_v11   ;;  %249 = vperm.xlu1 %5038, %v224_v17   ;;  %v1415_v11 = vld [vmem:[%s8015_s6 + $0x200] sm:$0xff]  ;;  %v4898_v17 = vcombine.low %v1417_v13, %v1425_v15  ;;  %8199 = vst [vmem:[#allocation2_spill] sm:$0xff] %v5428_v61 }
  0x15   :  { %2206 = vmatpush1.bf16.msra.mxu0 %v4866_v63 }
  0x16   :  { %2207 = vmatprep.subr.bf16.mxu0 %v4883_v10 }
  0x17   :  { %239 = vperm.xlu0 %5037, %v222_v12   ;;  %v1423_v12 = vld [vmem:[%s8015_s6 + $0x240] sm:$0xff] }
  0x18   :  { %4815 = vmatmul.mubr.msk.bf16.gmra.mrb[8].mxu0 %vm82_vm1, %v5047_v1  ;;  %v4895_v14 = vcombine.high %v1415_v11, %v1423_v12  ;;  %v4894_v16 = vcombine.low %v1415_v11, %v1423_v12 }
  0x19   :  { %167 = vmatprep.mubr.bf16.mxu0 %v8023_v2  ;;  %2208 = vmatpush1.bf16.msra.mxu0 %v4882_v9 }
  0x82   :  { %v193_v18 = vpop.permute.xlu0 %192 }
  0x86   :  { %v198_v22 = vpop.permute.xlu0 %197 }
  0x8a   :  { %v5422_v53 = vpop.permute.xlu0 %279 }
  0x8e   :  { %v235_v55 = vpop.permute.xlu0 %234 }
  0xdb   :  { %v139_v19 = vpop.f32.mrb[0].mxu0 }
  0xdc   :  { %v200_v20 = vadd.f32 %v193_v18, %v139_v19  ;;  %v141_v21 = vpop.f32.mrb[1].mxu0  ;;  %v5048_v19 = vld [vmem:[%s8011_s2 + $0x18] sm:$0xff]  }
  0xdd   :  { %v201_v23 = vadd.f32 %v193_v18, %v141_v21  ;;  %v143_v24 = vpop.f32.mrb[2].mxu0  ;;  %v4899_v18 = vcombine.high %v1417_v13, %v1425_v15  ;;  %4816 = vmatmul.mubr.msk.bf16.gmra.mrb[12].mxu0 %vm82_vm1, %v5048_v19  ;;  %v1439_v21 = vld [vmem:[%s8015_s6 + $0x2c0] sm:$0xff] }
  0xde   :  { %v202_v25 = vadd.f32 %v198_v22, %v143_v24  ;;  %v145_v26 = vpop.f32.mrb[3].mxu0  ;;  %v204_v28 = vmax.f32 %v200_v20, 0.0  ;;  %v1431_v20 = vld [vmem:[%s8015_s6 + $0x280] sm:$0xff]  ;;  %v1441_v24 = vld [vmem:[%s8015_s6 + $0x2d0] sm:$0xff]  ;;  %177 = vmatprep.mubr.bf16.mxu0 %v8023_v2 }
  0xdf   :  { %v203_v27 = vadd.f32 %v198_v22, %v145_v26  ;;  %v205_v30 = vmax.f32 %v201_v23, 0.0  ;;  %2209 = vmatprep.subr.bf16.mxu0 %v4899_v18  ;;  %v1433_v22 = vld [vmem:[%s8015_s6 + $0x290] sm:$0xff]  ;;  %v4911_v23 = vcombine.high %v1431_v20, %v1439_v21 }
  0xe0   :  { %v206_v29 = vmax.f32 %v202_v25, 0.0  ;;  %2210 = vmatpush1.bf16.msra.mxu0 %v4898_v17  ;;  %v4910_v25 = vcombine.low %v1431_v20, %v1439_v21  ;;  %v4914_v26 = vcombine.low %v1433_v22, %v1441_v24 }
  0xe1   :  { %v207_v31 = vmax.f32 %v203_v27, 0.0  ;;  %v4915_v27 = vcombine.high %v1433_v22, %v1441_v24 }
  0xe2   :  { %v219_v32 = vpack.c.bf16 %v206_v29, %v204_v28  ;;  %v1447_v28 = vld [vmem:[%s8015_s6 + $0x300] sm:$0xff] }
  0xe3   :  { %v220_v33 = vpack.c.bf16 %v207_v31, %v205_v30  ;;  %2211 = vmatprep.subr.bf16.mxu0 %v4915_v27  ;;  %v1455_v29 = vld [vmem:[%s8015_s6 + $0x340] sm:$0xff]  ;;  %v1449_v30 = vld [vmem:[%s8015_s6 + $0x310] sm:$0xff] }
  0xe4   :  { %2212 = vmatpush1.bf16.msra.mxu0 %v4914_v26  ;;  %v4926_v31 = vcombine.low %v1447_v28, %v1455_v29 }
  0xe5   :  { %334 = vmatprep.subr.bf16.mxu1 %v220_v33  ;;  %v1457_v33 = vld [vmem:[%s8015_s6 + $0x350] sm:$0xff] }
  0xe6   :  { %335 = vmatpush1.bf16.msra.mxu1 %v219_v32  ;;  %v4927_v32 = vcombine.high %v1447_v28, %v1455_v29 }
  0xe7   :  { %2119 = vmatprep.subr.bf16.mxu1 %v4831_v43 }
  0xe9   :  { %4824 = vmatmul.mubr.msk.bf16.vlgmr.msra.gmra.mrb[0].mxu1 %vm315_vm2, %v5040_v34  ;;  %v5049_v34 = vld [vmem:[%s8011_s2 + $0x20] sm:$0xff]  }
  0xea   :  { %376 = vmatprep.mubr.bf16.mxu1 %v8023_v2  ;;  %2120 = vmatpush1.bf16.msra.mxu1 %v4830_v45  ;;  %v5397_v45 = vld [vmem:[%s8015_s6 + $0x8] sm:$0xff] }
  0xeb   :  { %2121 = vmatprep.subr.bf16.mxu1 %v4847_v52  ;;  %4817 = vmatmul.mubr.msk.bf16.gmra.mrb[16].mxu0 %vm82_vm1, %v5049_v34  ;;  %v4833_v49 = vcombine.high %v5397_v45, %v5402_v46  ;;  %v4839_v52 = vcombine.high %v5407_v47, %v5416_v50 }
  0xec   :  { %2233 = vmatprep.mubr.bf16.mxu0 %v8023_v2 }
  0xee   :  { %2122 = vmatpush1.bf16.msra.mxu1 %v4846_v54  ;;  %v5424_v54 = vpop.permute.xlu1 %284 }
  0xef   :  { %2123 = vmatprep.subr.bf16.mxu1 %v4863_v60  ;;  %v429_v60 = vunpack.c.0.s8 %v428_v57 }
  0xf1   :  { %4825 = vmatmul.mubr.msk.bf16.gmra.mrb[4].mxu1 %vm315_vm2, %v5041_v35  ;;  %v4930_v35 = vcombine.low %v1449_v30, %v1457_v33  ;;  %v5433_v0 = vsub.s32 %v429_v60, %v5428_v61 }
  0xf2   :  { %386 = vmatprep.mubr.bf16.mxu1 %v8023_v2  ;;  %2124 = vmatpush1.bf16.msra.mxu1 %v4862_v62  ;;  %v5426_v59 = vpop.permute.xlu1 %274  ;;  %v5430_v62 = vpop.permute.xlu0 %264 }
  0xf3   :  { %2125 = vmatprep.subr.bf16.mxu1 %v4879_v6  ;;  %8200 = vst [vmem:[#allocation3_spill] sm:$0xff] %v5433_v0 }
  0xf6   :  { %2126 = vmatpush1.bf16.msra.mxu1 %v4878_v8  ;;  %v245_v63 = vpop.permute.xlu1 %244  ;;  %v240_v5 = vpop.permute.xlu0 %239  ;;  %v8027_v8 = vmov 0.0  }
  0xf7   :  { %2127 = vmatprep.subr.bf16.mxu1 %v4895_v14 }
  0xf9   :  { %4826 = vmatmul.mubr.msk.bf16.gmra.mrb[8].mxu1 %vm315_vm2, %v5042_v36  ;;  %v4931_v36 = vcombine.high %v1449_v30, %v1457_v33 }
  0xfa   :  { %396 = vmatprep.mubr.bf16.mxu1 %v8023_v2  ;;  %2128 = vmatpush1.bf16.msra.mxu1 %v4894_v16  ;;  %v255_v16 = vpop.permute.xlu1 %254 }
  0xfb   :  { %2129 = vmatprep.subr.bf16.mxu1 %v4911_v23  ;;  %2213 = vmatprep.subr.bf16.mxu0 %v4931_v36 }
  0xfc   :  { %2214 = vmatpush1.bf16.msra.mxu0 %v4930_v35 }
  0xfe   :  { %2130 = vmatpush1.bf16.msra.mxu1 %v4910_v25  ;;  %v250_v35 = vpop.permute.xlu1 %249 }
  0xff   :  { %2131 = vmatprep.subr.bf16.mxu1 %v4927_v32 }
 0x101   :  { %4827 = vmatmul.mubr.msk.bf16.gmra.mrb[12].mxu1 %vm315_vm2, %v5043_v37  ;;  %v1463_v37 = vld [vmem:[%s8015_s6 + $0x380] sm:$0xff] }
 0x102   :  { %406 = vmatprep.mubr.bf16.mxu1 %v8023_v2  ;;  %2132 = vmatpush1.bf16.msra.mxu1 %v4926_v31 }
 0x109   :  { %4828 = vmatmul.mubr.msk.bf16.gmra.mrb[16].mxu1 %vm315_vm2, %v5044_v38  ;;  %v1471_v38 = vld [vmem:[%s8015_s6 + $0x3c0] sm:$0xff] }
 0x10a   :  { %416 = vmatprep.mubr.bf16.mxu1 %v8023_v2  ;;  %v4942_v40 = vcombine.low %v1463_v37, %v1471_v38  ;;  %v4943_v41 = vcombine.high %v1463_v37, %v1471_v38 }
 0x10c   :  { %2133 = vmatprep.subr.bf16.mxu1 %v4943_v41 }
 0x10d   :  { %2134 = vmatpush1.bf16.msra.mxu1 %v4942_v40 }
 0x10e   :  { %2160 = vmatprep.subr.bf16.mxu1 %v4833_v49 }
 0x111   :  { %4829 = vmatmul.mubr.msk.bf16.gmra.mrb[20].mxu1 %vm315_vm2, %v5045_v39  ;;  %v1465_v39 = vld [vmem:[%s8015_s6 + $0x390] sm:$0xff] }
 0x112   :  { %2151 = vmatprep.mubr.bf16.mxu1 %v8023_v2  ;;  %v4946_v43 = vcombine.low %v1465_v39, %v1473_v42  ;;  %v4947_v44 = vcombine.high %v1465_v39, %v1473_v42 }
 0x114   :  { %2215 = vmatprep.subr.bf16.mxu0 %v4947_v44 }
 0x115   :  { %2216 = vmatpush1.bf16.msra.mxu0 %v4946_v43 }
 0x116   :  { %2283 = vmatprep.subr.bf16.mxu0 %v4839_v52 }
 0x1bc   :  { %v368_v1 = vpop.f32.mrb[0].mxu1 }
 0x1bd   :  { %v369_v3 = vadd.f32 %v368_v1, %v235_v55  ;;  %v370_v4 = vpop.f32.mrb[1].mxu1 }
 0x1be   :  { %v371_v6 = vadd.f32 %v370_v4, %v235_v55  ;;  %v372_v7 = vpop.f32.mrb[2].mxu1 }
 0x1bf   :  { %v426_v9 = vcombine.high %v369_v3, %v8027_v8  ;;  %v5437_v10 = vrot.slane %v369_v3, %v5433_v0  ;;  %v373_v11 = vadd.f32 %v372_v7, %v240_v5  ;;  %v374_v12 = vpop.f32.mrb[3].mxu1 }
 0x1c0   :  { %v441_v13 = vcombine.high %v371_v6, %v8027_v8  ;;  %v5441_v14 = vrot.slane %v371_v6, %v5433_v0  ;;  %v375_v15 = vadd.f32 %v374_v12, %v240_v5 }
 0x1c1   :  { %v5444_v17 = vrot.slane %v426_v9, %v5433_v0  ;;  %v492_v18 = vcombine.high %v373_v11, %v8027_v8  ;;  %v5448_v19 = vrot.slane %v373_v11, %v5433_v0 }
 0x1c2   :  { %v5451_v20 = vrot.slane %v441_v13, %v5433_v0  ;;  %v507_v23 = vcombine.high %v375_v15, %v8027_v8  ;;  %v5462_v25 = vrot.slane %v375_v15, %v5433_v0 }
 0x1c3   :  { %v5459_v24 = vrot.slane %v492_v18, %v5433_v0 }
 0x1c4   :  { %v378_v28 = vpop.f32.mrb[4].mxu1  ;;  %v5469_v29 = vrot.slane %v507_v23, %v5433_v0  ;;  %v5580_v23 = vsub.s32 0, %v5428_v61 }
 0x1c5   :  { %v379_v32 = vadd.f32 %v378_v28, %v245_v63  ;;  %v380_v33 = vpop.f32.mrb[5].mxu1 }
 0x1c6   :  { %v381_v34 = vadd.f32 %v380_v33, %v245_v63  ;;  %v382_v36 = vpop.f32.mrb[6].mxu1  ;;  %8210 = vst [vmem:[#allocation13_spill] sm:$0xff] %v5580_v23 }
 0x1c7   :  { %v384_v39 = vpop.f32.mrb[7].mxu1  ;;  %v558_v40 = vcombine.high %v379_v32, %v8027_v8  ;;  %v5481_v41 = vrot.slane %v379_v32, %v5433_v0  ;;  %v383_v44 = vadd.f32 %v382_v36, %v250_v35 }
 0x1c8   :  { %v573_v42 = vcombine.high %v381_v34, %v8027_v8  ;;  %v5485_v43 = vrot.slane %v381_v34, %v5433_v0  ;;  %v385_v49 = vadd.f32 %v384_v39, %v250_v35 }
 0x1c9   :  { %v5488_v52 = vrot.slane %v558_v40, %v5433_v0  ;;  %v624_v58 = vcombine.high %v383_v44, %v8027_v8  ;;  %v5499_v60 = vrot.slane %v383_v44, %v5433_v0 }
 0x1ca   :  { %v5491_v55 = vrot.slane %v573_v42, %v5433_v0  ;;  %v639_v63 = vcombine.high %v385_v49, %v8027_v8  ;;  %v5503_v1 = vrot.slane %v385_v49, %v5433_v0 }
 0x1cb   :  { %v5510_v6 = vrot.slane %v624_v58, %v5433_v0 }
 0x1cc   :  { %v388_v5 = vpop.f32.mrb[8].mxu1  ;;  %v5513_v7 = vrot.slane %v639_v63, %v5433_v0 }
 0x1cd   :  { %v390_v12 = vpop.f32.mrb[9].mxu1  ;;  %v389_v13 = vadd.f32 %v388_v5, %v255_v16 }
 0x1ce   :  { %8201 = vst [vmem:[#allocation4_spill] sm:$0xff] %v5513_v7  ;;  %v391_v15 = vadd.f32 %v390_v12, %v255_v16  ;;  %v5519_v18 = vpop.f32.mrb[10].mxu1 }
 0x1cf   :  { %v5525_v32 = vpop.f32.mrb[11].mxu1  ;;  %v690_v33 = vcombine.high %v389_v13, %v8027_v8  ;;  %v5529_v34 = vrot.slane %v389_v13, %v5433_v0 }
 0x1d0   :  { %v705_v35 = vcombine.high %v391_v15, %v8027_v8  ;;  %v5533_v36 = vrot.slane %v391_v15, %v5433_v0  ;;  %v5556_v15 = vld [vmem:[%s8016_s0] sm:$0x1] }
 0x1d1   :  { %8202 = vst [vmem:[#allocation5_spill] sm:$0xff] %v5529_v34  ;;  %v5536_v16 = vrot.slane %v690_v33, %v5433_v0  ;;  %vm1128_vm3 = vcmp.gt.f32.partialorder %v5556_v15, 0.5 }
 0x1d2   :  { %8203 = vst [vmem:[#allocation6_spill] sm:$0xff] %v5533_v36  ;;  %v5539_v39 = vrot.slane %v705_v35, %v5433_v0 }
 0x1d3   :  { %8204 = vst [vmem:[#allocation7_spill] sm:$0xff] %v5536_v16 }
 0x1d4   :  { %8205 = vst [vmem:[#allocation8_spill] sm:$0xff] %v5539_v39  ;;  %v398_v58 = vpop.f32.mrb[12].mxu1  ;;  %v1384_v39 = vld [vmem:[%s8015_s6 + $0x108] sm:$0xff] }
 0x1d5   :  { %v399_v63 = vadd.f32 %v398_v58, %v5430_v62  ;;  %v400_v5 = vpop.f32.mrb[13].mxu1 }
 0x1d6   :  { %v401_v12 = vadd.f32 %v400_v5, %v5430_v62  ;;  %v5551_v13 = vpop.f32.mrb[14].mxu1  ;;  %v5133_v5 = vmov 1934713408  }
 0x1d7   :  { %v822_v33 = vcombine.high %v399_v63, %v8027_v8  ;;  %v5560_v35 = vrot.slane %v399_v63, %v5433_v0  ;;  %v5562_v44 = vpop.f32.mrb[15].mxu1  ;;  %v459_v42 = vunpack.c.l.s4 %v5133_v5  ;;  %v1129_v5 = vsel %vm1128_vm3, 1, %v8023_v2 }
 0x1d8   :  { %v837_v49 = vcombine.high %v401_v12, %v8027_v8  ;;  %v5566_v58 = vrot.slane %v401_v12, %v5433_v0  ;;  %v1133_v38 = vrot.slane %v1129_v5, %v5580_v23  ;;  %v1427_v5 = vld [vmem:[%s8015_s6 + $0x260] sm:$0xff] }
 0x1d9   :  { %8206 = vst [vmem:[#allocation9_spill] sm:$0xff] %v5560_v35  ;;  %v5569_v62 = vrot.slane %v822_v33, %v5433_v0  ;;  %v460_v4 = vunpack.c.0.s8 %v459_v42 }
 0x1da   :  { %8207 = vst [vmem:[#allocation10_spill] sm:$0xff] %v5566_v58  ;;  %v5573_v28 = vrot.slane %v837_v49, %v5433_v0  ;;  %vm5603_vm4 = vcmp.eq.s32.totalorder %v1133_v38, 1 }
 0x1db   :  { %8208 = vst [vmem:[#allocation11_spill] sm:$0xff] %v5569_v62 }
 0x1dc   :  { %8209 = vst [vmem:[#allocation12_spill] sm:$0xff] %v5573_v28  ;;  %v408_v11 = vpop.f32.mrb[16].mxu1 }
 0x1dd   :  { %v409_v49 = vadd.f32 %v408_v11, %v5426_v59  ;;  %v410_v9 = vpop.f32.mrb[17].mxu1 }
 0x1de   :  { %v411_v63 = vadd.f32 %v410_v9, %v5426_v59  ;;  %v412_v3 = vpop.f32.mrb[18].mxu1  ;;  %v5599_v9 = vsub.s32 %v460_v4, %v5428_v61  ;;  %v1368_v61 = vld [vmem:[%s8015_s6 + $0x88] sm:$0xff] }
 0x1df   :  { %v954_v40 = vcombine.high %v409_v49, %v8027_v8  ;;  %v961_v57 = vrot.slane %v409_v49, %v5433_v0  ;;  %v413_v56 = vadd.f32 %v412_v3, %v5422_v53  ;;  %v414_v12 = vpop.f32.mrb[19].mxu1 }
 0x1e0   :  { %v969_v33 = vcombine.high %v411_v63, %v8027_v8  ;;  %v976_v37 = vrot.slane %v411_v63, %v5433_v0  ;;  %v415_v11 = vadd.f32 %v414_v12, %v5422_v53  ;;  %8211 = vst [vmem:[#allocation14_spill] sm:$0xff] %v5599_v9 }
 0x1e1   :  { %v968_v42 = vrot.slane %v954_v40, %v5433_v0  ;;  %v1027_v59 = vrot.slane %v413_v56, %v5433_v0 }
 0x1e2   :  { %v983_v49 = vrot.slane %v969_v33, %v5433_v0  ;;  %v984_v31 = vcombine.low %v961_v57, %v976_v37  ;;  %v985_v3 = vcombine.high %v961_v57, %v976_v37  ;;  %v1042_v30 = vrot.slane %v415_v11, %v5433_v0 }
 0x1e4   :  { %v418_v63 = vpop.f32.mrb[20].mxu1  ;;  %v999_v53 = vrot.slane %v985_v3, %v5599_v9  ;;  %v992_v40 = vrot.slane %v984_v31, %v5599_v9  ;;  %v1000_v12 = vcombine.low %v968_v42, %v983_v49  ;;  %v1050_v27 = vcombine.low %v1027_v59, %v1042_v30 }
 0x1e5   :  { %v1051_v4 = vcombine.high %v1027_v59, %v1042_v30  ;;  %v419_v26 = vadd.f32 %v418_v63, %v5424_v54  ;;  %v420_v33 = vpop.f32.mrb[21].mxu1  ;;  %v1001_v22 = vcombine.high %v968_v42, %v983_v49 }
 0x1e6   :  { %v421_v37 = vadd.f32 %v420_v33, %v5424_v54  ;;  %v5613_v38 = vsel %vm5603_vm4, %v999_v53, -1e+30  ;;  %v5617_v57 = vsel %vm5603_vm4, %v992_v40, -1e+30  ;;  %v1016_v3 = vcombine.high %v992_v40, %v8027_v8  ;;  %v422_v31 = vpop.f32.mrb[22].mxu1 }
 0x1e7   :  { %v1092_v21 = vrot.slane %v419_v26, %v5433_v0  ;;  %v1158_v30 = vsel %vm1151_vm5, %v5613_v38, -inf  ;;  %v1152_v42 = vsel %vm1151_vm5, %v5617_v57, -inf  ;;  %v1017_v54 = vcombine.high %v999_v53, %v8027_v8  ;;  %v423_v59 = vpop.f32.mrb[23].mxu1 }
 0x1e8   :  { %v1099_v49 = vrot.slane %v421_v37, %v5433_v0  ;;  %1159 = vmax.xlane.f32.xlu0 %v1158_v30  ;;  %1153 = vmax.xlane.f32.xlu1 %v1152_v42  ;;  %v5629_v63 = vsel %vm5603_vm4, %v1016_v3, -1e+30  ;;  %v1008_v40 = vrot.slane %v1000_v12, %v5599_v9  ;;  %v1015_v26 = vrot.slane %v1001_v22, %v5599_v9 }
 0x1e9   :  { %v1020_v33 = vcombine.high %v413_v56, %v8027_v8  ;;  %v1035_v31 = vcombine.high %v415_v11, %v8027_v8  ;;  %v5637_v53 = vsel %vm5603_vm4, %v1017_v54, -1e+30  ;;  %v1122_v30 = vrot.slane %v5556_v15, %v5580_v23 }
 0x1ea   :  { %v1100_v59 = vcombine.low %v1092_v21, %v1099_v49  ;;  %v1101_v37 = vcombine.high %v1092_v21, %v1099_v49  ;;  %v1155_v3 = vsel %vm1151_vm5, %v5629_v63, -inf  ;;  %v1161_v12 = vsel %vm1151_vm5, %v5637_v53, -inf }
 0x1eb   :  { %v5647_v22 = vsel %vm5603_vm4, %v1008_v40, -1e+30  ;;  %v1018_v56 = vcombine.high %v1008_v40, %v8027_v8  ;;  %v1058_v11 = vrot.slane %v1050_v27, %v5599_v9  ;;  %v1019_v15 = vcombine.high %v1015_v26, %v8027_v8 }
 0x1ec   :  { %v1108_v42 = vrot.slane %v1100_v59, %v5599_v9  ;;  %v1115_v21 = vrot.slane %v1101_v37, %v5599_v9  ;;  %1156 = vmax.xlane.f32.xlu0 %v1155_v3  ;;  %1162 = vmax.xlane.f32.xlu1 %v1161_v12  ;;  %v1034_v54 = vrot.slane %v1020_v33, %v5433_v0  ;;  %v1164_v59 = vsel %vm1151_vm5, %v5647_v22, -inf }
 0x1ed   :  { %v1049_v49 = vrot.slane %v1035_v31, %v5433_v0  ;;  %v5658_v2 = vsel %vm5603_vm4, %v1018_v56, -1e+30  ;;  %v1065_v37 = vrot.slane %v1051_v4, %v5599_v9  ;;  %v5671_v31 = vsel %vm5603_vm4, %v1015_v26, -1e+30 }
 0x1ee   :  { %v1116_v40 = vcombine.high %v1108_v42, %v8027_v8  ;;  %v1117_v27 = vcombine.high %v1115_v21, %v8027_v8  ;;  %v5665_v3 = vmul.f32 %v1122_v30, %v1108_v42  ;;  %v1167_v33 = vsel %vm1151_vm5, %v5658_v2, -inf }
 0x1ef   :  { %v1082_v12 = vcombine.high %v1058_v11, %v8027_v8  ;;  %v5676_v51 = vmul.f32 %v1122_v30, %v1115_v21  ;;  %v5682_v4 = vsel %vm5603_vm4, %v1019_v15, -1e+30  ;;  %v1066_v42 = vcombine.low %v1034_v54, %v1049_v49 }
 0x1f0   :  { %v5674_v56 = vmul.f32 %v1122_v30, %v1116_v40  ;;  %v5678_v48 = vmul.f32 %v1122_v30, %v1117_v27  ;;  %1165 = vmax.xlane.f32.xlu0 %v1164_v59  ;;  %1168 = vmax.xlane.f32.xlu1 %v1167_v33  ;;  %v1067_v23 = vcombine.high %v1034_v54, %v1049_v49  ;;  %v1170_v21 = vsel %vm1151_vm5, %v5671_v31, -inf }
 0x1f1   :  { %v1173_v30 = vsel %vm1151_vm5, %v5682_v4, -inf  ;;  %v5694_v40 = vsel %vm5603_vm4, %v1058_v11, -1e+30  ;;  %v8214_v15 = vmov 0.0   ;;  %v5699_v54 = vsel %vm5603_vm4, %v1082_v12, -1e+30 }
 0x1f2   :  { %v1332_v26 = vcombine.low %v5665_v3, %v5674_v56  ;;  %v1333_v8 = vcombine.low %v5676_v51, %v5678_v48  ;;  %v1083_v27 = vcombine.high %v1065_v37, %v8214_v15  ;;  %v1074_v33 = vrot.slane %v1066_v42, %v5599_v9  ;;  %v1371_v12 = vld [vmem:[%s8015_s6 + $0xa0] sm:$0xff] }
 0x1f3   :  { %v1179_v42 = vsel %vm1151_vm5, %v5699_v54, -inf  ;;  %v1081_v62 = vrot.slane %v1067_v23, %v5599_v9  ;;  %v1395_v23 = vld [vmem:[%s8015_s6 + $0x160] sm:$0xff] }
 0x1f4   :  { %1171 = vmax.xlane.f32.xlu0 %v1170_v21  ;;  %1174 = vmax.xlane.f32.xlu1 %v1173_v30  ;;  %v1340_v49 = vrot.slane %v1332_v26, %v5433_v0  ;;  %v1347_v59 = vrot.slane %v1333_v8, %v5433_v0  ;;  %v1376_v21 = vld [vmem:[%s8015_s6 + $0xc8] sm:$0xff]  ;;  %v1379_v26 = vld [vmem:[%s8015_s6 + $0xe0] sm:$0xff]  ;;  %v1176_v8 = vsel %vm1151_vm5, %v5694_v40, -inf  ;;  %v5722_v30 = vsel %vm5603_vm4, %v1065_v37, -1e+30 }
 0x1f5   :  { %v1084_v28 = vcombine.high %v1074_v33, %v8214_v15  ;;  %v4849_v58 = vcombine.high %v1368_v61, %v1376_v21  ;;  %v4855_v35 = vcombine.high %v1371_v12, %v1379_v26  ;;  %v1392_v37 = vld [vmem:[%s8015_s6 + $0x148] sm:$0xff]  ;;  %v4848_v36 = vcombine.low %v1368_v61, %v1376_v21 }
 0x1f6   :  { %v1348_v11 = vcombine.low %v1340_v49, %v1347_v59  ;;  %v5728_v59 = vsel %vm5603_vm4, %v1083_v27, -1e+30  ;;  %v1387_v27 = vld [vmem:[%s8015_s6 + $0x120] sm:$0xff]  ;;  %v4854_v34 = vcombine.low %v1371_v12, %v1379_v26  ;;  %v5758_v7 = vsel %vm5603_vm4, %v1074_v33, -1e+30  ;;  %v1400_v61 = vld [vmem:[%s8015_s6 + $0x188] sm:$0xff] }
 0x1f7   :  { %v1185_v16 = vsel %vm1151_vm5, %v5728_v59, -inf  ;;  %v1403_v33 = vld [vmem:[%s8015_s6 + $0x1a0] sm:$0xff]  ;;  %v4864_v12 = vcombine.low %v1384_v39, %v1392_v37  ;;  %v4870_v26 = vcombine.low %v1387_v27, %v1395_v23 }
 0x1f8   :  { %1177 = vmax.xlane.f32.xlu0 %v1176_v8  ;;  %1180 = vmax.xlane.f32.xlu1 %v1179_v42  ;;  %v5724_v49 = vpack.c.bf16 %v1348_v11, %v1348_v11  ;;  %v8215_v11 = vcombine.low %v5397_v45, %v5402_v46  ;;  %v8216_v8 = vcombine.low %v5407_v47, %v5416_v50  ;;  %v1182_v42 = vsel %vm1151_vm5, %v5722_v30, -inf }
 0x1f9   :  { %v5762_v45 = vsel %vm5603_vm4, %v1084_v28, -1e+30  ;;  %v1085_v46 = vcombine.high %v1081_v62, %v8214_v15  ;;  %v4865_v47 = vcombine.high %v1384_v39, %v1392_v37  ;;  %v4871_v50 = vcombine.high %v1387_v27, %v1395_v23  ;;  %v1411_v28 = vld [vmem:[%s8015_s6 + $0x1e0] sm:$0xff]  ;;  %v1424_v39 = vld [vmem:[%s8015_s6 + $0x248] sm:$0xff] }
 0x1fa   :  { %2152 = vmatmul.mubr.bf16.vlgmr.msra.gmra.mrb[24].mxu1 %v5724_v49  ;;  %2234 = vmatmul.mubr.bf16.vlgmr.msra.gmra.mrb[20].mxu0 %v5724_v49  ;;  %v1191_v21 = vsel %vm1151_vm5, %v5762_v45, -inf }
 0x1fb   :  { %2161 = vmatpush1.bf16.msra.mxu1 %v8215_v11  ;;  %2284 = vmatpush1.bf16.msra.mxu0 %v8216_v8  ;;  %v5785_v11 = vsel %vm5603_vm4, %v1081_v62, -1e+30  ;;  %v5789_v8 = vsel %vm5603_vm4, %v1085_v46, -1e+30  ;;  %v1419_v62 = vld [vmem:[%s8015_s6 + $0x220] sm:$0xff]  ;;  %v4886_v46 = vcombine.low %v1403_v33, %v1411_v28 }
 0x1fc   :  { %1183 = vmax.xlane.f32.xlu0 %v1182_v42  ;;  %1186 = vmax.xlane.f32.xlu1 %v1185_v16  ;;  %v1408_v16 = vld [vmem:[%s8015_s6 + $0x1c8] sm:$0xff]  ;;  %v4887_v42 = vcombine.high %v1403_v33, %v1411_v28  ;;  %v1194_v37 = vsel %vm1151_vm5, %v5785_v11, -inf  ;;  %v1197_v27 = vsel %vm1151_vm5, %v5789_v8, -inf  ;;  %v4902_v33 = vcombine.low %v1419_v62, %v1427_v5 }
 0x1fd   :  { %2162 = vmatprep.subr.bf16.mxu1 %v4849_v58  ;;  %2285 = vmatprep.subr.bf16.mxu0 %v4855_v35  ;;  %v8217_v58 = vmov 0   ;;  %v1188_v35 = vsel %vm1151_vm5, %v5758_v7, -inf  ;;  %v4880_v23 = vcombine.low %v1400_v61, %v1408_v16 }
 0x1fe   :  { %2192 = vmatprep.mubr.bf16.mxu1 %v8217_v58  ;;  %2315 = vmatprep.mubr.bf16.mxu0 %v8217_v58 }
 0x1ff   :  { %2163 = vmatpush1.bf16.msra.mxu1 %v4848_v36  ;;  %2286 = vmatpush1.bf16.msra.mxu0 %v4854_v34  ;;  %v1416_v34 = vld [vmem:[%s8015_s6 + $0x208] sm:$0xff]  ;;  %v4881_v36 = vcombine.high %v1400_v61, %v1408_v16  ;;  %v1443_v61 = vld [vmem:[%s8015_s6 + $0x2e0] sm:$0xff] }
 0x200   :  { %1189 = vmax.xlane.f32.xlu0 %v1188_v35  ;;  %1192 = vmax.xlane.f32.xlu1 %v1191_v21  ;;  %v1432_v35 = vld [vmem:[%s8015_s6 + $0x288] sm:$0xff]  ;;  %v4896_v16 = vcombine.low %v1416_v34, %v1424_v39 }
 0x201   :  { %2164 = vmatprep.subr.bf16.mxu1 %v4865_v47  ;;  %2287 = vmatprep.subr.bf16.mxu0 %v4871_v50  ;;  %v4897_v47 = vcombine.high %v1416_v34, %v1424_v39  ;;  %v4903_v50 = vcombine.high %v1419_v62, %v1427_v5  ;;  %v1440_v21 = vld [vmem:[%s8015_s6 + $0x2c8] sm:$0xff]  ;;  %v1459_v34 = vld [vmem:[%s8015_s6 + $0x360] sm:$0xff] }
 0x202   :  { %v4913_v28 = vcombine.high %v1432_v35, %v1440_v21  ;;  %v4912_v39 = vcombine.low %v1432_v35, %v1440_v21 }
 0x203   :  { %2165 = vmatpush1.bf16.msra.mxu1 %v4864_v12  ;;  %2288 = vmatpush1.bf16.msra.mxu0 %v4870_v26  ;;  %v1435_v12 = vld [vmem:[%s8015_s6 + $0x2a0] sm:$0xff] }
 0x204   :  { %1195 = vmax.xlane.f32.xlu0 %v1194_v37  ;;  %1198 = vmax.xlane.f32.xlu1 %v1197_v27  ;;  %v4919_v26 = vcombine.high %v1435_v12, %v1443_v61  ;;  %v1451_v37 = vld [vmem:[%s8015_s6 + $0x320] sm:$0xff]  ;;  %v4918_v62 = vcombine.low %v1435_v12, %v1443_v61 }
 0x205   :  { %2166 = vmatprep.subr.bf16.mxu1 %v4881_v36  ;;  %2289 = vmatprep.subr.bf16.mxu0 %v4887_v42  ;;  %v1448_v36 = vld [vmem:[%s8015_s6 + $0x308] sm:$0xff]  ;;  %v4935_v27 = vcombine.high %v1451_v37, %v1459_v34  ;;  %v4934_v21 = vcombine.low %v1451_v37, %v1459_v34 }
 0x206   :  { %v1456_v42 = vld [vmem:[%s8015_s6 + $0x348] sm:$0xff] }
 0x207   :  { %2167 = vmatpush1.bf16.msra.mxu1 %v4880_v23  ;;  %2290 = vmatpush1.bf16.msra.mxu0 %v4886_v46  ;;  %v4929_v5 = vcombine.high %v1448_v36, %v1456_v42  ;;  %v1464_v23 = vld [vmem:[%s8015_s6 + $0x388] sm:$0xff]  ;;  %v4928_v35 = vcombine.low %v1448_v36, %v1456_v42 }
 0x208   :  { %2168 = vmatprep.subr.bf16.mxu1 %v4897_v47  ;;  %2291 = vmatprep.subr.bf16.mxu0 %v4903_v50  ;;  %v1472_v46 = vld [vmem:[%s8015_s6 + $0x3c8] sm:$0xff]  ;;  %v1467_v47 = vld [vmem:[%s8015_s6 + $0x3a0] sm:$0xff] }
 0x209   :  { %v1475_v50 = vld [vmem:[%s8015_s6 + $0x3e0] sm:$0xff]  ;;  %v4945_v12 = vcombine.high %v1464_v23, %v1472_v46  ;;  %v226_v36 = vld [vmem:[%s8013_s5 + $0x28] sm:$0xff]  ;;  %v4944_v42 = vcombine.low %v1464_v23, %v1472_v46  ;;  %v1381_v23 = vld [vmem:[%s8015_s6 + $0xf0] sm:$0xff] }
 0x20a   :  { %v4951_v61 = vcombine.high %v1467_v47, %v1475_v50  ;;  %v4950_v37 = vcombine.low %v1467_v47, %v1475_v50  ;;  %v228_v50 = vld [vmem:[%s8013_s5 + $0x38] sm:$0xff] }
 0x20b   :  { %2169 = vmatpush1.bf16.msra.mxu1 %v4896_v16  ;;  %2292 = vmatpush1.bf16.msra.mxu0 %v4902_v33  ;;  %v1354_v16 = vld [vmem:[%s8015_s6 + $0x18] sm:$0xff] }
 0x20c   :  { %2170 = vmatprep.subr.bf16.mxu1 %v4913_v28  ;;  %2293 = vmatprep.subr.bf16.mxu0 %v4919_v26  ;;  %v1362_v33 = vld [vmem:[%s8015_s6 + $0x58] sm:$0xff]  ;;  %v1357_v28 = vld [vmem:[%s8015_s6 + $0x30] sm:$0xff] }
 0x20d   :  { %v1365_v26 = vld [vmem:[%s8015_s6 + $0x70] sm:$0xff]  ;;  %v4837_v34 = vcombine.high %v1354_v16, %v1362_v33  ;;  %v4836_v46 = vcombine.low %v1354_v16, %v1362_v33 }
 0x20e   :  { %v4842_v47 = vcombine.low %v1357_v28, %v1365_v26  ;;  %v1389_v16 = vld [vmem:[%s8015_s6 + $0x130] sm:$0xff] }
 0x20f   :  { %2171 = vmatpush1.bf16.msra.mxu1 %v4912_v39  ;;  %2294 = vmatpush1.bf16.msra.mxu0 %v4918_v62  ;;  %v4843_v39 = vcombine.high %v1357_v28, %v1365_v26  ;;  %v1370_v62 = vld [vmem:[%s8015_s6 + $0x98] sm:$0xff]  ;;  %v1397_v33 = vld [vmem:[%s8015_s6 + $0x170] sm:$0xff] }
 0x210   :  { %2172 = vmatprep.subr.bf16.mxu1 %v4929_v5  ;;  %2295 = vmatprep.subr.bf16.mxu0 %v4935_v27  ;;  %v1378_v5 = vld [vmem:[%s8015_s6 + $0xd8] sm:$0xff]  ;;  %v1373_v27 = vld [vmem:[%s8015_s6 + $0xb0] sm:$0xff] }
 0x211   :  { %v4852_v28 = vcombine.low %v1370_v62, %v1378_v5  ;;  %v4858_v26 = vcombine.low %v1373_v27, %v1381_v23 }
 0x213   :  { %2173 = vmatpush1.bf16.msra.mxu1 %v4928_v35  ;;  %2296 = vmatpush1.bf16.msra.mxu0 %v4934_v21  ;;  %v4853_v35 = vcombine.high %v1370_v62, %v1378_v5  ;;  %v4859_v21 = vcombine.high %v1373_v27, %v1381_v23  ;;  %v1413_v62 = vld [vmem:[%s8015_s6 + $0x1f0] sm:$0xff]  ;;  %v4874_v27 = vcombine.low %v1389_v16, %v1397_v33 }
 0x214   :  { %2174 = vmatprep.subr.bf16.mxu1 %v4945_v12  ;;  %2297 = vmatprep.subr.bf16.mxu0 %v4951_v61  ;;  %v1386_v12 = vld [vmem:[%s8015_s6 + $0x118] sm:$0xff] }
 0x215   :  { %259 = vperm.xlu1 %5038, %v226_v36   ;;  %v1394_v61 = vld [vmem:[%s8015_s6 + $0x158] sm:$0xff] }
 0x216   :  { %v4869_v36 = vcombine.high %v1386_v12, %v1394_v61  ;;  %v4868_v5 = vcombine.low %v1386_v12, %v1394_v61 }
 0x217   :  { %2175 = vmatpush1.bf16.msra.mxu1 %v4944_v42  ;;  %2298 = vmatpush1.bf16.msra.mxu0 %v4950_v37  ;;  %v4875_v42 = vcombine.high %v1389_v16, %v1397_v33  ;;  %v1402_v37 = vld [vmem:[%s8015_s6 + $0x198] sm:$0xff] }
 0x218   :  { %2242 = vmatprep.subr.bf16.mxu1 %v4837_v34  ;;  %2365 = vmatprep.subr.bf16.mxu0 %v4843_v39  ;;  %v1410_v34 = vld [vmem:[%s8015_s6 + $0x1d8] sm:$0xff]  ;;  %v1405_v39 = vld [vmem:[%s8015_s6 + $0x1b0] sm:$0xff] }
 0x219   :  { %v4885_v23 = vcombine.high %v1402_v37, %v1410_v34  ;;  %v4884_v12 = vcombine.low %v1402_v37, %v1410_v34  ;;  %v4890_v61 = vcombine.low %v1405_v39, %v1413_v62 }
 0x21a   :  { %2193 = vmatmul.mubr.bf16.vlgmr.msra.gmra.mrb[28].mxu1 %v5724_v49  ;;  %2316 = vmatmul.mubr.bf16.vlgmr.msra.gmra.mrb[24].mxu0 %v5724_v49 }
 0x21b   :  { %269 = vperm.xlu0 %5037, %v228_v50   ;;  %2243 = vmatpush1.bf16.msra.mxu1 %v4836_v46  ;;  %v4891_v46 = vcombine.high %v1405_v39, %v1413_v62  ;;  %v1426_v50 = vld [vmem:[%s8015_s6 + $0x258] sm:$0xff] }
 0x21c   :  { %2366 = vmatpush1.bf16.msra.mxu0 %v4842_v47  ;;  %2244 = vmatprep.subr.bf16.mxu1 %v4853_v35  ;;  %v1418_v47 = vld [vmem:[%s8015_s6 + $0x218] sm:$0xff]  ;;  %v1421_v35 = vld [vmem:[%s8015_s6 + $0x230] sm:$0xff] }
 0x21d   :  { %2367 = vmatprep.subr.bf16.mxu0 %v4859_v21  ;;  %2274 = vmatprep.mubr.bf16.mxu1 %v8217_v58  ;;  %v1429_v21 = vld [vmem:[%s8015_s6 + $0x270] sm:$0xff]  ;;  %v4901_v16 = vcombine.high %v1418_v47, %v1426_v50  ;;  %v4900_v37 = vcombine.low %v1418_v47, %v1426_v50 }
 0x21e   :  { %2397 = vmatprep.mubr.bf16.mxu0 %v8217_v58  ;;  %v4907_v33 = vcombine.high %v1421_v35, %v1429_v21  ;;  %v4906_v34 = vcombine.low %v1421_v35, %v1429_v21 }
 0x21f   :  { %2245 = vmatpush1.bf16.msra.mxu1 %v4852_v28  ;;  %v1434_v28 = vld [vmem:[%s8015_s6 + $0x298] sm:$0xff] }
 0x220   :  { %2368 = vmatpush1.bf16.msra.mxu0 %v4858_v26  ;;  %2246 = vmatprep.subr.bf16.mxu1 %v4869_v36  ;;  %v1442_v26 = vld [vmem:[%s8015_s6 + $0x2d8] sm:$0xff]  ;;  %v1437_v36 = vld [vmem:[%s8015_s6 + $0x2b0] sm:$0xff] }
 0x221   :  { %2369 = vmatprep.subr.bf16.mxu0 %v4875_v42  ;;  %v1445_v42 = vld [vmem:[%s8015_s6 + $0x2f0] sm:$0xff]  ;;  %v4917_v39 = vcombine.high %v1434_v28, %v1442_v26  ;;  %v4916_v47 = vcombine.low %v1434_v28, %v1442_v26 }
 0x222   :  { %v4923_v62 = vcombine.high %v1437_v36, %v1445_v42  ;;  %v4922_v50 = vcombine.low %v1437_v36, %v1445_v42 }
 0x223   :  { %2247 = vmatpush1.bf16.msra.mxu1 %v4868_v5  ;;  %v1450_v5 = vld [vmem:[%s8015_s6 + $0x318] sm:$0xff] }
 0x224   :  { %2370 = vmatpush1.bf16.msra.mxu0 %v4874_v27  ;;  %2248 = vmatprep.subr.bf16.mxu1 %v4885_v23  ;;  %v1458_v27 = vld [vmem:[%s8015_s6 + $0x358] sm:$0xff]  ;;  %v1453_v23 = vld [vmem:[%s8015_s6 + $0x330] sm:$0xff] }
 0x225   :  { %2371 = vmatprep.subr.bf16.mxu0 %v4891_v46  ;;  %v1461_v46 = vld [vmem:[%s8015_s6 + $0x370] sm:$0xff]  ;;  %v4933_v35 = vcombine.high %v1450_v5, %v1458_v27  ;;  %v4932_v28 = vcombine.low %v1450_v5, %v1458_v27  ;;  %v1372_v27 = vld [vmem:[%s8015_s6 + $0xa8] sm:$0xff] }
 0x226   :  { %v4939_v21 = vcombine.high %v1453_v23, %v1461_v46  ;;  %v4938_v26 = vcombine.low %v1453_v23, %v1461_v46  ;;  %v1380_v23 = vld [vmem:[%s8015_s6 + $0xe8] sm:$0xff] }
 0x227   :  { %2249 = vmatpush1.bf16.msra.mxu1 %v4884_v12  ;;  %v1466_v12 = vld [vmem:[%s8015_s6 + $0x398] sm:$0xff] }
 0x228   :  { %2372 = vmatpush1.bf16.msra.mxu0 %v4890_v61  ;;  %2250 = vmatprep.subr.bf16.mxu1 %v4901_v16  ;;  %v1474_v61 = vld [vmem:[%s8015_s6 + $0x3d8] sm:$0xff]  ;;  %v1469_v16 = vld [vmem:[%s8015_s6 + $0x3b0] sm:$0xff] }
 0x229   :  { %2373 = vmatprep.subr.bf16.mxu0 %v4907_v33  ;;  %v1477_v33 = vld [vmem:[%s8015_s6 + $0x3f0] sm:$0xff]  ;;  %v4949_v36 = vcombine.high %v1466_v12, %v1474_v61 }
 0x22a   :  { %v4955_v42 = vcombine.high %v1469_v16, %v1477_v33 }
 0x22b   :  { %2251 = vmatpush1.bf16.msra.mxu1 %v4900_v37  ;;  %v1356_v37 = vld [vmem:[%s8015_s6 + $0x28] sm:$0xff] }
 0x22c   :  { %2374 = vmatpush1.bf16.msra.mxu0 %v4906_v34  ;;  %2252 = vmatprep.subr.bf16.mxu1 %v4917_v39  ;;  %v1364_v34 = vld [vmem:[%s8015_s6 + $0x68] sm:$0xff]  ;;  %v4948_v39 = vcombine.low %v1466_v12, %v1474_v61 }
 0x22d   :  { %2375 = vmatprep.subr.bf16.mxu0 %v4923_v62  ;;  %v4954_v62 = vcombine.low %v1469_v16, %v1477_v33  ;;  %v4841_v5 = vcombine.high %v1356_v37, %v1364_v34  ;;  %v4840_v46 = vcombine.low %v1356_v37, %v1364_v34  ;;  %v1404_v61 = vld [vmem:[%s8015_s6 + $0x1a8] sm:$0xff] }
 0x22e   :  { %v1412_v16 = vld [vmem:[%s8015_s6 + $0x1e8] sm:$0xff] }
 0x22f   :  { %2253 = vmatpush1.bf16.msra.mxu1 %v4916_v47  ;;  %v4857_v47 = vcombine.high %v1372_v27, %v1380_v23  ;;  %v1436_v34 = vld [vmem:[%s8015_s6 + $0x2a8] sm:$0xff] }
 0x230   :  { %2376 = vmatpush1.bf16.msra.mxu0 %v4922_v50  ;;  %2254 = vmatprep.subr.bf16.mxu1 %v4933_v35  ;;  %v1388_v50 = vld [vmem:[%s8015_s6 + $0x128] sm:$0xff] }
 0x231   :  { %2377 = vmatprep.subr.bf16.mxu0 %v4939_v21  ;;  %v1396_v35 = vld [vmem:[%s8015_s6 + $0x168] sm:$0xff]  ;;  %v4856_v21 = vcombine.low %v1372_v27, %v1380_v23 }
 0x232   :  { %v4873_v12 = vcombine.high %v1388_v50, %v1396_v35  ;;  %v4872_v33 = vcombine.low %v1388_v50, %v1396_v35  ;;  %v1452_v27 = vld [vmem:[%s8015_s6 + $0x328] sm:$0xff] }
 0x233   :  { %2255 = vmatpush1.bf16.msra.mxu1 %v4932_v28  ;;  %v4889_v28 = vcombine.high %v1404_v61, %v1412_v16  ;;  %v1460_v23 = vld [vmem:[%s8015_s6 + $0x368] sm:$0xff] }
 0x234   :  { %2378 = vmatpush1.bf16.msra.mxu0 %v4938_v26  ;;  %2256 = vmatprep.subr.bf16.mxu1 %v4949_v36  ;;  %v1420_v26 = vld [vmem:[%s8015_s6 + $0x228] sm:$0xff] }
 0x235   :  { %2379 = vmatprep.subr.bf16.mxu0 %v4955_v42  ;;  %v1428_v36 = vld [vmem:[%s8015_s6 + $0x268] sm:$0xff]  ;;  %v4888_v42 = vcombine.low %v1404_v61, %v1412_v16  ;;  %v1358_v61 = vld [vmem:[%s8015_s6 + $0x38] sm:$0xff] }
 0x236   :  { %v4905_v37 = vcombine.high %v1420_v26, %v1428_v36  ;;  %v1468_v50 = vld [vmem:[%s8015_s6 + $0x3a8] sm:$0xff]  ;;  %v1366_v16 = vld [vmem:[%s8015_s6 + $0x78] sm:$0xff] }
 0x237   :  { %2257 = vmatpush1.bf16.msra.mxu1 %v4948_v39  ;;  %v1444_v39 = vld [vmem:[%s8015_s6 + $0x2e8] sm:$0xff] }
 0x238   :  { %2380 = vmatpush1.bf16.msra.mxu0 %v4954_v62  ;;  %2324 = vmatprep.subr.bf16.mxu1 %v4841_v5  ;;  %v4904_v62 = vcombine.low %v1420_v26, %v1428_v36  ;;  %v4921_v5 = vcombine.high %v1436_v34, %v1444_v39  ;;  %v1476_v35 = vld [vmem:[%s8015_s6 + $0x3e8] sm:$0xff]  ;;  %v1374_v26 = vld [vmem:[%s8015_s6 + $0xb8] sm:$0xff] }
 0x239   :  { %v1382_v36 = vld [vmem:[%s8015_s6 + $0xf8] sm:$0xff] }
 0x23a   :  { %2275 = vmatmul.mubr.bf16.vlgmr.msra.gmra.mrb[32].mxu1 %v5724_v49 }
 0x23b   :  { %2398 = vmatmul.mubr.bf16.vlgmr.msra.gmra.mrb[28].mxu0 %v5724_v49  ;;  %2325 = vmatpush1.bf16.msra.mxu1 %v4840_v46  ;;  %v4920_v46 = vcombine.low %v1436_v34, %v1444_v39  ;;  %v1390_v34 = vld [vmem:[%s8015_s6 + $0x138] sm:$0xff] }
 0x23c   :  { %2326 = vmatprep.subr.bf16.mxu1 %v4857_v47  ;;  %2356 = vmatprep.mubr.bf16.mxu1 %v8217_v58  ;;  %v4937_v47 = vcombine.high %v1452_v27, %v1460_v23  ;;  %v1398_v39 = vld [vmem:[%s8015_s6 + $0x178] sm:$0xff] }
 0x23f   :  { %2327 = vmatpush1.bf16.msra.mxu1 %v4856_v21  ;;  %v4936_v21 = vcombine.low %v1452_v27, %v1460_v23  ;;  %v1406_v27 = vld [vmem:[%s8015_s6 + $0x1b8] sm:$0xff] }
 0x240   :  { %2328 = vmatprep.subr.bf16.mxu1 %v4873_v12  ;;  %v4953_v12 = vcombine.high %v1468_v50, %v1476_v35  ;;  %v1414_v23 = vld [vmem:[%s8015_s6 + $0x1f8] sm:$0xff] }
 0x243   :  { %2329 = vmatpush1.bf16.msra.mxu1 %v4872_v33  ;;  %v4952_v33 = vcombine.low %v1468_v50, %v1476_v35  ;;  %v1422_v50 = vld [vmem:[%s8015_s6 + $0x238] sm:$0xff] }
 0x244   :  { %2330 = vmatprep.subr.bf16.mxu1 %v4889_v28  ;;  %v4845_v28 = vcombine.high %v1358_v61, %v1366_v16  ;;  %v1430_v35 = vld [vmem:[%s8015_s6 + $0x278] sm:$0xff] }
 0x247   :  { %2331 = vmatpush1.bf16.msra.mxu1 %v4888_v42  ;;  %v4844_v42 = vcombine.low %v1358_v61, %v1366_v16  ;;  %v1438_v61 = vld [vmem:[%s8015_s6 + $0x2b8] sm:$0xff] }
 0x248   :  { %2332 = vmatprep.subr.bf16.mxu1 %v4905_v37  ;;  %v4861_v37 = vcombine.high %v1374_v26, %v1382_v36  ;;  %v1446_v16 = vld [vmem:[%s8015_s6 + $0x2f8] sm:$0xff] }
 0x24b   :  { %2333 = vmatpush1.bf16.msra.mxu1 %v4904_v62  ;;  %v4860_v62 = vcombine.low %v1374_v26, %v1382_v36  ;;  %v1454_v26 = vld [vmem:[%s8015_s6 + $0x338] sm:$0xff] }
 0x24c   :  { %2334 = vmatprep.subr.bf16.mxu1 %v4921_v5  ;;  %v4877_v5 = vcombine.high %v1390_v34, %v1398_v39  ;;  %v1462_v36 = vld [vmem:[%s8015_s6 + $0x378] sm:$0xff] }
 0x24f   :  { %2335 = vmatpush1.bf16.msra.mxu1 %v4920_v46  ;;  %v4876_v46 = vcombine.low %v1390_v34, %v1398_v39  ;;  %v1470_v34 = vld [vmem:[%s8015_s6 + $0x3b8] sm:$0xff] }
 0x250   :  { %2336 = vmatprep.subr.bf16.mxu1 %v4937_v47  ;;  %v4893_v47 = vcombine.high %v1406_v27, %v1414_v23  ;;  %v1478_v39 = vld [vmem:[%s8015_s6 + $0x3f8] sm:$0xff] }
 0x253   :  { %2337 = vmatpush1.bf16.msra.mxu1 %v4936_v21  ;;  %v4892_v21 = vcombine.low %v1406_v27, %v1414_v23  ;;  %v4956_v27 = vcombine.low %v1470_v34, %v1478_v39 }
 0x254   :  { %2338 = vmatprep.subr.bf16.mxu1 %v4953_v12  ;;  %v4909_v12 = vcombine.high %v1422_v50, %v1430_v35 }
 0x257   :  { %2339 = vmatpush1.bf16.msra.mxu1 %v4952_v33  ;;  %v4908_v33 = vcombine.low %v1422_v50, %v1430_v35 }
 0x258   :  { %2406 = vmatprep.subr.bf16.mxu1 %v4845_v28  ;;  %v4925_v28 = vcombine.high %v1438_v61, %v1446_v16 }
 0x25a   :  { %2357 = vmatmul.mubr.bf16.vlgmr.msra.gmra.mrb[36].mxu1 %v5724_v49 }
 0x25b   :  { %2407 = vmatpush1.bf16.msra.mxu1 %v4844_v42  ;;  %2438 = vmatprep.mubr.bf16.mxu1 %v8217_v58  ;;  %v4924_v42 = vcombine.low %v1438_v61, %v1446_v16 }
 0x25c   :  { %2408 = vmatprep.subr.bf16.mxu1 %v4861_v37  ;;  %v4941_v37 = vcombine.high %v1454_v26, %v1462_v36 }
 0x25f   :  { %2409 = vmatpush1.bf16.msra.mxu1 %v4860_v62  ;;  %v4940_v62 = vcombine.low %v1454_v26, %v1462_v36 }
 0x260   :  { %2410 = vmatprep.subr.bf16.mxu1 %v4877_v5  ;;  %v4957_v5 = vcombine.high %v1470_v34, %v1478_v39 }
 0x263   :  { %2411 = vmatpush1.bf16.msra.mxu1 %v4876_v46 }
 0x264   :  { %2412 = vmatprep.subr.bf16.mxu1 %v4893_v47 }
 0x267   :  { %2413 = vmatpush1.bf16.msra.mxu1 %v4892_v21 }
 0x268   :  { %2414 = vmatprep.subr.bf16.mxu1 %v4909_v12 }
 0x26b   :  { %2415 = vmatpush1.bf16.msra.mxu1 %v4908_v33 }
 0x26c   :  { %2416 = vmatprep.subr.bf16.mxu1 %v4925_v28 }
 0x26f   :  { %2417 = vmatpush1.bf16.msra.mxu1 %v4924_v42 }
 0x270   :  { %2418 = vmatprep.subr.bf16.mxu1 %v4941_v37 }
 0x273   :  { %2419 = vmatpush1.bf16.msra.mxu1 %v4940_v62 }
 0x274   :  { %2420 = vmatprep.subr.bf16.mxu1 %v4957_v5 }
 0x275   :  { %v1160_v23 = vpop.xlane.xlu0 %1159  ;;  %v1154_v46 = vpop.xlane.xlu1 %1153 }
 0x276   :  { %v1202_v47 = vsub.f32 %v5613_v38, %v1160_v23  ;;  %v1200_v50 = vsub.f32 %v5617_v57, %v1154_v46 }
 0x277   :  { %2421 = vmatpush1.bf16.msra.mxu1 %v4956_v27 }
 0x278   :  { %v1216_v35 = vmul.f32 1.442695, %v1200_v50  ;;  %v1220_v21 = vmul.f32 1.442695, %v1202_v47 }
 0x279   :  { %v1157_v12 = vpop.xlane.xlu0 %1156  ;;  %v1163_v61 = vpop.xlane.xlu1 %1162 }
 0x27a   :  { %v1201_v16 = vsub.f32 %v5629_v63, %v1157_v12  ;;  %v1203_v33 = vsub.f32 %v5637_v53, %v1163_v61  ;;  %2439 = vmatmul.mubr.bf16.vlgmr.msra.gmra.mrb[40].mxu1 %v5724_v49  ;;  %5066 = vpow2.f32 %v1216_v35 }
 0x27b   :  { %5068 = vpow2.f32 %v1220_v21 }
 0x27c   :  { %v1218_v28 = vmul.f32 1.442695, %v1201_v16  ;;  %v1222_v26 = vmul.f32 1.442695, %v1203_v33 }
 0x27d   :  { %v1166_v36 = vpop.xlane.xlu0 %1165  ;;  %v1169_v42 = vpop.xlane.xlu1 %1168 }
 0x27e   :  { %5070 = vpow2.f32 %v1218_v28  ;;  %v1204_v38 = vsub.f32 %v5647_v22, %v1166_v36  ;;  %v1205_v57 = vsub.f32 %v5658_v2, %v1169_v42 }
 0x27f   :  { %5072 = vpow2.f32 %v1222_v26 }
 0x280   :  { %v1224_v37 = vmul.f32 1.442695, %v1204_v38  ;;  %v1226_v34 = vmul.f32 1.442695, %v1205_v57 }
 0x281   :  { %v1172_v39 = vpop.xlane.xlu0 %1171  ;;  %v1175_v63 = vpop.xlane.xlu1 %1174 }
 0x282   :  { %5074 = vpow2.f32 %v1224_v37  ;;  %v1206_v53 = vsub.f32 %v5671_v31, %v1172_v39  ;;  %v1207_v49 = vsub.f32 %v5682_v4, %v1175_v63 }
 0x283   :  { %5076 = vpow2.f32 %v1226_v34 }
 0x284   :  { %v1228_v62 = vmul.f32 1.442695, %v1206_v53  ;;  %v1230_v5 = vmul.f32 1.442695, %v1207_v49  ;;  %v6059_v27 = vpop.eup %5066 }
 0x285   :  { %v1178_v23 = vpop.xlane.xlu0 %1177  ;;  %v1181_v46 = vpop.xlane.xlu1 %1180  ;;  %v1248_v47 = vsel %vm1151_vm5, %v6059_v27, 0.0 }
 0x286   :  { %5078 = vpow2.f32 %v1228_v62  ;;  %v1208_v2 = vsub.f32 %v5694_v40, %v1178_v23  ;;  %v1209_v22 = vsub.f32 %v5699_v54, %v1181_v46  ;;  %v6065_v50 = vpop.eup %5068  ;;  %1249 = vadd.xlane.f32.xlu0 %v1248_v47 }
 0x287   :  { %5080 = vpow2.f32 %v1230_v5  ;;  %v1254_v33 = vsel %vm1151_vm5, %v6065_v50, 0.0 }
 0x288   :  { %v6067_v31 = vpop.eup %5070  ;;  %v1232_v4 = vmul.f32 1.442695, %v1208_v2  ;;  %v1234_v35 = vmul.f32 1.442695, %v1209_v22 }
 0x289   :  { %v1184_v21 = vpop.xlane.xlu0 %1183  ;;  %v1187_v12 = vpop.xlane.xlu1 %1186  ;;  %v1251_v61 = vsel %vm1151_vm5, %v6067_v31, 0.0 }
 0x28a   :  { %v6071_v16 = vpop.eup %5072  ;;  %5082 = vpow2.f32 %v1232_v4  ;;  %v1210_v40 = vsub.f32 %v5722_v30, %v1184_v21  ;;  %v1211_v54 = vsub.f32 %v5728_v59, %v1187_v12  ;;  %1252 = vadd.xlane.f32.xlu1 %v1251_v61  ;;  %1255 = vadd.xlane.f32.xlu0 %v1254_v33 }
 0x28b   :  { %5084 = vpow2.f32 %v1234_v35  ;;  %v1257_v30 = vsel %vm1151_vm5, %v6071_v16, 0.0 }
 0x28c   :  { %v6077_v28 = vpop.eup %5074  ;;  %v1236_v26 = vmul.f32 1.442695, %v1210_v40  ;;  %v1238_v36 = vmul.f32 1.442695, %v1211_v54 }
 0x28d   :  { %v1190_v42 = vpop.xlane.xlu0 %1189  ;;  %v1193_v38 = vpop.xlane.xlu1 %1192  ;;  %v1260_v57 = vsel %vm1151_vm5, %v6077_v28, 0.0 }
 0x28e   :  { %v6083_v37 = vpop.eup %5076  ;;  %5086 = vpow2.f32 %v1236_v26  ;;  %v1212_v59 = vsub.f32 %v5758_v7, %v1190_v42  ;;  %v1213_v34 = vsub.f32 %v5762_v45, %v1193_v38  ;;  %1258 = vadd.xlane.f32.xlu1 %v1257_v30  ;;  %1261 = vadd.xlane.f32.xlu0 %v1260_v57 }
 0x28f   :  { %5088 = vpow2.f32 %v1238_v36  ;;  %v1263_v23 = vsel %vm1151_vm5, %v6083_v37, 0.0 }
 0x290   :  { %v6087_v39 = vpop.eup %5078  ;;  %v1240_v63 = vmul.f32 1.442695, %v1212_v59  ;;  %v1242_v53 = vmul.f32 1.442695, %v1213_v34 }
 0x291   :  { %v1196_v49 = vpop.xlane.xlu0 %1195  ;;  %v1199_v62 = vpop.xlane.xlu1 %1198  ;;  %v1266_v5 = vsel %vm1151_vm5, %v6087_v39, 0.0 }
 0x292   :  { %v6093_v46 = vpop.eup %5080  ;;  %5090 = vpow2.f32 %v1240_v63  ;;  %v1214_v7 = vsub.f32 %v5785_v11, %v1196_v49  ;;  %v1215_v45 = vsub.f32 %v5789_v8, %v1199_v62  ;;  %1264 = vadd.xlane.f32.xlu1 %v1263_v23  ;;  %1267 = vadd.xlane.f32.xlu0 %v1266_v5 }
 0x293   :  { %5092 = vpow2.f32 %v1242_v53  ;;  %v1269_v21 = vsel %vm1151_vm5, %v6093_v46, 0.0 }
 0x294   :  { %v6097_v2 = vpop.eup %5082  ;;  %v1244_v22 = vmul.f32 1.442695, %v1214_v7  ;;  %v1246_v47 = vmul.f32 1.442695, %v1215_v45 }
 0x295   :  { %v260_v4 = vpop.permute.xlu1 %259  ;;  %v1272_v35 = vsel %vm1151_vm5, %v6097_v2, 0.0  ;;  %v6103_v12 = vpop.eup %5084 }
 0x296   :  { %5094 = vpow2.f32 %v1244_v22  ;;  %v393_v11 = vadd.f32 %v5519_v18, %v260_v4  ;;  %v395_v8 = vadd.f32 %v5525_v32, %v260_v4  ;;  %1270 = vadd.xlane.f32.xlu1 %v1269_v21  ;;  %1273 = vadd.xlane.f32.xlu0 %v1272_v35  ;;  %v1275_v32 = vsel %vm1151_vm5, %v6103_v12, 0.0 }
 0x297   :  { %5096 = vpow2.f32 %v1246_v47 }
 0x298   :  { %v6107_v61 = vpop.eup %5086  ;;  %v756_v40 = vcombine.high %v393_v11, %v8214_v15  ;;  %v6111_v54 = vrot.slane %v393_v11, %v5433_v0  ;;  %v771_v33 = vcombine.high %v395_v8, %v8214_v15  ;;  %v6115_v26 = vrot.slane %v395_v8, %v5433_v0 }
 0x299   :  { %v6117_v36 = vpop.eup %5088  ;;  %v1278_v18 = vsel %vm1151_vm5, %v6107_v61, 0.0 }
 0x29a   :  { %v6124_v42 = vrot.slane %v756_v40, %v5433_v0  ;;  %v6127_v38 = vrot.slane %v771_v33, %v5433_v0  ;;  %v270_v59 = vpop.permute.xlu0 %269  ;;  %1276 = vadd.xlane.f32.xlu1 %v1275_v32  ;;  %1279 = vadd.xlane.f32.xlu0 %v1278_v18  ;;  %v1281_v5 = vsel %vm1151_vm5, %v6117_v36, 0.0 }
 0x29b   :  { %v403_v34 = vadd.f32 %v5551_v13, %v270_v59  ;;  %v405_v63 = vadd.f32 %v5562_v44, %v270_v59 }
 0x29c   :  { %v6135_v53 = vpop.eup %5090 }
 0x29d   :  { %v888_v23 = vcombine.high %v403_v34, %v8214_v15  ;;  %v6145_v7 = vrot.slane %v403_v34, %v5433_v0  ;;  %v903_v13 = vcombine.high %v405_v63, %v8214_v15  ;;  %v6149_v44 = vrot.slane %v405_v63, %v5433_v0  ;;  %v6151_v45 = vpop.eup %5092 }
 0x29e   :  { %v1284_v22 = vsel %vm1151_vm5, %v6135_v53, 0.0  ;;  %1282 = vadd.xlane.f32.xlu1 %v1281_v5  ;;  %v1287_v18 = vsel %vm1151_vm5, %v6151_v45, 0.0 }
 0x29f   :  { %v6156_v47 = vrot.slane %v888_v23, %v5433_v0  ;;  %v6159_v4 = vrot.slane %v903_v13, %v5433_v0  ;;  %1285 = vadd.xlane.f32.xlu0 %v1284_v22 }
 0x2a0   :  { %v6165_v11 = vpop.eup %5094 }
 0x2a1   :  { %v6167_v8 = vpop.eup %5096  ;;  %v1290_v32 = vsel %vm1151_vm5, %v6165_v11, 0.0 }
 0x2a2   :  { %8218 = vst [vmem:[#allocation15_spill] sm:$0xff] %v6167_v8  ;;  %1288 = vadd.xlane.f32.xlu1 %v1287_v18  ;;  %v1293_v59 = vsel %vm1151_vm5, %v6167_v8, 0.0 }
 0x2a3   :  { %1291 = vadd.xlane.f32.xlu0 %v1290_v32 }
 0x2a6   :  { %1294 = vadd.xlane.f32.xlu1 %v1293_v59 }
 0x2cd   :  { %v6179_v34 = vpop.f32.mrb[24].mxu1  ;;  %v6181_v63 = vpop.f32.mrb[20].mxu0 }
 0x2ce   :  { %v6183_v5 = vpop.f32.mrb[25].mxu1  ;;  %v6185_v23 = vpop.f32.mrb[21].mxu0 }
 0x2cf   :  { %v2157_v13 = vpop.f32.mrb[26].mxu1  ;;  %v2239_v22 = vpop.f32.mrb[22].mxu0 }
 0x2d0   :  { %v2158_v33 = vpop.f32.mrb[27].mxu1  ;;  %v2240_v40 = vpop.f32.mrb[23].mxu0 }
 0x2ed   :  { %v6187_v21 = vpop.f32.mrb[28].mxu1  ;;  %v6189_v18 = vpop.f32.mrb[24].mxu0 }
 0x2ee   :  { %8219 = vst [vmem:[#allocation16_spill] sm:$0xff] %v6187_v21  ;;  %8220 = vst [vmem:[#allocation17_spill] sm:$0xff] %v6189_v18  ;;  %v6191_v32 = vpop.f32.mrb[29].mxu1  ;;  %v6193_v35 = vpop.f32.mrb[25].mxu0 }
 0x2ef   :  { %8221 = vst [vmem:[#allocation18_spill] sm:$0xff] %v6191_v32  ;;  %v2198_v59 = vpop.f32.mrb[30].mxu1  ;;  %v2321_v62 = vpop.f32.mrb[26].mxu0 }
 0x2f0   :  { %v2199_v49 = vpop.f32.mrb[31].mxu1  ;;  %v2322_v30 = vpop.f32.mrb[27].mxu0 }
 0x30d   :  { %v6195_v57 = vpop.f32.mrb[32].mxu1 }
 0x30e   :  { %8222 = vst [vmem:[#allocation19_spill] sm:$0xff] %v6195_v57  ;;  %v6197_v58 = vpop.f32.mrb[28].mxu0  ;;  %v6199_v13 = vpop.f32.mrb[33].mxu1 }
 0x30f   :  { %8223 = vst [vmem:[#allocation20_spill] sm:$0xff] %v6197_v58  ;;  %8224 = vst [vmem:[#allocation21_spill] sm:$0xff] %v6199_v13  ;;  %v6201_v33 = vpop.f32.mrb[29].mxu0  ;;  %v2280_v40 = vpop.f32.mrb[34].mxu1 }
 0x310   :  { %8225 = vst [vmem:[#allocation22_spill] sm:$0xff] %v6201_v33  ;;  %v2403_v22 = vpop.f32.mrb[30].mxu0  ;;  %v2281_v21 = vpop.f32.mrb[35].mxu1 }
 0x311   :  { %v2404_v18 = vpop.f32.mrb[31].mxu0 }
 0x313   :  { %v1250_v8 = vpop.xlane.xlu0 %1249 }
 0x314   :  { %5098 = vrcp.f32 %v1250_v8 }
 0x317   :  { %v1256_v32 = vpop.xlane.xlu0 %1255  ;;  %v1253_v59 = vpop.xlane.xlu1 %1252 }
 0x318   :  { %5100 = vrcp.f32 %v1256_v32 }
 0x319   :  { %5102 = vrcp.f32 %v1253_v59 }
 0x31b   :  { %v1259_v57 = vpop.xlane.xlu1 %1258 }
 0x31c   :  { %5104 = vrcp.f32 %v1259_v57 }
 0x31e   :  { %v5099_v49 = vpop.eup %5098 }
 0x31f   :  { %v1312_v30 = vmul.f32 %v5099_v49, %v6059_v27 }
 0x321   :  { %v2470_v62 = vmul.f32 %v1312_v30, %v5674_v56  ;;  %v2469_v58 = vmul.f32 %v1312_v30, %v5665_v3  ;;  %v2471_v18 = vmul.f32 %v1312_v30, %v5676_v51  ;;  %v2472_v8 = vmul.f32 %v1312_v30, %v5678_v48 }
 0x322   :  { %v5101_v13 = vpop.eup %5100 }
 0x323   :  { %v2476_v40 = vsel %vm1151_vm5, %v2470_v62, 0.0  ;;  %v2473_v21 = vsel %vm1151_vm5, %v2469_v58, 0.0  ;;  %v1314_v32 = vmul.f32 %v5101_v13, %v6065_v50  ;;  %v5103_v27 = vpop.eup %5102  ;;  %v2479_v22 = vsel %vm1151_vm5, %v2471_v18, 0.0  ;;  %v1262_v58 = vpop.xlane.xlu0 %1261 }
 0x324   :  { %2477 = vadd.xlane.f32.xlu0 %v2476_v40  ;;  %2474 = vadd.xlane.f32.xlu1 %v2473_v21  ;;  %v2482_v59 = vsel %vm1151_vm5, %v2472_v8, 0.0  ;;  %v1313_v33 = vmul.f32 %v5103_v27, %v6067_v31  ;;  %5106 = vrcp.f32 %v1262_v58 }
 0x325   :  { %v2617_v49 = vmul.f32 %v1314_v32, %v5665_v3  ;;  %v2618_v62 = vmul.f32 %v1314_v32, %v5674_v56  ;;  %v2619_v50 = vmul.f32 %v1314_v32, %v5676_v51  ;;  %v2620_v57 = vmul.f32 %v1314_v32, %v5678_v48 }
 0x326   :  { %v2543_v27 = vmul.f32 %v1313_v33, %v5665_v3  ;;  %v2545_v32 = vmul.f32 %v1313_v33, %v5676_v51 }
 0x327   :  { %v2621_v30 = vsel %vm1151_vm5, %v2617_v49, 0.0  ;;  %v2624_v40 = vsel %vm1151_vm5, %v2618_v62, 0.0  ;;  %v2630_v31 = vsel %vm1151_vm5, %v2620_v57, 0.0  ;;  %v5105_v49 = vpop.eup %5104  ;;  %v1268_v62 = vpop.xlane.xlu0 %1267 }
 0x328   :  { %2480 = vadd.xlane.f32.xlu0 %v2479_v22  ;;  %2483 = vadd.xlane.f32.xlu1 %v2482_v59  ;;  %v2627_v22 = vsel %vm1151_vm5, %v2619_v50, 0.0  ;;  %v2544_v59 = vmul.f32 %v1313_v33, %v5674_v56  ;;  %v2547_v58 = vsel %vm1151_vm5, %v2543_v27, 0.0  ;;  %v1315_v50 = vmul.f32 %v5105_v49, %v6071_v16 }
 0x329   :  { %5108 = vrcp.f32 %v1268_v62 }
 0x32a   :  { %v2693_v49 = vmul.f32 %v1315_v50, %v5676_v51  ;;  %v2694_v62 = vmul.f32 %v1315_v50, %v5678_v48 }
 0x32b   :  { %v1274_v27 = vpop.xlane.xlu0 %1273 }
 0x32c   :  { %2622 = vadd.xlane.f32.xlu0 %v2621_v30  ;;  %2625 = vadd.xlane.f32.xlu1 %v2624_v40  ;;  %v2550_v30 = vsel %vm1151_vm5, %v2544_v59, 0.0  ;;  %v2546_v40 = vmul.f32 %v1313_v33, %v5678_v48  ;;  %5110 = vrcp.f32 %v1274_v27 }
 0x32d   :  { %v6220_v13 = vpop.f32.mrb[36].mxu1 }
 0x32e   :  { %v6222_v21 = vpop.f32.mrb[37].mxu1  ;;  %v5107_v57 = vpop.eup %5106 }
 0x32f   :  { %v2362_v18 = vpop.f32.mrb[38].mxu1  ;;  %v1316_v59 = vmul.f32 %v5107_v57, %v6077_v28 }
 0x330   :  { %v2363_v8 = vpop.f32.mrb[39].mxu1  ;;  %2628 = vadd.xlane.f32.xlu0 %v2627_v22  ;;  %2631 = vadd.xlane.f32.xlu1 %v2630_v31  ;;  %v2553_v18 = vsel %vm1151_vm5, %v2545_v32, 0.0  ;;  %v2691_v22 = vmul.f32 %v1315_v50, %v5665_v3  ;;  %v2692_v31 = vmul.f32 %v1315_v50, %v5674_v56 }
 0x331   :  { %v2556_v8 = vsel %vm1151_vm5, %v2546_v40, 0.0  ;;  %v2765_v32 = vmul.f32 %v1316_v59, %v5665_v3  ;;  %v2766_v40 = vmul.f32 %v1316_v59, %v5674_v56  ;;  %v2767_v50 = vmul.f32 %v1316_v59, %v5676_v51 }
 0x332   :  { %v2695_v33 = vsel %vm1151_vm5, %v2691_v22, 0.0  ;;  %v2698_v16 = vsel %vm1151_vm5, %v2692_v31, 0.0  ;;  %v2768_v22 = vmul.f32 %v1316_v59, %v5678_v48 }
 0x333   :  { %v5109_v28 = vpop.eup %5108  ;;  %v2769_v57 = vsel %vm1151_vm5, %v2765_v32, 0.0  ;;  %v1265_v32 = vpop.xlane.xlu1 %1264 }
 0x334   :  { %2548 = vadd.xlane.f32.xlu0 %v2547_v58  ;;  %2551 = vadd.xlane.f32.xlu1 %v2550_v30  ;;  %v2701_v58 = vsel %vm1151_vm5, %v2693_v49, 0.0  ;;  %v2704_v30 = vsel %vm1151_vm5, %v2694_v62, 0.0  ;;  %v1318_v31 = vmul.f32 %v5109_v28, %v6087_v39 }
 0x336   :  { %v5111_v27 = vpop.eup %5110  ;;  %v2913_v49 = vmul.f32 %v1318_v31, %v5665_v3  ;;  %v2914_v62 = vmul.f32 %v1318_v31, %v5674_v56 }
 0x338   :  { %2554 = vadd.xlane.f32.xlu0 %v2553_v18  ;;  %2557 = vadd.xlane.f32.xlu1 %v2556_v8  ;;  %v1280_v18 = vpop.xlane.xlu0 %1279  ;;  %v2772_v8 = vsel %vm1151_vm5, %v2766_v40, 0.0  ;;  %v2917_v59 = vsel %vm1151_vm5, %v2913_v49, 0.0  ;;  %v2920_v39 = vsel %vm1151_vm5, %v2914_v62, 0.0  ;;  %v2916_v40 = vmul.f32 %v1318_v31, %v5678_v48 }
 0x339   :  { %5112 = vrcp.f32 %v1280_v18 }
 0x33a   :  { %5114 = vrcp.f32 %v1265_v32 }
 0x33c   :  { %2696 = vadd.xlane.f32.xlu0 %v2695_v33  ;;  %2699 = vadd.xlane.f32.xlu1 %v2698_v16  ;;  %v2775_v33 = vsel %vm1151_vm5, %v2767_v50, 0.0  ;;  %v2778_v16 = vsel %vm1151_vm5, %v2768_v22, 0.0 }
 0x340   :  { %2702 = vadd.xlane.f32.xlu0 %v2701_v58  ;;  %2705 = vadd.xlane.f32.xlu1 %v2704_v30  ;;  %v1320_v58 = vmul.f32 %v5111_v27, %v6097_v2  ;;  %v2915_v30 = vmul.f32 %v1318_v31, %v5676_v51  ;;  %v2926_v2 = vsel %vm1151_vm5, %v2916_v40, 0.0 }
 0x342   :  { %v2923_v50 = vsel %vm1151_vm5, %v2915_v30, 0.0  ;;  %v3061_v22 = vmul.f32 %v1320_v58, %v5665_v3  ;;  %v3062_v27 = vmul.f32 %v1320_v58, %v5674_v56  ;;  %v3063_v31 = vmul.f32 %v1320_v58, %v5676_v51 }
 0x343   :  { %v3064_v32 = vmul.f32 %v1320_v58, %v5678_v48 }
 0x344   :  { %2770 = vadd.xlane.f32.xlu0 %v2769_v57  ;;  %2773 = vadd.xlane.f32.xlu1 %v2772_v8  ;;  %v3065_v49 = vsel %vm1151_vm5, %v3061_v22, 0.0  ;;  %v3068_v62 = vsel %vm1151_vm5, %v3062_v27, 0.0  ;;  %v3071_v30 = vsel %vm1151_vm5, %v3063_v31, 0.0 }
 0x345   :  { %v3074_v40 = vsel %vm1151_vm5, %v3064_v32, 0.0 }
 0x348   :  { %2776 = vadd.xlane.f32.xlu0 %v2775_v33  ;;  %2779 = vadd.xlane.f32.xlu1 %v2778_v16  ;;  %v5113_v33 = vpop.eup %5112  ;;  %v1271_v16 = vpop.xlane.xlu1 %1270 }
 0x349   :  { %5116 = vrcp.f32 %v1271_v16 }
 0x34c   :  { %2918 = vadd.xlane.f32.xlu0 %v2917_v59  ;;  %2921 = vadd.xlane.f32.xlu1 %v2920_v39  ;;  %v1322_v59 = vmul.f32 %v5113_v33, %v6107_v61  ;;  %v5115_v39 = vpop.eup %5114 }
 0x34d   :  { %v6260_v28 = vpop.f32.mrb[40].mxu1 }
 0x34e   :  { %8226 = vst [vmem:[#allocation23_spill] sm:$0xff] %v6260_v28  ;;  %v6262_v57 = vpop.f32.mrb[41].mxu1  ;;  %v3211_v22 = vmul.f32 %v1322_v59, %v5676_v51  ;;  %v3212_v27 = vmul.f32 %v1322_v59, %v5678_v48 }
 0x34f   :  { %8227 = vst [vmem:[#allocation24_spill] sm:$0xff] %v6262_v57  ;;  %v2444_v18 = vpop.f32.mrb[42].mxu1 }
 0x350   :  { %v2445_v8 = vpop.f32.mrb[43].mxu1  ;;  %2924 = vadd.xlane.f32.xlu0 %v2923_v50  ;;  %2927 = vadd.xlane.f32.xlu1 %v2926_v2  ;;  %v3209_v18 = vmul.f32 %v1322_v59, %v5665_v3  ;;  %v1317_v50 = vmul.f32 %v5115_v39, %v6083_v37  ;;  %v1277_v2 = vpop.xlane.xlu1 %1276  ;;  %v3219_v33 = vsel %vm1151_vm5, %v3211_v22, 0.0  ;;  %v3222_v31 = vsel %vm1151_vm5, %v3212_v27, 0.0 }
 0x351   :  { %v3210_v8 = vmul.f32 %v1322_v59, %v5674_v56  ;;  %5118 = vrcp.f32 %v1277_v2  ;;  %v1286_v22 = vpop.xlane.xlu0 %1285 }
 0x352   :  { %v3213_v58 = vsel %vm1151_vm5, %v3209_v18, 0.0  ;;  %v2839_v16 = vmul.f32 %v1317_v50, %v5665_v3  ;;  %v2840_v37 = vmul.f32 %v1317_v50, %v5674_v56  ;;  %v2841_v32 = vmul.f32 %v1317_v50, %v5676_v51 }
 0x353   :  { %v3216_v61 = vsel %vm1151_vm5, %v3210_v8, 0.0 }
 0x354   :  { %3066 = vadd.xlane.f32.xlu0 %v3065_v49  ;;  %3069 = vadd.xlane.f32.xlu1 %v3068_v62  ;;  %v5117_v49 = vpop.eup %5116  ;;  %v1283_v62 = vpop.xlane.xlu1 %1282  ;;  %v2843_v39 = vsel %vm1151_vm5, %v2839_v16, 0.0  ;;  %v2846_v59 = vsel %vm1151_vm5, %v2840_v37, 0.0  ;;  %v2849_v18 = vsel %vm1151_vm5, %v2841_v32, 0.0 }
 0x355   :  { %5120 = vrcp.f32 %v1283_v62 }
 0x356   :  { %5122 = vrcp.f32 %v1286_v22 }
 0x358   :  { %3072 = vadd.xlane.f32.xlu0 %v3071_v30  ;;  %3075 = vadd.xlane.f32.xlu1 %v3074_v40  ;;  %v2842_v30 = vmul.f32 %v1317_v50, %v5678_v48  ;;  %v1319_v40 = vmul.f32 %v5117_v49, %v6093_v46 }
 0x35a   :  { %v2852_v8 = vsel %vm1151_vm5, %v2842_v30, 0.0  ;;  %v2987_v2 = vmul.f32 %v1319_v40, %v5665_v3  ;;  %v2989_v27 = vmul.f32 %v1319_v40, %v5676_v51 }
 0x35c   :  { %3214 = vadd.xlane.f32.xlu0 %v3213_v58  ;;  %3217 = vadd.xlane.f32.xlu1 %v3216_v61  ;;  %v2988_v58 = vmul.f32 %v1319_v40, %v5674_v56  ;;  %v5119_v61 = vpop.eup %5118  ;;  %v2991_v50 = vsel %vm1151_vm5, %v2987_v2, 0.0  ;;  %v2997_v37 = vsel %vm1151_vm5, %v2989_v27, 0.0  ;;  %v8232_v27 = vcombine.high %v5444_v17, %v5451_v20 }
 0x35e   :  { %v2994_v46 = vsel %vm1151_vm5, %v2988_v58, 0.0  ;;  %v8229_v58 = vcombine.high %v5437_v10, %v5441_v14 }
 0x35f   :  { %v5121_v16 = vpop.eup %5120 }
 0x360   :  { %3220 = vadd.xlane.f32.xlu0 %v3219_v33  ;;  %3223 = vadd.xlane.f32.xlu1 %v3222_v31  ;;  %v2990_v33 = vmul.f32 %v1319_v40, %v5678_v48  ;;  %v1321_v31 = vmul.f32 %v5119_v61, %v6103_v12  ;;  %v6319_v61 = vrot.slane %v8229_v58, %v5599_v9 }
 0x362   :  { %v3000_v49 = vsel %vm1151_vm5, %v2990_v33, 0.0  ;;  %v3136_v62 = vmul.f32 %v1321_v31, %v5674_v56  ;;  %v3135_v32 = vmul.f32 %v1321_v31, %v5665_v3  ;;  %v3137_v40 = vmul.f32 %v1321_v31, %v5676_v51 }
 0x364   :  { %2844 = vadd.xlane.f32.xlu0 %v2843_v39  ;;  %2847 = vadd.xlane.f32.xlu1 %v2846_v59  ;;  %v1292_v39 = vpop.xlane.xlu0 %1291  ;;  %v1323_v59 = vmul.f32 %v5121_v16, %v6117_v36  ;;  %v3142_v30 = vsel %vm1151_vm5, %v3136_v62, 0.0  ;;  %v3139_v12 = vsel %vm1151_vm5, %v3135_v32, 0.0  ;;  %v8230_v36 = vcombine.low %v5444_v17, %v5451_v20 }
 0x365   :  { %5124 = vrcp.f32 %v1292_v39  ;;  %v8240_v20 = vcombine.high %v5459_v24, %v5469_v29 }
 0x366   :  { %v6325_v22 = vrot.slane %v8230_v36, %v5599_v9  ;;  %v3283_v32 = vmul.f32 %v1323_v59, %v5665_v3  ;;  %v3284_v39 = vmul.f32 %v1323_v59, %v5674_v56  ;;  %v8252_v36 = vld [vmem:[#allocation4_spill] sm:$0xff] }
 0x367   :  { %v6355_v16 = vrot.slane %v8240_v20, %v5599_v9  ;;  %v8258_v20 = vcombine.high %v5510_v6, %v8252_v36 }
 0x368   :  { %2850 = vadd.xlane.f32.xlu0 %v2849_v18  ;;  %2853 = vadd.xlane.f32.xlu1 %v2852_v8  ;;  %v3138_v18 = vmul.f32 %v1321_v31, %v5678_v48  ;;  %v8228_v8 = vcombine.low %v5437_v10, %v5441_v14  ;;  %8231 = vst [vmem:[#allocation25_spill] sm:$0xff] %v6325_v22 }
 0x369   :  { %v8234_v10 = vcombine.low %v5448_v19, %v5462_v25  ;;  %v8238_v31 = vcombine.low %v5459_v24, %v5469_v29  ;;  %8241 = vst [vmem:[#allocation30_spill] sm:$0xff] %v6355_v16  ;;  %v8243_v24 = vcombine.high %v5481_v41, %v5485_v43 }
 0x36a   :  { %v6313_v2 = vrot.slane %v8228_v8, %v5599_v9  ;;  %v3148_v62 = vsel %vm1151_vm5, %v3138_v18, 0.0  ;;  %v8250_v8 = vcombine.high %v5499_v60, %v5503_v1 }
 0x36b   :  { %v6337_v14 = vrot.slane %v8234_v10, %v5599_v9  ;;  %v6349_v17 = vrot.slane %v8238_v31, %v5599_v9  ;;  %v6371_v29 = vrot.slane %v8243_v24, %v5599_v9  ;;  %v8256_v10 = vld [vmem:[#allocation6_spill] sm:$0xff] }
 0x36c   :  { %2992 = vadd.xlane.f32.xlu0 %v2991_v50  ;;  %2995 = vadd.xlane.f32.xlu1 %v2994_v46  ;;  %v6331_v50 = vrot.slane %v8232_v27, %v5599_v9  ;;  %v8236_v46 = vcombine.high %v5448_v19, %v5462_v25  ;;  %v5123_v19 = vpop.eup %5122  ;;  %v3145_v25 = vsel %vm1151_vm5, %v3137_v40, 0.0  ;;  %v8246_v40 = vcombine.high %v5488_v52, %v5491_v55  ;;  %v8255_v27 = vld [vmem:[#allocation5_spill] sm:$0xff] }
 0x36d   :  { %8235 = vst [vmem:[#allocation27_spill] sm:$0xff] %v6337_v14  ;;  %8239 = vst [vmem:[#allocation29_spill] sm:$0xff] %v6349_v17  ;;  %v6395_v58 = vrot.slane %v8250_v8, %v5599_v9  ;;  %v3287_v8 = vsel %vm1151_vm5, %v3283_v32, 0.0  ;;  %v6456_v32 = vcombine.high %v6371_v29, %v8214_v15 }
 0x36e   :  { %8233 = vst [vmem:[#allocation26_spill] sm:$0xff] %v6331_v50  ;;  %v6343_v33 = vrot.slane %v8236_v46, %v5599_v9  ;;  %v6383_v18 = vrot.slane %v8246_v40, %v5599_v9  ;;  %v8257_v46 = vcombine.low %v8255_v27, %v8256_v10  ;;  %v1289_v40 = vpop.xlane.xlu1 %1288 }
 0x36f   :  { %8251 = vst [vmem:[#allocation34_spill] sm:$0xff] %v6395_v58  ;;  %5126 = vrcp.f32 %v1289_v40  ;;  %8269 = vst [vmem:[#allocation36_spill] sm:$0xff] %v6456_v32  ;;  %v8274_v40 = vld [vmem:[#allocation11_spill] sm:$0xff]  ;;  %v5125_v32 = vpop.eup %5124 }
 0x370   :  { %2998 = vadd.xlane.f32.xlu0 %v2997_v37  ;;  %3001 = vadd.xlane.f32.xlu1 %v3000_v49  ;;  %8237 = vst [vmem:[#allocation28_spill] sm:$0xff] %v6343_v33  ;;  %v8242_v37 = vcombine.low %v5481_v41, %v5485_v43  ;;  %8247 = vst [vmem:[#allocation32_spill] sm:$0xff] %v6383_v18  ;;  %v8248_v41 = vcombine.low %v5499_v60, %v5503_v1 }
 0x371   :  { %v6407_v31 = vrot.slane %v8257_v46, %v5599_v9  ;;  %v8260_v60 = vcombine.high %v8255_v27, %v8256_v10  ;;  %v6440_v46 = vcombine.high %v6313_v2, %v8214_v15 }
 0x372   :  { %v6361_v49 = vrot.slane %v8242_v37, %v5599_v9  ;;  %v6389_v43 = vrot.slane %v8248_v41, %v5599_v9  ;;  %v6413_v37 = vrot.slane %v8258_v20, %v5599_v9  ;;  %v1324_v41 = vmul.f32 %v5123_v19, %v6135_v53  ;;  %v8271_v20 = vld [vmem:[#allocation10_spill] sm:$0xff] }
 0x373   :  { %v6419_v1 = vrot.slane %v8260_v60, %v5599_v9  ;;  %v6452_v19 = vcombine.high %v6319_v61, %v8214_v15 }
 0x374   :  { %3143 = vadd.xlane.f32.xlu0 %v3142_v30  ;;  %3140 = vadd.xlane.f32.xlu1 %v3139_v12  ;;  %v8244_v30 = vcombine.low %v5488_v52, %v5491_v55  ;;  %8249 = vst [vmem:[#allocation33_spill] sm:$0xff] %v6389_v43  ;;  %v8253_v52 = vcombine.low %v5510_v6, %v8252_v36  ;;  %8259 = vst [vmem:[#allocation5_spill] sm:$0xff] %v6413_v37  ;;  %v3290_v6 = vsel %vm1151_vm5, %v3284_v39, 0.0  ;;  %v8270_v39 = vld [vmem:[#allocation9_spill] sm:$0xff] }
 0x375   :  { %v3285_v36 = vmul.f32 %v1323_v59, %v5676_v51  ;;  %v6444_v53 = vcombine.high %v6361_v49, %v8214_v15  ;;  %8268 = vst [vmem:[#allocation35_spill] sm:$0xff] %v6452_v19  ;;  %v8272_v60 = vcombine.low %v8270_v39, %v8271_v20  ;;  %v6478_v57 = vcombine.high %v6419_v1, %v8214_v15 }
 0x376   :  { %v6377_v12 = vrot.slane %v8244_v30, %v5599_v9  ;;  %v6401_v55 = vrot.slane %v8253_v52, %v5599_v9  ;;  %v3286_v52 = vmul.f32 %v1323_v59, %v5678_v48  ;;  %v6448_v59 = vcombine.high %v6407_v31, %v8214_v15 }
 0x377   :  { %8278 = vst [vmem:[#allocation10_spill] sm:$0xff] %v6478_v57  ;;  %v6504_v57 = vcombine.high %v6331_v50, %v8214_v15 }
 0x378   :  { %8245 = vst [vmem:[#allocation31_spill] sm:$0xff] %v6377_v12  ;;  %3146 = vadd.xlane.f32.xlu0 %v3145_v25  ;;  %3149 = vadd.xlane.f32.xlu1 %v3148_v62  ;;  %8254 = vst [vmem:[#allocation4_spill] sm:$0xff] %v6401_v55  ;;  %v8261_v25 = vld [vmem:[#allocation7_spill] sm:$0xff]  ;;  %v8262_v62 = vld [vmem:[#allocation8_spill] sm:$0xff]  ;;  %v3296_v19 = vsel %vm1151_vm5, %v3286_v52, 0.0 }
 0x379   :  { %v8263_v24 = vcombine.low %v8261_v25, %v8262_v62  ;;  %v8265_v27 = vcombine.high %v8261_v25, %v8262_v62  ;;  %8267 = vst [vmem:[#allocation8_spill] sm:$0xff] %v6448_v59  ;;  %v6462_v25 = vrot.slane %v8272_v60, %v5599_v9  ;;  %v8273_v62 = vcombine.high %v8270_v39, %v8271_v20 }
 0x37a   :  { %v3293_v60 = vsel %vm1151_vm5, %v3285_v36, 0.0  ;;  %v3357_v59 = vmul.f32 %v1324_v41, %v5665_v3  ;;  %v3358_v39 = vmul.f32 %v1324_v41, %v5674_v56  ;;  %v6496_v36 = vcombine.high %v6377_v12, %v8214_v15  ;;  %8284 = vst [vmem:[#allocation39_spill] sm:$0xff] %v6504_v57 }
 0x37b   :  { %v6425_v30 = vrot.slane %v8263_v24, %v5599_v9  ;;  %v6436_v10 = vrot.slane %v8265_v27, %v5599_v9  ;;  %v6468_v24 = vrot.slane %v8273_v62, %v5599_v9 }
 0x37c   :  { %3288 = vadd.xlane.f32.xlu0 %v3287_v8  ;;  %3291 = vadd.xlane.f32.xlu1 %v3290_v6  ;;  %v8275_v8 = vld [vmem:[#allocation12_spill] sm:$0xff]  ;;  %8282 = vst [vmem:[#allocation37_spill] sm:$0xff] %v6496_v36  ;;  %v3364_v36 = vsel %vm1151_vm5, %v3358_v39, 0.0 }
 0x37d   :  { %8264 = vst [vmem:[#allocation6_spill] sm:$0xff] %v6425_v30  ;;  %8266 = vst [vmem:[#allocation7_spill] sm:$0xff] %v6436_v10  ;;  %v8276_v6 = vcombine.low %v8274_v40, %v8275_v8  ;;  %v8279_v20 = vcombine.high %v8274_v40, %v8275_v8  ;;  %v6500_v52 = vcombine.high %v6425_v30, %v8214_v15 }
 0x37e   :  { %v6508_v40 = vcombine.high %v6383_v18, %v8214_v15  ;;  %v1326_v8 = vmul.f32 %v5125_v32, %v6165_v11  ;;  %v3360_v11 = vmul.f32 %v1324_v41, %v5678_v48 }
 0x37f   :  { %v6474_v27 = vrot.slane %v8276_v6, %v5599_v9  ;;  %v6488_v62 = vrot.slane %v8279_v20, %v5599_v9  ;;  %v6492_v6 = vcombine.high %v6325_v22, %v8214_v15  ;;  %8283 = vst [vmem:[#allocation38_spill] sm:$0xff] %v6500_v52  ;;  %v6521_v20 = vcombine.high %v6468_v24, %v8214_v15  ;;  %v1295_v52 = vpop.xlane.xlu1 %1294 }
 0x380   :  { %3294 = vadd.xlane.f32.xlu0 %v3293_v60  ;;  %3297 = vadd.xlane.f32.xlu1 %v3296_v19  ;;  %8285 = vst [vmem:[#allocation40_spill] sm:$0xff] %v6508_v40  ;;  %v6512_v19 = vcombine.high %v6436_v10, %v8214_v15  ;;  %v6517_v60 = vcombine.high %v6462_v25, %v8214_v15  ;;  %v3361_v40 = vsel %vm1151_vm5, %v3357_v59, 0.0  ;;  %5128 = vrcp.f32 %v1295_v52 }
 0x381   :  { %8277 = vst [vmem:[#allocation9_spill] sm:$0xff] %v6474_v27  ;;  %8280 = vst [vmem:[#allocation11_spill] sm:$0xff] %v6488_v62  ;;  %v6525_v57 = vcombine.high %v6474_v27, %v8214_v15  ;;  %v6533_v32 = vcombine.high %v6488_v62, %v8214_v15  ;;  %v8291_v59 = vcombine.low %v6111_v54, %v6115_v26 }
 0x382   :  { %8281 = vst [vmem:[#allocation12_spill] sm:$0xff] %v6492_v6  ;;  %8286 = vst [vmem:[#allocation41_spill] sm:$0xff] %v6512_v19  ;;  %v3359_v19 = vmul.f32 %v1324_v41, %v5676_v51  ;;  %v6537_v6 = vcombine.high %v6337_v14, %v8214_v15  ;;  %v8293_v41 = vcombine.high %v6111_v54, %v6115_v26 }
 0x383   :  { %8287 = vst [vmem:[#allocation42_spill] sm:$0xff] %v6525_v57  ;;  %8288 = vst [vmem:[#allocation43_spill] sm:$0xff] %v6533_v32  ;;  %v6541_v57 = vcombine.high %v6389_v43, %v8214_v15  ;;  %v6547_v39 = vrot.slane %v8291_v59, %v5599_v9  ;;  %v8299_v54 = vcombine.high %v6124_v42, %v6127_v38  ;;  %v3370_v32 = vsel %vm1151_vm5, %v3360_v11, 0.0 }
 0x384   :  { %3362 = vadd.xlane.f32.xlu0 %v3361_v40  ;;  %3365 = vadd.xlane.f32.xlu1 %v3364_v36  ;;  %8289 = vst [vmem:[#allocation44_spill] sm:$0xff] %v6537_v6  ;;  %v6553_v36 = vrot.slane %v8293_v41, %v5599_v9  ;;  %v6557_v40 = vcombine.high %v6343_v33, %v8214_v15 }
 0x385   :  { %8290 = vst [vmem:[#allocation45_spill] sm:$0xff] %v6541_v57  ;;  %8292 = vst [vmem:[#allocation46_spill] sm:$0xff] %v6547_v39  ;;  %v6561_v6 = vcombine.high %v6395_v58, %v8214_v15  ;;  %v8297_v57 = vcombine.low %v6124_v42, %v6127_v38  ;;  %v6573_v26 = vrot.slane %v8299_v54, %v5599_v9 }
 0x386   :  { %8294 = vst [vmem:[#allocation47_spill] sm:$0xff] %v6553_v36  ;;  %8295 = vst [vmem:[#allocation48_spill] sm:$0xff] %v6557_v40  ;;  %v6577_v41 = vcombine.high %v6349_v17, %v8214_v15  ;;  %v5127_v40 = vpop.eup %5126  ;;  %v3505_v58 = vmul.f32 %v1326_v8, %v5665_v3  ;;  %v8302_v42 = vcombine.low %v6145_v7, %v6149_v44 }
 0x387   :  { %8296 = vst [vmem:[#allocation49_spill] sm:$0xff] %v6561_v6  ;;  %v6567_v59 = vrot.slane %v8297_v57, %v5599_v9  ;;  %8300 = vst [vmem:[#allocation51_spill] sm:$0xff] %v6573_v26  ;;  %v3367_v6 = vsel %vm1151_vm5, %v3359_v19, 0.0  ;;  %v3506_v57 = vmul.f32 %v1326_v8, %v5674_v56  ;;  %v6591_v52 = vcombine.high %v6401_v55, %v8214_v15 }
 0x388   :  { %8301 = vst [vmem:[#allocation52_spill] sm:$0xff] %v6577_v41  ;;  %v6587_v38 = vrot.slane %v8302_v42, %v5599_v9  ;;  %3368 = vadd.xlane.f32.xlu0 %v3367_v6  ;;  %3371 = vadd.xlane.f32.xlu1 %v3370_v32  ;;  %v6595_v19 = vcombine.high %v6355_v16, %v8214_v15  ;;  %v3509_v41 = vsel %vm1151_vm5, %v3505_v58, 0.0 }
 0x389   :  { %8298 = vst [vmem:[#allocation50_spill] sm:$0xff] %v6567_v59  ;;  %8304 = vst [vmem:[#allocation54_spill] sm:$0xff] %v6591_v52  ;;  %v8306_v11 = vcombine.high %v6145_v7, %v6149_v44  ;;  %v6605_v42 = vcombine.high %v6547_v39, %v8214_v15  ;;  %v6609_v6 = vcombine.high %v6553_v36, %v8214_v15 }
 0x38a   :  { %8303 = vst [vmem:[#allocation53_spill] sm:$0xff] %v6587_v38  ;;  %8305 = vst [vmem:[#allocation55_spill] sm:$0xff] %v6595_v19  ;;  %v6613_v32 = vcombine.high %v6413_v37, %v8214_v15  ;;  %v8311_v19 = vcombine.low %v6156_v47, %v6159_v4  ;;  %v1325_v7 = vmul.f32 %v5127_v40, %v6151_v45 }
 0x38b   :  { %v6601_v54 = vrot.slane %v8306_v11, %v5599_v9  ;;  %8308 = vst [vmem:[#allocation57_spill] sm:$0xff] %v6605_v42  ;;  %8309 = vst [vmem:[#allocation58_spill] sm:$0xff] %v6609_v6  ;;  %v6624_v44 = vcombine.high %v6567_v59, %v8214_v15  ;;  %v6628_v11 = vcombine.high %v6573_v26, %v8214_v15  ;;  %v5129_v26 = vpop.eup %5128 }
 0x38c   :  { %8310 = vst [vmem:[#allocation59_spill] sm:$0xff] %v6613_v32  ;;  %v6619_v52 = vrot.slane %v8311_v19, %v5599_v9  ;;  %v3512_v32 = vsel %vm1151_vm5, %v3506_v57, 0.0  ;;  %v3507_v37 = vmul.f32 %v1326_v8, %v5676_v51  ;;  %v3508_v16 = vmul.f32 %v1326_v8, %v5678_v48  ;;  %3510 = vadd.xlane.f32.xlu0 %v3509_v41 }
 0x38d   :  { %8307 = vst [vmem:[#allocation56_spill] sm:$0xff] %v6601_v54  ;;  %8313 = vst [vmem:[#allocation61_spill] sm:$0xff] %v6624_v44  ;;  %v8315_v45 = vcombine.high %v6156_v47, %v6159_v4  ;;  %v2448_v19 = vcombine.high %v6179_v34, %v6179_v34  ;;  %3513 = vadd.xlane.f32.xlu1 %v3512_v32  ;;  %v6644_v58 = vcombine.high %v6587_v38, %v8214_v15 }
 0x38e   :  { %8312 = vst [vmem:[#allocation60_spill] sm:$0xff] %v6619_v52  ;;  %8314 = vst [vmem:[#allocation62_spill] sm:$0xff] %v6628_v11  ;;  %v6648_v57 = vrot.slane %v6179_v34, %v5433_v0  ;;  %v2744_v8 = vcombine.high %v6181_v63, %v6181_v63  ;;  %v6654_v47 = vrot.slane %v6181_v63, %v5433_v0  ;;  %v3515_v63 = vsel %vm1151_vm5, %v3507_v37, 0.0 }
 0x38f   :  { %v6638_v40 = vrot.slane %v8315_v45, %v5599_v9  ;;  %8317 = vst [vmem:[#allocation64_spill] sm:$0xff] %v6644_v58  ;;  %v6658_v4 = vcombine.high %v6601_v54, %v8214_v15  ;;  %v2522_v41 = vcombine.high %v6183_v5, %v6183_v5  ;;  %v6664_v32 = vrot.slane %v6183_v5, %v5433_v0  ;;  %v8335_v58 = vld [vmem:[#allocation20_spill] sm:$0xff] }
 0x390   :  { %8318 = vst [vmem:[#allocation65_spill] sm:$0xff] %v6654_v47  ;;  %v6668_v34 = vrot.slane %v6185_v23, %v5433_v0  ;;  %v6672_v45 = vcombine.high %v6619_v52, %v8214_v15  ;;  %v3518_v9 = vsel %vm1151_vm5, %v3508_v16, 0.0  ;;  %v3431_v11 = vmul.f32 %v1325_v7, %v5665_v3  ;;  %3516 = vadd.xlane.f32.xlu0 %v3515_v63 }
 0x391   :  { %8316 = vst [vmem:[#allocation63_spill] sm:$0xff] %v6638_v40  ;;  %8319 = vst [vmem:[#allocation66_spill] sm:$0xff] %v6658_v4  ;;  %v3432_v44 = vmul.f32 %v1325_v7, %v5674_v56  ;;  %v2818_v5 = vcombine.high %v6185_v23, %v6185_v23  ;;  %3519 = vadd.xlane.f32.xlu1 %v3518_v9  ;;  %v6681_v59 = vrot.slane %v2448_v19, %v5433_v0  ;;  %v5134_v9 = vmov 1966171168  }
 0x392   :  { %8320 = vst [vmem:[#allocation67_spill] sm:$0xff] %v6668_v34  ;;  %8321 = vst [vmem:[#allocation68_spill] sm:$0xff] %v6672_v45  ;;  %v6685_v45 = vcombine.high %v6638_v40, %v8214_v15  ;;  %v6692_v52 = vrot.slane %v2744_v8, %v5433_v0  ;;  %v3433_v23 = vmul.f32 %v1325_v7, %v5676_v51  ;;  %v3435_v63 = vsel %vm1151_vm5, %v3431_v11, 0.0  ;;  %v8325_v40 = vld [vmem:[#allocation16_spill] sm:$0xff] }
 0x393   :  { %v6698_v19 = vrot.slane %v2522_v41, %v5433_v0  ;;  %v3438_v16 = vsel %vm1151_vm5, %v3432_v44, 0.0  ;;  %v3434_v37 = vmul.f32 %v1325_v7, %v5678_v48  ;;  %v6708_v55 = vrot.slane %v8325_v40, %v5433_v0  ;;  %v8327_v7 = vld [vmem:[#allocation17_spill] sm:$0xff] }
 0x394   :  { %8322 = vst [vmem:[#allocation69_spill] sm:$0xff] %v6685_v45  ;;  %8323 = vst [vmem:[#allocation70_spill] sm:$0xff] %v6692_v52  ;;  %v8324_v45 = vld [vmem:[#allocation15_spill] sm:$0xff]  ;;  %3436 = vadd.xlane.f32.xlu0 %v3435_v63  ;;  %v3928_v41 = vunpack.c.l.s4 %v5134_v9  ;;  %v6713_v15 = vrot.slane %v2818_v5, %v5433_v0  ;;  %v2596_v44 = vcombine.high %v8325_v40, %v8325_v40  ;;  %v8337_v63 = vld [vmem:[#allocation2_spill] sm:$0xff] }
 0x395   :  { %v1327_v8 = vmul.f32 %v5129_v26, %v8324_v45  ;;  %3439 = vadd.xlane.f32.xlu1 %v3438_v16  ;;  %v3040_v26 = vcombine.high %v8327_v7, %v8327_v7  ;;  %v6721_v11 = vrot.slane %v8327_v7, %v5433_v0  ;;  %v8329_v45 = vld [vmem:[#allocation18_spill] sm:$0xff]  ;;  %v3114_v5 = vcombine.high %v6193_v35, %v6193_v35 }
 0x396   :  { %8326 = vst [vmem:[#allocation15_spill] sm:$0xff] %v6713_v15  ;;  %v2670_v16 = vcombine.high %v8329_v45, %v8329_v45  ;;  %v6727_v9 = vrot.slane %v8329_v45, %v5433_v0  ;;  %v6733_v40 = vrot.slane %v6193_v35, %v5433_v0  ;;  %v3441_v7 = vsel %vm1151_vm5, %v3433_v23, 0.0  ;;  %v8336_v15 = vld [vmem:[#allocation21_spill] sm:$0xff] }
 0x397   :  { %8328 = vst [vmem:[#allocation16_spill] sm:$0xff] %v6721_v11  ;;  %v3444_v17 = vsel %vm1151_vm5, %v3434_v37, 0.0  ;;  %v3579_v4 = vmul.f32 %v1327_v8, %v5665_v3  ;;  %v3580_v6 = vmul.f32 %v1327_v8, %v5674_v56  ;;  %v3929_v45 = vunpack.c.0.s8 %v3928_v41 }
 0x398   :  { %8330 = vst [vmem:[#allocation17_spill] sm:$0xff] %v6733_v40  ;;  %3442 = vadd.xlane.f32.xlu0 %v3441_v7  ;;  %v6748_v23 = vrot.slane %v2596_v44, %v5433_v0  ;;  %v6751_v37 = vrot.slane %v2670_v16, %v5433_v0  ;;  %v6756_v56 = vrot.slane %v3040_v26, %v5433_v0 }
 0x399   :  { %3445 = vadd.xlane.f32.xlu1 %v3444_v17  ;;  %v8333_v17 = vld [vmem:[#allocation19_spill] sm:$0xff]  ;;  %v6765_v44 = vrot.slane %v3114_v5, %v5433_v0  ;;  %v3583_v16 = vsel %vm1151_vm5, %v3579_v4, 0.0  ;;  %v3586_v35 = vsel %vm1151_vm5, %v3580_v6, 0.0  ;;  %v3581_v3 = vmul.f32 %v1327_v8, %v5676_v51  ;;  %v8339_v5 = vld [vmem:[#allocation22_spill] sm:$0xff] }
 0x39a   :  { %8331 = vst [vmem:[#allocation18_spill] sm:$0xff] %v6751_v37  ;;  %8332 = vst [vmem:[#allocation71_spill] sm:$0xff] %v6756_v56  ;;  %v2892_v41 = vcombine.high %v8333_v17, %v8333_v17  ;;  %v3582_v26 = vmul.f32 %v1327_v8, %v5678_v48  ;;  %v3336_v42 = vcombine.high %v8335_v58, %v8335_v58  ;;  %v3922_v51 = vld [vmem:[%s8017_s8] sm:$0xff] }
 0x39b   :  { %8334 = vst [vmem:[#allocation19_spill] sm:$0xff] %v6765_v44  ;;  %v2966_v7 = vcombine.high %v8336_v15, %v8336_v15  ;;  %v6776_v40 = vsub.s32 %v3929_v45, %v8337_v63  ;;  %v3410_v4 = vcombine.high %v8339_v5, %v8339_v5  ;;  %v6791_v63 = vrot.slane %v8333_v17, %v5433_v0 }
 0x39c   :  { %3584 = vadd.xlane.f32.xlu0 %v3583_v16  ;;  %v6795_v45 = vrot.slane %v8335_v58, %v5433_v0  ;;  %v6803_v16 = vrot.slane %v8339_v5, %v5433_v0  ;;  %v3589_v6 = vsel %vm1151_vm5, %v3581_v3, 0.0  ;;  %v3592_v8 = vsel %vm1151_vm5, %v3582_v26, 0.0 }
 0x39d   :  { %3587 = vadd.xlane.f32.xlu1 %v3586_v35  ;;  %8338 = vst [vmem:[#allocation20_spill] sm:$0xff] %v6776_v40  ;;  %8340 = vst [vmem:[#allocation21_spill] sm:$0xff] %v6791_v63  ;;  %v6799_v35 = vrot.slane %v8336_v15, %v5433_v0  ;;  %v3926_v48 = vcombine.high %v3922_v51, %v3922_v51  ;;  %v6808_v17 = vrot.slane %v2892_v41, %v5433_v0  ;;  %v3923_v15 = vld [vmem:[%s8017_s8 + $0x8] sm:$0xff] }
 0x39e   :  { %8341 = vst [vmem:[#allocation2_spill] sm:$0xff] %v6795_v45  ;;  %8343 = vst [vmem:[#allocation72_spill] sm:$0xff] %v6803_v16  ;;  %v3933_v58 = vrot.slane %v3922_v51, %v6776_v40  ;;  %v6815_v34 = vrot.slane %v2966_v7, %v5433_v0  ;;  %v6818_v5 = vrot.slane %v3336_v42, %v5433_v0 }
 0x39f   :  { %8342 = vst [vmem:[#allocation22_spill] sm:$0xff] %v6799_v35  ;;  %8344 = vst [vmem:[#allocation73_spill] sm:$0xff] %v6808_v17  ;;  %v3188_v3 = vcombine.high %v6220_v13, %v6220_v13  ;;  %v3975_v26 = vcombine.high %v3923_v15, %v3923_v15  ;;  %v6829_v51 = vrot.slane %v6220_v13, %v5433_v0 }
 0x3a0   :  { %3590 = vadd.xlane.f32.xlu0 %v3589_v6  ;;  %8345 = vst [vmem:[#allocation74_spill] sm:$0xff] %v6815_v34  ;;  %8346 = vst [vmem:[#allocation75_spill] sm:$0xff] %v6818_v5  ;;  %v6825_v6 = vrot.slane %v3410_v4, %v5433_v0  ;;  %v3262_v54 = vcombine.high %v6222_v21, %v6222_v21  ;;  %v3940_v41 = vrot.slane %v3926_v48, %v6776_v40  ;;  %v4168_v4 = vld [vmem:[%s8018_s9] sm:$0xff] }
 0x3a1   :  { %3593 = vadd.xlane.f32.xlu1 %v3592_v8  ;;  %8348 = vst [vmem:[#allocation77_spill] sm:$0xff] %v6829_v51  ;;  %v3941_v44 = vcombine.high %v3933_v58, %v3933_v58  ;;  %v3982_v7 = vrot.slane %v3923_v15, %v6776_v40  ;;  %v6850_v45 = vrot.slane %v3933_v58, %v6776_v40 }
 0x3a2   :  { %8347 = vst [vmem:[#allocation76_spill] sm:$0xff] %v6825_v6  ;;  %v3989_v48 = vrot.slane %v3975_v26, %v6776_v40  ;;  %v6857_v13 = vrot.slane %v3188_v3, %v5433_v0  ;;  %v6863_v42 = vrot.slane %v6222_v21, %v5433_v0  ;;  %v3942_v8 = vcombine.high %v3940_v41, %v3940_v41 }
 0x3a3   :  { %v3990_v16 = vcombine.high %v3982_v7, %v3982_v7  ;;  %v6870_v5 = vrot.slane %v3940_v41, %v6776_v40  ;;  %v6873_v34 = vrot.slane %v3262_v54, %v5433_v0  ;;  %v6877_v15 = vrot.slane %v6260_v28, %v5433_v0  ;;  %v8353_v41 = vld [vmem:[#allocation13_spill] sm:$0xff] }
 0x3a4   :  { %8349 = vst [vmem:[#allocation78_spill] sm:$0xff] %v6857_v13  ;;  %8350 = vst [vmem:[#allocation79_spill] sm:$0xff] %v6863_v42  ;;  %v3991_v3 = vcombine.high %v3989_v48, %v3989_v48  ;;  %v3963_v21 = vrot.slane %v3941_v44, %v6776_v40  ;;  %v6881_v6 = vrot.slane %v3982_v7, %v6776_v40 }
 0x3a5   :  { %8351 = vst [vmem:[#allocation80_spill] sm:$0xff] %v6873_v34  ;;  %8352 = vst [vmem:[#allocation81_spill] sm:$0xff] %v6877_v15  ;;  %v4179_v58 = vrot.slane %v4168_v4, %v6776_v40  ;;  %v3971_v26 = vcombine.high %v6850_v45, %v6850_v45  ;;  %v4027_v35 = vrot.slane %v6850_v45, %v8353_v41 }
 0x3a6   :  { %v3972_v54 = vcombine.high %v6870_v5, %v6870_v5  ;;  %v3973_v15 = vcombine.high %v3963_v21, %v3963_v21  ;;  %v6893_v44 = vrot.slane %v3942_v8, %v6776_v40  ;;  %v4020_v7 = vcombine.high %v6881_v6, %v6881_v6 }
 0x3a7   :  { %v6898_v42 = vrot.slane %v3990_v16, %v6776_v40  ;;  %v6901_v36 = vrot.slane %v3989_v48, %v6776_v40  ;;  %v6904_v45 = vrot.slane %v3991_v3, %v6776_v40  ;;  %v4187_v33 = vcombine.high %v4179_v58, %v4179_v58 }
 0x3a8   :  { %v4172_v28 = vcombine.high %v4168_v4, %v4168_v4  ;;  %v3974_v8 = vcombine.high %v6893_v44, %v6893_v44  ;;  %v6913_v16 = vrot.slane %v4179_v58, %v6776_v40  ;;  %v4031_v48 = vrot.slane %v3963_v21, %v8353_v41 }
 0x3a9   :  { %v4022_v0 = vcombine.high %v6898_v42, %v6898_v42  ;;  %v4021_v4 = vcombine.high %v6901_v36, %v6901_v36  ;;  %v4023_v34 = vcombine.high %v6904_v45, %v6904_v45  ;;  %v4035_v13 = vrot.slane %v3971_v26, %v8353_v41 }
 0x3aa   :  { %8354 = vst [vmem:[#allocation13_spill] sm:$0xff] %v6913_v16  ;;  %v6924_v51 = vrot.slane %v3972_v54, %v8353_v41  ;;  %v4217_v21 = vcombine.high %v6913_v16, %v6913_v16  ;;  %v4039_v38 = vrot.slane %v3973_v15, %v8353_v41  ;;  %v6932_v3 = vrot.slane %v4020_v7, %v8353_v41  ;;  %v4169_v15 = vld [vmem:[%s8018_s9 + $0x8] sm:$0xff] }
 0x3ab   :  { %v6935_v39 = vrot.slane %v4187_v33, %v6776_v40  ;;  %v4186_v43 = vrot.slane %v4172_v28, %v6776_v40  ;;  %v6939_v26 = vrot.slane %v3974_v8, %v8353_v41  ;;  %v6946_v14 = vrot.slane %v4022_v0, %v8353_v41 }
 0x3ac   :  { %v6952_v28 = vrot.slane %v4021_v4, %v8353_v41  ;;  %v6959_v58 = vrot.slane %v4023_v34, %v8353_v41  ;;  %v8357_v0 = vcombine.high %v6648_v57, %v6648_v57  ;;  %v4228_v62 = vrot.slane %v4169_v15, %v6776_v40 }
 0x3ad   :  { %8355 = vst [vmem:[#allocation82_spill] sm:$0xff] %v6935_v39  ;;  %v4219_v4 = vcombine.high %v6935_v39, %v6935_v39  ;;  %v6973_v54 = vrot.slane %v4186_v43, %v6776_v40  ;;  %v4188_v34 = vcombine.high %v4186_v43, %v4186_v43  ;;  %v8360_v63 = vcombine.high %v6681_v59, %v6681_v59 }
 0x3ae   :  { %8356 = vst [vmem:[#allocation83_spill] sm:$0xff] %v6959_v58  ;;  %v4236_v12 = vcombine.high %v4228_v62, %v4228_v62  ;;  %v8369_v37 = vrot.slane %v6893_v44, %v8353_v41 }
 0x3af   :  { %8359 = vst [vmem:[#allocation85_spill] sm:$0xff] %v6973_v54  ;;  %v7008_v27 = vrot.slane %v4219_v4, %v8353_v41 }
 0x3b1   :  { %v2478_v33 = vpop.xlane.xlu0 %2477  ;;  %v2475_v7 = vpop.xlane.xlu1 %2474  ;;  %8361 = vst [vmem:[#allocation86_spill] sm:$0xff] %v7008_v27  ;;  %v8363_v27 = vrot.slane %v6870_v5, %v8353_v41 }
 0x3b2   :  { %4093 = vperm.xlu1 %5038, %v4031_v48   ;;  %v2486_v56 = vadd.f32 %v2478_v33, %v8357_v0  ;;  %v2485_v11 = vadd.f32 %v2475_v7, %v6648_v57  ;;  %v6966_v48 = vrot.slane %v4217_v21, %v8353_v41  ;;  %v5054_v7 = vld [vmem:[%s8019_s7] sm:$0xff]  }
 0x3b3   :  { %4996 = vmatprep.subr.bf16.mxu0 %v5054_v7 }
 0x3b4   :  { %8358 = vst [vmem:[#allocation84_spill] sm:$0xff] %v6966_v48  ;;  %v6977_v10 = vmul.f32 %v2486_v56, %v6313_v2  ;;  %v6980_v57 = vmul.f32 %v2486_v56, %v6361_v49  ;;  %v6983_v21 = vmul.f32 %v2486_v56, %v6407_v31  ;;  %v6986_v33 = vmul.f32 %v2486_v56, %v6462_v25 }
 0x3b5   :  { %v6992_v43 = vmul.f32 %v2485_v11, %v6313_v2  ;;  %v6995_v0 = vmul.f32 %v2485_v11, %v6361_v49  ;;  %v6998_v8 = vmul.f32 %v2485_v11, %v6407_v31  ;;  %v7001_v18 = vmul.f32 %v2485_v11, %v6462_v25  ;;  %v2481_v50 = vpop.xlane.xlu0 %2480  ;;  %v2484_v56 = vpop.xlane.xlu1 %2483  ;;  %4997 = vmatpush3.bf16.msra.mxu0 %v5054_v7 }
 0x3b6   :  { %4097 = vperm.xlu1 %5038, %v4035_v13   ;;  %v2487_v17 = vadd.f32 %v2481_v50, %v6681_v59  ;;  %v2488_v52 = vadd.f32 %v2484_v56, %v8360_v63  ;;  %4089 = vperm.xlu0 %5037, %v4027_v35   ;;  %v7013_v11 = vrot.slane %v4188_v34, %v6776_v40  ;;  %v5055_v50 = vld [vmem:[%s8019_s7 + $0x8] sm:$0xff]  }
 0x3b7   :  { %v4221_v13 = vcombine.high %v4169_v15, %v4169_v15  ;;  %4998 = vmatprep.subr.bf16.mxu0 %v5055_v50  ;;  %v8368_v48 = vcombine.high %v6748_v23, %v6748_v23 }
 0x3b8   :  { %8362 = vst [vmem:[#allocation87_spill] sm:$0xff] %v7013_v11  ;;  %v7019_v59 = vmul.f32 %v2487_v17, %v6313_v2  ;;  %v7022_v63 = vmul.f32 %v2487_v17, %v6361_v49  ;;  %v7025_v35 = vmul.f32 %v2487_v17, %v6407_v31  ;;  %v7028_v4 = vmul.f32 %v2487_v17, %v6462_v25 }
 0x3b9   :  { %v7031_v34 = vmul.f32 %v2488_v52, %v6313_v2  ;;  %v7034_v15 = vmul.f32 %v2488_v52, %v6361_v49  ;;  %v7037_v7 = vmul.f32 %v2488_v52, %v6407_v31  ;;  %v7040_v56 = vmul.f32 %v2488_v52, %v6462_v25  ;;  %v2623_v30 = vpop.xlane.xlu0 %2622  ;;  %v2626_v22 = vpop.xlane.xlu1 %2625  ;;  %4999 = vmatpush3.bf16.msra.mxu0 %v5055_v50 }
 0x3ba   :  { %4105 = vperm.xlu1 %5038, %v8363_v27   ;;  %v2633_v17 = vadd.f32 %v2623_v30, %v6708_v55  ;;  %v8364_v2 = vcombine.high %v6708_v55, %v6708_v55  ;;  %4101 = vperm.xlu0 %5037, %v4039_v38   ;;  %v4218_v49 = vcombine.high %v6973_v54, %v6973_v54 }
 0x3bb   :  { %v7052_v31 = vrot.slane %v4228_v62, %v6776_v40  ;;  %v4220_v25 = vcombine.high %v7013_v11, %v7013_v11  ;;  %v7057_v27 = vrot.slane %v4236_v12, %v6776_v40  ;;  %v7060_v30 = vrot.slane %v4221_v13, %v6776_v40 }
 0x3bc   :  { %v2634_v39 = vadd.f32 %v2626_v22, %v8364_v2  ;;  %v7063_v22 = vmul.f32 %v2633_v17, %v6319_v61  ;;  %v7066_v55 = vmul.f32 %v2633_v17, %v6371_v29  ;;  %v7069_v38 = vmul.f32 %v2633_v17, %v6419_v1 }
 0x3bd   :  { %8365 = vst [vmem:[#allocation88_spill] sm:$0xff] %v7052_v31  ;;  %8366 = vst [vmem:[#allocation89_spill] sm:$0xff] %v7057_v27  ;;  %v7072_v62 = vmul.f32 %v2633_v17, %v6468_v24  ;;  %v2629_v50 = vpop.xlane.xlu0 %2628  ;;  %v2632_v2 = vpop.xlane.xlu1 %2631  ;;  %v5056_v17 = vld [vmem:[%s8019_s7 + $0x10] sm:$0xff]   ;;  %v7105_v16 = vrot.slane %v4220_v25, %v8353_v41  ;;  %v4268_v44 = vcombine.high %v7057_v27, %v7057_v27 }
 0x3be   :  { %8367 = vst [vmem:[#allocation90_spill] sm:$0xff] %v7060_v30  ;;  %v7075_v52 = vmul.f32 %v2634_v39, %v6319_v61  ;;  %v7078_v12 = vmul.f32 %v2634_v39, %v6371_v29  ;;  %v7081_v5 = vmul.f32 %v2634_v39, %v6419_v1  ;;  %v7084_v13 = vmul.f32 %v2634_v39, %v6468_v24 }
 0x3bf   :  { %4113 = vperm.xlu1 %5038, %v6924_v51   ;;  %v2635_v54 = vadd.f32 %v2629_v50, %v6748_v23  ;;  %v2636_v47 = vadd.f32 %v2632_v2, %v8368_v48  ;;  %4109 = vperm.xlu0 %5037, %v8369_v37   ;;  %v7098_v39 = vrot.slane %v4218_v49, %v8353_v41 }
 0x3c0   :  { %v4266_v51 = vcombine.high %v7052_v31, %v7052_v31  ;;  %8371 = vst [vmem:[#allocation92_spill] sm:$0xff] %v7105_v16  ;;  %v7109_v23 = vrot.slane %v7060_v30, %v6776_v40  ;;  %5000 = vmatprep.subr.bf16.mxu0 %v5056_v17  ;;  %v8374_v11 = vrot.slane %v6881_v6, %v8353_v41 }
 0x3c1   :  { %8370 = vst [vmem:[#allocation91_spill] sm:$0xff] %v7098_v39  ;;  %v7114_v37 = vmul.f32 %v2635_v54, %v6319_v61  ;;  %v7117_v48 = vmul.f32 %v2635_v54, %v6371_v29  ;;  %v7120_v49 = vmul.f32 %v2635_v54, %v6419_v1  ;;  %v7123_v25 = vmul.f32 %v2635_v54, %v6468_v24  ;;  %v2549_v40 = vpop.xlane.xlu0 %2548  ;;  %v2552_v54 = vpop.xlane.xlu1 %2551 }
 0x3c2   :  { %8372 = vst [vmem:[#allocation93_spill] sm:$0xff] %v7109_v23  ;;  %5001 = vmatpush3.bf16.msra.mxu0 %v5056_v17  ;;  %v7126_v50 = vmul.f32 %v2636_v47, %v6319_v61  ;;  %v7129_v2 = vmul.f32 %v2636_v47, %v6371_v29  ;;  %v7132_v58 = vmul.f32 %v2636_v47, %v6419_v1 }
 0x3c3   :  { %v7135_v16 = vmul.f32 %v2636_v47, %v6468_v24  ;;  %4121 = vperm.xlu1 %5038, %v8374_v11   ;;  %v2559_v17 = vadd.f32 %v2549_v40, %v6664_v32  ;;  %v8375_v61 = vcombine.high %v6664_v32, %v6664_v32  ;;  %4117 = vperm.xlu0 %5037, %v6939_v26   ;;  %v8378_v11 = vld [vmem:[#allocation8_spill] sm:$0xff] }
 0x3c4   :  { %v7148_v1 = vrot.slane %v4266_v51, %v8353_v41  ;;  %v7155_v40 = vrot.slane %v4268_v44, %v8353_v41  ;;  %v8379_v30 = vrot.slane %v6898_v42, %v8353_v41 }
 0x3c5   :  { %8373 = vst [vmem:[#allocation94_spill] sm:$0xff] %v7135_v16  ;;  %v2560_v39 = vadd.f32 %v2552_v54, %v8375_v61  ;;  %v2563_v6 = vmul.f32 %v2559_v17, %v6440_v46  ;;  %v2567_v26 = vmul.f32 %v2559_v17, %v6444_v53  ;;  %v2571_v54 = vmul.f32 %v2559_v17, %v8378_v11  ;;  %v2555_v29 = vpop.xlane.xlu0 %2554  ;;  %v2558_v32 = vpop.xlane.xlu1 %2557 }
 0x3c6   :  { %8376 = vst [vmem:[#allocation95_spill] sm:$0xff] %v7148_v1  ;;  %8377 = vst [vmem:[#allocation96_spill] sm:$0xff] %v7155_v40  ;;  %v2575_v51 = vmul.f32 %v2559_v17, %v6517_v60  ;;  %v5057_v40 = vld [vmem:[%s8019_s7 + $0x18] sm:$0xff]  }
 0x3c7   :  { %v2564_v61 = vmul.f32 %v2560_v39, %v6440_v46  ;;  %v2568_v24 = vmul.f32 %v2560_v39, %v6444_v53  ;;  %v2572_v47 = vmul.f32 %v2560_v39, %v8378_v11  ;;  %v2576_v44 = vmul.f32 %v2560_v39, %v6517_v60  ;;  %4129 = vperm.xlu1 %5038, %v6932_v3  }
 0x3c8   :  { %v2579_v27 = vadd.f32 %v2563_v6, %v6992_v43  ;;  %v2583_v17 = vadd.f32 %v2567_v26, %v6995_v0  ;;  %v2587_v1 = vadd.f32 %v2571_v54, %v6998_v8  ;;  %v2591_v31 = vadd.f32 %v2575_v51, %v7001_v18  ;;  %4125 = vperm.xlu0 %5037, %v8379_v30  }
 0x3c9   :  { %v2580_v39 = vadd.f32 %v2564_v61, %v6977_v10  ;;  %v2584_v3 = vadd.f32 %v2568_v24, %v6980_v57  ;;  %v2588_v23 = vadd.f32 %v2572_v47, %v6983_v21  ;;  %v2592_v16 = vadd.f32 %v2576_v44, %v6986_v33  ;;  %5002 = vmatprep.subr.bf16.mxu0 %v5057_v40  ;;  %v2697_v30 = vpop.xlane.xlu0 %2696  ;;  %v2700_v33 = vpop.xlane.xlu1 %2699  ;;  %v8387_v61 = vld [vmem:[#allocation13_spill] sm:$0xff] }
 0x3ca   :  { %v2561_v43 = vadd.f32 %v2555_v29, %v6698_v19  ;;  %v8380_v8 = vcombine.high %v6698_v19, %v6698_v19  ;;  %v2653_v18 = vadd.f32 %v7063_v22, %v2579_v27  ;;  %v2657_v42 = vadd.f32 %v7066_v55, %v2583_v17  ;;  %5003 = vmatpush3.bf16.msra.mxu0 %v5057_v40 }
 0x3cb   :  { %v2661_v10 = vadd.f32 %v7069_v38, %v2587_v1  ;;  %v2665_v57 = vadd.f32 %v7072_v62, %v2591_v31  ;;  %v8381_v21 = vrot.slane %v6901_v36, %v8353_v41  ;;  %v2654_v29 = vadd.f32 %v7075_v52, %v2580_v39  ;;  %v5058_v52 = vld [vmem:[%s8019_s7 + $0x20] sm:$0xff]  }
 0x3cc   :  { %v2562_v0 = vadd.f32 %v2558_v32, %v8380_v8  ;;  %v2658_v19 = vadd.f32 %v7078_v12, %v2584_v3  ;;  %v2565_v24 = vmul.f32 %v2561_v43, %v6440_v46  ;;  %v2569_v27 = vmul.f32 %v2561_v43, %v6444_v53  ;;  %4133 = vperm.xlu0 %5037, %v6946_v14  }
 0x3cd   :  { %4137 = vperm.xlu1 %5038, %v8381_v21   ;;  %v2573_v22 = vmul.f32 %v2561_v43, %v8378_v11  ;;  %v2577_v55 = vmul.f32 %v2561_v43, %v6517_v60  ;;  %v2703_v32 = vpop.xlane.xlu0 %2702  ;;  %v2706_v6 = vpop.xlane.xlu1 %2705  ;;  %5004 = vmatprep.subr.bf16.mxu0 %v5058_v52  ;;  %v8388_v44 = vrot.slane %v8387_v61, %v8353_v41 }
 0x3ce   :  { %v2566_v31 = vmul.f32 %v2562_v0, %v6440_v46  ;;  %v2570_v36 = vmul.f32 %v2562_v0, %v6444_v53  ;;  %v2574_v38 = vmul.f32 %v2562_v0, %v8378_v11  ;;  %v2578_v62 = vmul.f32 %v2562_v0, %v6517_v60  ;;  %v8386_v11 = vld [vmem:[#allocation10_spill] sm:$0xff]  ;;  %5005 = vmatpush3.bf16.msra.mxu0 %v5058_v52  ;;  %v8389_v0 = vld [vmem:[#allocation83_spill] sm:$0xff] }
 0x3cf   :  { %v2581_v12 = vadd.f32 %v2565_v24, %v7019_v59  ;;  %v2585_v1 = vadd.f32 %v2569_v27, %v7022_v63  ;;  %v2589_v47 = vadd.f32 %v2573_v22, %v7025_v35  ;;  %v2593_v14 = vadd.f32 %v2577_v55, %v7028_v4  ;;  %v5060_v27 = vld [vmem:[%s8019_s7 + $0x30] sm:$0xff]   ;;  %v8390_v22 = vld [vmem:[#allocation18_spill] sm:$0xff] }
 0x3d0   :  { %v2582_v46 = vadd.f32 %v2566_v31, %v7031_v34  ;;  %v2586_v53 = vadd.f32 %v2570_v36, %v7034_v15  ;;  %v2590_v40 = vadd.f32 %v2574_v38, %v7037_v7  ;;  %v2594_v60 = vadd.f32 %v2578_v62, %v7040_v56  ;;  %v8393_v36 = vld [vmem:[#allocation65_spill] sm:$0xff] }
 0x3d1   :  { %4145 = vperm.xlu1 %5038, %v6952_v28   ;;  %v2707_v59 = vadd.f32 %v2697_v30, %v6727_v9  ;;  %v2662_v63 = vadd.f32 %v7081_v5, %v2588_v23  ;;  %v2666_v35 = vadd.f32 %v7084_v13, %v2592_v16  ;;  %v8382_v4 = vcombine.high %v6727_v9, %v6727_v9  ;;  %v5059_v16 = vld [vmem:[%s8019_s7 + $0x28] sm:$0xff]   ;;  %v8385_v13 = vld [vmem:[#allocation36_spill] sm:$0xff]  ;;  %v2771_v51 = vpop.xlane.xlu0 %2770  ;;  %v2774_v17 = vpop.xlane.xlu1 %2773 }
 0x3d2   :  { %v8383_v15 = vrot.slane %v6904_v45, %v8353_v41  ;;  %v2655_v7 = vadd.f32 %v7114_v37, %v2581_v12  ;;  %v2659_v56 = vadd.f32 %v7117_v48, %v2585_v1  ;;  %v2663_v28 = vadd.f32 %v7120_v49, %v2589_v47  ;;  %v8384_v5 = vld [vmem:[#allocation35_spill] sm:$0xff]  ;;  %5006 = vmatprep.subr.bf16.mxu0 %v5059_v16  ;;  %v8395_v1 = vld [vmem:[#allocation84_spill] sm:$0xff] }
 0x3d3   :  { %v2708_v34 = vadd.f32 %v2700_v33, %v8382_v4  ;;  %v2667_v26 = vadd.f32 %v7123_v25, %v2593_v14  ;;  %v2711_v9 = vmul.f32 %v2707_v59, %v8384_v5  ;;  %v2715_v23 = vmul.f32 %v2707_v59, %v8385_v13  ;;  %5007 = vmatpush3.bf16.msra.mxu0 %v5059_v16 }
 0x3d4   :  { %4141 = vperm.xlu0 %5037, %v8383_v15   ;;  %v2719_v45 = vmul.f32 %v2707_v59, %v8386_v11  ;;  %v2723_v54 = vmul.f32 %v2707_v59, %v6521_v20  ;;  %v2709_v55 = vadd.f32 %v2703_v32, %v8390_v22  ;;  %v2656_v31 = vadd.f32 %v7126_v50, %v2582_v46  ;;  %v8396_v46 = vld [vmem:[#allocation82_spill] sm:$0xff]  ;;  %v5061_v59 = vld [vmem:[%s8019_s7 + $0x38] sm:$0xff]  }
 0x3d5   :  { %v2712_v37 = vmul.f32 %v2708_v34, %v8384_v5  ;;  %v2716_v48 = vmul.f32 %v2708_v34, %v8385_v13  ;;  %v2720_v49 = vmul.f32 %v2708_v34, %v8386_v11  ;;  %v2724_v25 = vmul.f32 %v2708_v34, %v6521_v20  ;;  %4335 = vperm.xlu1 %5038, %v8388_v44   ;;  %v2777_v12 = vpop.xlane.xlu0 %2776  ;;  %v2780_v50 = vpop.xlane.xlu1 %2779 }
 0x3d6   :  { %v2727_v39 = vadd.f32 %v2711_v9, %v2653_v18  ;;  %v2731_v3 = vadd.f32 %v2715_v23, %v2657_v42  ;;  %v2735_v43 = vadd.f32 %v2719_v45, %v2661_v10  ;;  %v2739_v8 = vadd.f32 %v2723_v54, %v2665_v57  ;;  %v8391_v10 = vld [vmem:[#allocation94_spill] sm:$0xff]  ;;  %5008 = vmatprep.subr.bf16.mxu0 %v5060_v27  ;;  %v8400_v45 = vld [vmem:[#allocation25_spill] sm:$0xff] }
 0x3d7   :  { %v2728_v30 = vadd.f32 %v2712_v37, %v2654_v29  ;;  %v2732_v21 = vadd.f32 %v2716_v48, %v2658_v19  ;;  %v2736_v33 = vadd.f32 %v2720_v49, %v2662_v63  ;;  %v2740_v24 = vadd.f32 %v2724_v25, %v2666_v35  ;;  %5009 = vmatpush3.bf16.msra.mxu0 %v5060_v27  ;;  %v8401_v37 = vld [vmem:[#allocation31_spill] sm:$0xff]  ;;  %v8402_v49 = vld [vmem:[#allocation6_spill] sm:$0xff] }
 0x3d8   :  { %4149 = vperm.xlu0 %5037, %v8389_v0   ;;  %v2660_v18 = vadd.f32 %v7129_v2, %v2586_v53  ;;  %v2664_v42 = vadd.f32 %v7132_v58, %v2590_v40  ;;  %v2668_v57 = vadd.f32 %v8391_v10, %v2594_v60  ;;  %v8392_v29 = vcombine.high %v8390_v22, %v8390_v22 }
 0x3d9   :  { %v2781_v38 = vadd.f32 %v2771_v51, %v8393_v36  ;;  %v8394_v62 = vcombine.high %v8393_v36, %v8393_v36  ;;  %4343 = vperm.xlu1 %5038, %v8395_v1   ;;  %v2713_v2 = vmul.f32 %v2709_v55, %v8384_v5  ;;  %v2717_v58 = vmul.f32 %v2709_v55, %v8385_v13  ;;  %v2919_v23 = vpop.xlane.xlu0 %2918  ;;  %v8414_v1 = vld [vmem:[#allocation93_spill] sm:$0xff] }
 0x3da   :  { %v2710_v19 = vadd.f32 %v2706_v6, %v8392_v29  ;;  %v2721_v47 = vmul.f32 %v2709_v55, %v8386_v11  ;;  %v2725_v14 = vmul.f32 %v2709_v55, %v6521_v20  ;;  %v8397_v53 = vrot.slane %v8396_v46, %v8353_v41  ;;  %5010 = vmatprep.subr.bf16.mxu0 %v5061_v59  ;;  %v8406_v29 = vld [vmem:[#allocation70_spill] sm:$0xff] }
 0x3db   :  { %v2782_v52 = vadd.f32 %v2774_v17, %v8394_v62  ;;  %v2729_v63 = vadd.f32 %v2713_v2, %v2655_v7  ;;  %v2733_v35 = vadd.f32 %v2717_v58, %v2659_v56  ;;  %v2785_v54 = vmul.f32 %v2781_v38, %v8400_v45  ;;  %v8403_v56 = vld [vmem:[#allocation9_spill] sm:$0xff]  ;;  %5011 = vmatpush3.bf16.msra.mxu0 %v5061_v59  ;;  %v8416_v58 = vld [vmem:[#allocation90_spill] sm:$0xff] }
 0x3dc   :  { %4339 = vperm.xlu0 %5037, %v8397_v53   ;;  %v2714_v40 = vmul.f32 %v2710_v19, %v8384_v5  ;;  %v2718_v60 = vmul.f32 %v2710_v19, %v8385_v13  ;;  %v2722_v32 = vmul.f32 %v2710_v19, %v8386_v11  ;;  %v2726_v6 = vmul.f32 %v2710_v19, %v6521_v20  ;;  %v8398_v13 = vld [vmem:[#allocation85_spill] sm:$0xff]  ;;  %v2922_v20 = vpop.xlane.xlu1 %2921 }
 0x3dd   :  { %v2737_v4 = vadd.f32 %v2721_v47, %v2663_v28  ;;  %v2741_v34 = vadd.f32 %v2725_v14, %v2667_v26  ;;  %v8399_v11 = vrot.slane %v8398_v13, %v8353_v41  ;;  %v2789_v48 = vmul.f32 %v2781_v38, %v8401_v37  ;;  %v8404_v26 = vld [vmem:[#allocation86_spill] sm:$0xff]  ;;  %v2925_v10 = vpop.xlane.xlu0 %2924  ;;  %v8408_v19 = vld [vmem:[#allocation21_spill] sm:$0xff] }
 0x3de   :  { %v2730_v15 = vadd.f32 %v2714_v40, %v2656_v31  ;;  %v2734_v16 = vadd.f32 %v2718_v60, %v2660_v18  ;;  %v2738_v9 = vadd.f32 %v2722_v32, %v2664_v42  ;;  %v2742_v5 = vadd.f32 %v2726_v6, %v2668_v57  ;;  %v8405_v57 = vld [vmem:[#allocation91_spill] sm:$0xff] }
 0x3df   :  { %4351 = vperm.xlu1 %5038, %v8399_v11   ;;  %v2793_v7 = vmul.f32 %v2781_v38, %v8402_v49  ;;  %v2797_v28 = vmul.f32 %v2781_v38, %v8403_v56  ;;  %v2786_v25 = vmul.f32 %v2782_v52, %v8400_v45  ;;  %v2790_v51 = vmul.f32 %v2782_v52, %v8401_v37  ;;  %v8412_v38 = vld [vmem:[#allocation73_spill] sm:$0xff]  ;;  %v8418_v11 = vld [vmem:[#allocation88_spill] sm:$0xff] }
 0x3e0   :  { %4347 = vperm.xlu0 %5037, %v8404_v26   ;;  %v2794_v61 = vmul.f32 %v2782_v52, %v8402_v49  ;;  %v2798_v44 = vmul.f32 %v2782_v52, %v8403_v56  ;;  %v7286_v17 = vadd.f32 %v2785_v54, %v2727_v39  ;;  %v7288_v0 = vadd.f32 %v2789_v48, %v2731_v3  ;;  %v2928_v39 = vpop.xlane.xlu1 %2927 }
 0x3e1   :  { %v7290_v27 = vadd.f32 %v2793_v7, %v2735_v43  ;;  %v7292_v22 = vadd.f32 %v2797_v28, %v2739_v8  ;;  %v7294_v55 = vadd.f32 %v2786_v25, %v2728_v30  ;;  %v7296_v31 = vadd.f32 %v2790_v51, %v2732_v21  ;;  %v3067_v13 = vpop.xlane.xlu0 %3066  ;;  %v8421_v51 = vld [vmem:[#allocation26_spill] sm:$0xff] }
 0x3e2   :  { %v7298_v18 = vadd.f32 %v2794_v61, %v2736_v33  ;;  %v7300_v42 = vadd.f32 %v2798_v44, %v2740_v24  ;;  %v2783_v3 = vadd.f32 %v2777_v12, %v8406_v29  ;;  %v8407_v43 = vcombine.high %v8406_v29, %v8406_v29  ;;  %v8410_v33 = vld [vmem:[#allocation87_spill] sm:$0xff] }
 0x3e3   :  { %4359 = vperm.xlu1 %5038, %v8405_v57   ;;  %v2929_v36 = vadd.f32 %v2919_v23, %v8408_v19  ;;  %v8409_v30 = vcombine.high %v8408_v19, %v8408_v19  ;;  %v8411_v24 = vrot.slane %v8410_v33, %v8353_v41  ;;  %v2931_v62 = vadd.f32 %v2925_v10, %v8412_v38 }
 0x3e4   :  { %v2784_v8 = vadd.f32 %v2780_v50, %v8407_v43  ;;  %v8413_v52 = vcombine.high %v8412_v38, %v8412_v38  ;;  %v4267_v2 = vcombine.high %v8414_v1, %v8414_v1  ;;  %v8415_v50 = vld [vmem:[#allocation20_spill] sm:$0xff]  ;;  %v8417_v47 = vcombine.high %v8416_v58, %v8416_v58  ;;  %v3070_v54 = vpop.xlane.xlu1 %3069 }
 0x3e5   :  { %v2930_v21 = vadd.f32 %v2922_v20, %v8409_v30  ;;  %4355 = vperm.xlu0 %5037, %v8411_v24   ;;  %v2787_v46 = vmul.f32 %v2783_v3, %v8400_v45  ;;  %v2791_v53 = vmul.f32 %v2783_v3, %v8401_v37  ;;  %v2795_v40 = vmul.f32 %v2783_v3, %v8402_v49  ;;  %v3073_v57 = vpop.xlane.xlu0 %3072 }
 0x3e6   :  { %v2932_v12 = vadd.f32 %v2928_v39, %v8413_v52  ;;  %v7324_v14 = vrot.slane %v8417_v47, %v8415_v50  ;;  %v2799_v60 = vmul.f32 %v2783_v3, %v8403_v56  ;;  %v2788_v32 = vmul.f32 %v2784_v8, %v8400_v45  ;;  %v8420_v45 = vld [vmem:[#allocation92_spill] sm:$0xff]  ;;  %v8425_v39 = vld [vmem:[#allocation95_spill] sm:$0xff] }
 0x3e7   :  { %v2792_v6 = vmul.f32 %v2784_v8, %v8401_v37  ;;  %v2796_v59 = vmul.f32 %v2784_v8, %v8402_v49  ;;  %v2800_v23 = vmul.f32 %v2784_v8, %v8403_v56  ;;  %v8419_v20 = vrot.slane %v8418_v11, %v8353_v41  ;;  %v8428_v52 = vld [vmem:[#allocation24_spill] sm:$0xff] }
 0x3e8   :  { %v7337_v48 = vadd.f32 %v2787_v46, %v2729_v63  ;;  %v7339_v7 = vadd.f32 %v2791_v53, %v2733_v35  ;;  %v7341_v28 = vadd.f32 %v2795_v40, %v2737_v4  ;;  %v7343_v26 = vadd.f32 %v2799_v60, %v2741_v34  ;;  %v8422_v63 = vld [vmem:[#allocation32_spill] sm:$0xff]  ;;  %v8423_v4 = vld [vmem:[#allocation7_spill] sm:$0xff]  ;;  %v3076_v29 = vpop.xlane.xlu1 %3075 }
 0x3e9   :  { %4367 = vperm.xlu1 %5038, %v8419_v20   ;;  %4363 = vperm.xlu0 %5037, %v8420_v45   ;;  %v7346_v37 = vadd.f32 %v2788_v32, %v2730_v15  ;;  %v7348_v49 = vadd.f32 %v2792_v6, %v2734_v16  ;;  %v7350_v56 = vadd.f32 %v2796_v59, %v2738_v9  ;;  %v8424_v34 = vld [vmem:[#allocation11_spill] sm:$0xff]  ;;  %v8429_v50 = vld [vmem:[#allocation16_spill] sm:$0xff]  ;;  %v3215_v6 = vpop.xlane.xlu0 %3214  ;;  %v8436_v45 = vld [vmem:[#allocation33_spill] sm:$0xff] }
 0x3ea   :  { %v7352_v25 = vadd.f32 %v2800_v23, %v2742_v5  ;;  %v7355_v61 = vmul.f32 %v2929_v36, %v8421_v51  ;;  %v7358_v35 = vmul.f32 %v2929_v36, %v8422_v63  ;;  %v7361_v44 = vmul.f32 %v2929_v36, %v8423_v4  ;;  %v8431_v53 = vld [vmem:[#allocation71_spill] sm:$0xff] }
 0x3eb   :  { %v7364_v10 = vmul.f32 %v2929_v36, %v8424_v34  ;;  %v7367_v15 = vmul.f32 %v2930_v21, %v8421_v51  ;;  %v7370_v16 = vmul.f32 %v2930_v21, %v8422_v63  ;;  %v7373_v9 = vmul.f32 %v2930_v21, %v8423_v4  ;;  %v8426_v36 = vld [vmem:[#allocation89_spill] sm:$0xff]  ;;  %v8434_v20 = vld [vmem:[#allocation27_spill] sm:$0xff] }
 0x3ec   :  { %v7376_v5 = vmul.f32 %v2930_v21, %v8424_v34  ;;  %v7380_v3 = vmul.f32 %v2931_v62, %v8421_v51  ;;  %v7383_v43 = vmul.f32 %v2931_v62, %v8422_v63  ;;  %v7386_v8 = vmul.f32 %v2931_v62, %v8423_v4  ;;  %v3218_v59 = vpop.xlane.xlu1 %3217 }
 0x3ed   :  { %4375 = vperm.xlu1 %5038, %v8425_v39   ;;  %v7389_v19 = vmul.f32 %v2931_v62, %v8424_v34  ;;  %v8427_v30 = vrot.slane %v8426_v36, %v8353_v41  ;;  %v7395_v21 = vmul.f32 %v2932_v12, %v8421_v51  ;;  %v7398_v33 = vmul.f32 %v2932_v12, %v8422_v63  ;;  %v8438_v63 = vld [vmem:[#allocation46_spill] sm:$0xff] }
 0x3ee   :  { %v7401_v24 = vmul.f32 %v2932_v12, %v8423_v4  ;;  %v7404_v38 = vmul.f32 %v2932_v12, %v8424_v34  ;;  %v3558_v62 = vcombine.high %v8428_v52, %v8428_v52  ;;  %v3077_v58 = vadd.f32 %v3067_v13, %v8429_v50 }
 0x3ef   :  { %4371 = vperm.xlu0 %5037, %v8427_v30   ;;  %v8430_v47 = vcombine.high %v8429_v50, %v8429_v50  ;;  %v3079_v40 = vadd.f32 %v3073_v57, %v8431_v53  ;;  %v8432_v60 = vcombine.high %v8431_v53, %v8431_v53  ;;  %v8433_v12 = vrot.slane %v8414_v1, %v8353_v41  ;;  %v8440_v1 = vld [vmem:[#allocation53_spill] sm:$0xff]  ;;  %v8442_v57 = vld [vmem:[#allocation96_spill] sm:$0xff] }
 0x3f0   :  { %v4329_v23 = vrot.slane %v4267_v2, %v8353_v41  ;;  %v4325_v13 = vrot.slane %v7324_v14, %v8353_v41  ;;  %v4269_v11 = vcombine.high %v7324_v14, %v7324_v14  ;;  %v7428_v51 = vmul.f32 %v3077_v58, %v8436_v45 }
 0x3f1   :  { %v3078_v46 = vadd.f32 %v3070_v54, %v8430_v47  ;;  %v3080_v32 = vadd.f32 %v3076_v29, %v8432_v60  ;;  %4383 = vperm.xlu1 %5038, %v8433_v12   ;;  %v7425_v54 = vmul.f32 %v3077_v58, %v8434_v20  ;;  %v7431_v4 = vmul.f32 %v3077_v58, %v8438_v63  ;;  %v3221_v12 = vpop.xlane.xlu0 %3220 }
 0x3f2   :  { %8437 = vst [vmem:[#allocation35_spill] sm:$0xff] %v7428_v51  ;;  %v7434_v34 = vmul.f32 %v3077_v58, %v8440_v1  ;;  %v7450_v36 = vmul.f32 %v3079_v40, %v8434_v20  ;;  %v7453_v30 = vmul.f32 %v3079_v40, %v8436_v45  ;;  %v7456_v50 = vmul.f32 %v3079_v40, %v8438_v63  ;;  %v8490_v51 = vld [vmem:[#allocation15_spill] sm:$0xff] }
 0x3f3   :  { %8435 = vst [vmem:[#allocation8_spill] sm:$0xff] %v7425_v54  ;;  %8439 = vst [vmem:[#allocation36_spill] sm:$0xff] %v7431_v4  ;;  %4379 = vperm.xlu0 %5037, %v8442_v57   ;;  %v7438_v2 = vmul.f32 %v3078_v46, %v8434_v20  ;;  %v7441_v39 = vmul.f32 %v3078_v46, %v8436_v45  ;;  %v7444_v14 = vmul.f32 %v3078_v46, %v8438_v63  ;;  %v3224_v57 = vpop.xlane.xlu1 %3223 }
 0x3f4   :  { %8441 = vst [vmem:[#allocation10_spill] sm:$0xff] %v7434_v34  ;;  %v7447_v29 = vmul.f32 %v3078_v46, %v8440_v1  ;;  %8443 = vst [vmem:[#allocation13_spill] sm:$0xff] %v7450_v36  ;;  %v7459_v58 = vmul.f32 %v3079_v40, %v8440_v1  ;;  %v7462_v47 = vmul.f32 %v3080_v32, %v8434_v20  ;;  %v8453_v20 = vld [vmem:[#allocation78_spill] sm:$0xff] }
 0x3f5   :  { %8444 = vst [vmem:[#allocation83_spill] sm:$0xff] %v7453_v30  ;;  %8445 = vst [vmem:[#allocation18_spill] sm:$0xff] %v7456_v50  ;;  %v7465_v53 = vmul.f32 %v3080_v32, %v8436_v45  ;;  %v7468_v46 = vmul.f32 %v3080_v32, %v8438_v63  ;;  %v7471_v60 = vmul.f32 %v3080_v32, %v8440_v1  ;;  %4391 = vperm.xlu1 %5038, %v4329_v23   ;;  %v8451_v30 = vld [vmem:[#allocation77_spill] sm:$0xff]  ;;  %v4705_v45 = vld [vmem:[%s8020_s11] sm:$0xff] }
 0x3f6   :  { %8446 = vst [vmem:[#allocation94_spill] sm:$0xff] %v7459_v58  ;;  %8447 = vst [vmem:[#allocation65_spill] sm:$0xff] %v7462_v47  ;;  %v3225_v50 = vadd.f32 %v3215_v6, %v8451_v30  ;;  %v8452_v40 = vcombine.high %v8451_v30, %v8451_v30  ;;  %v3227_v47 = vadd.f32 %v3221_v12, %v8453_v20  ;;  %v8454_v32 = vld [vmem:[#allocation3_spill] sm:$0xff] }
 0x3f7   :  { %8448 = vst [vmem:[#allocation84_spill] sm:$0xff] %v7465_v53  ;;  %8449 = vst [vmem:[#allocation82_spill] sm:$0xff] %v7468_v46  ;;  %4387 = vperm.xlu0 %5037, %v4325_v13   ;;  %v4333_v63 = vrot.slane %v4269_v11, %v8353_v41  ;;  %v7484_v1 = vrot.slane %v8428_v52, %v8454_v32  ;;  %v8456_v6 = vcombine.high %v8453_v20, %v8453_v20  ;;  %v8457_v30 = vld [vmem:[#allocation23_spill] sm:$0xff]  ;;  %v8463_v41 = vld [vmem:[#allocation34_spill] sm:$0xff] }
 0x3f8   :  { %8450 = vst [vmem:[#allocation85_spill] sm:$0xff] %v7471_v60  ;;  %v3226_v58 = vadd.f32 %v3218_v59, %v8452_v40  ;;  %v8458_v59 = vcombine.high %v8457_v30, %v8457_v30  ;;  %v7496_v13 = vrot.slane %v3558_v62, %v8454_v32  ;;  %v8461_v40 = vld [vmem:[#allocation28_spill] sm:$0xff]  ;;  %v7502_v11 = vmul.f32 %v3225_v50, %v8463_v41  ;;  %v8465_v52 = vld [vmem:[#allocation47_spill] sm:$0xff] }
 0x3f9   :  { %8455 = vst [vmem:[#allocation25_spill] sm:$0xff] %v7484_v1  ;;  %v3228_v23 = vadd.f32 %v3224_v57, %v8456_v6  ;;  %v7499_v60 = vmul.f32 %v3225_v50, %v8461_v40  ;;  %v7505_v46 = vmul.f32 %v3225_v50, %v8465_v52  ;;  %v8467_v20 = vld [vmem:[#allocation56_spill] sm:$0xff]  ;;  %4715 = vperm.xlu1 %5038, %v4705_v45  }
 0x3fa   :  { %v7493_v12 = vrot.slane %v8458_v59, %v8454_v32  ;;  %8460 = vst [vmem:[#allocation6_spill] sm:$0xff] %v7496_v13  ;;  %8464 = vst [vmem:[#allocation86_spill] sm:$0xff] %v7502_v11  ;;  %v7508_v57 = vmul.f32 %v3225_v50, %v8467_v20  ;;  %v7511_v6 = vmul.f32 %v3226_v58, %v8461_v40  ;;  %v2845_v32 = vpop.xlane.xlu0 %2844  ;;  %v2848_v11 = vpop.xlane.xlu1 %2847  ;;  %v4708_v13 = vld [vmem:[%s8020_s11 + $0x18] sm:$0xff] }
 0x3fb   :  { %8462 = vst [vmem:[#allocation9_spill] sm:$0xff] %v7499_v60  ;;  %8466 = vst [vmem:[#allocation91_spill] sm:$0xff] %v7505_v46  ;;  %v7514_v30 = vmul.f32 %v3226_v58, %v8463_v41  ;;  %v7517_v62 = vmul.f32 %v3226_v58, %v8465_v52  ;;  %v7520_v59 = vmul.f32 %v3226_v58, %v8467_v20  ;;  %4395 = vperm.xlu0 %5037, %v4333_v63   ;;  %v4707_v58 = vld [vmem:[%s8020_s11 + $0x10] sm:$0xff]  ;;  %v8481_v63 = vld [vmem:[#allocation67_spill] sm:$0xff] }
 0x3fc   :  { %8459 = vst [vmem:[#allocation31_spill] sm:$0xff] %v7493_v12  ;;  %8468 = vst [vmem:[#allocation70_spill] sm:$0xff] %v7508_v57  ;;  %v7523_v46 = vmul.f32 %v3227_v47, %v8461_v40  ;;  %v7526_v50 = vmul.f32 %v3227_v47, %v8463_v41  ;;  %v7538_v45 = vmul.f32 %v3228_v23, %v8461_v40 }
 0x3fd   :  { %8469 = vst [vmem:[#allocation21_spill] sm:$0xff] %v7511_v6  ;;  %8470 = vst [vmem:[#allocation87_spill] sm:$0xff] %v7514_v30  ;;  %v7529_v6 = vmul.f32 %v3227_v47, %v8465_v52  ;;  %v7532_v30 = vmul.f32 %v3227_v47, %v8467_v20  ;;  %v4706_v47 = vld [vmem:[%s8020_s11 + $0x8] sm:$0xff]  ;;  %4725 = vperm.xlu1 %5038, %v4707_v58   ;;  %v8489_v58 = vld [vmem:[#allocation42_spill] sm:$0xff] }
 0x3fe   :  { %8471 = vst [vmem:[#allocation73_spill] sm:$0xff] %v7517_v62  ;;  %8472 = vst [vmem:[#allocation93_spill] sm:$0xff] %v7520_v59  ;;  %v7541_v59 = vmul.f32 %v3228_v23, %v8463_v41  ;;  %v8487_v41 = vld [vmem:[#allocation37_spill] sm:$0xff] }
 0x3ff   :  { %8473 = vst [vmem:[#allocation20_spill] sm:$0xff] %v7523_v46  ;;  %8474 = vst [vmem:[#allocation90_spill] sm:$0xff] %v7526_v50  ;;  %v7544_v46 = vmul.f32 %v3228_v23, %v8465_v52  ;;  %v7547_v50 = vmul.f32 %v3228_v23, %v8467_v20  ;;  %v2854_v23 = vpop.xlane.xlu1 %2853  ;;  %v8488_v52 = vld [vmem:[#allocation38_spill] sm:$0xff]  ;;  %4720 = vperm.xlu0 %5037, %v4706_v47  }
 0x400   :  { %8475 = vst [vmem:[#allocation88_spill] sm:$0xff] %v7529_v6  ;;  %8476 = vst [vmem:[#allocation92_spill] sm:$0xff] %v7532_v30  ;;  %v2855_v30 = vadd.f32 %v2845_v32, %v8481_v63  ;;  %v8482_v6 = vcombine.high %v8481_v63, %v8481_v63 }
 0x401   :  { %8477 = vst [vmem:[#allocation26_spill] sm:$0xff] %v7538_v45  ;;  %8478 = vst [vmem:[#allocation32_spill] sm:$0xff] %v7541_v59 }
 0x402   :  { %8479 = vst [vmem:[#allocation7_spill] sm:$0xff] %v7544_v46  ;;  %8480 = vst [vmem:[#allocation11_spill] sm:$0xff] %v7547_v50  ;;  %v2856_v40 = vadd.f32 %v2848_v11, %v8482_v6  ;;  %v2851_v46 = vpop.xlane.xlu0 %2850  ;;  %v8486_v6 = vld [vmem:[#allocation12_spill] sm:$0xff]  ;;  %v2863_v45 = vmul.f32 %v2855_v30, %v8487_v41  ;;  %v2867_v59 = vmul.f32 %v2855_v30, %v8488_v52  ;;  %v4709_v50 = vld [vmem:[%s8020_s11 + $0x20] sm:$0xff] }
 0x403   :  { %v2859_v63 = vmul.f32 %v2855_v30, %v8486_v6  ;;  %v2871_v57 = vmul.f32 %v2855_v30, %v8489_v58  ;;  %4735 = vperm.xlu1 %5038, %v4709_v50   ;;  %v2996_v4 = vpop.xlane.xlu1 %2995  ;;  %v2857_v54 = vadd.f32 %v2851_v46, %v8490_v51  ;;  %4730 = vperm.xlu0 %5037, %v4708_v13  }
 0x404   :  { %v2860_v62 = vmul.f32 %v2856_v40, %v8486_v6  ;;  %v2864_v32 = vmul.f32 %v2856_v40, %v8487_v41  ;;  %v2868_v1 = vmul.f32 %v2856_v40, %v8488_v52  ;;  %v2872_v11 = vmul.f32 %v2856_v40, %v8489_v58 }
 0x405   :  { %v2875_v12 = vadd.f32 %v2859_v63, %v7286_v17  ;;  %v2879_v30 = vadd.f32 %v2863_v45, %v7288_v0  ;;  %v2883_v47 = vadd.f32 %v2867_v59, %v7290_v27  ;;  %v2887_v20 = vadd.f32 %v2871_v57, %v7292_v22 }
 0x406   :  { %v2876_v60 = vadd.f32 %v2860_v62, %v7294_v55  ;;  %v2880_v53 = vadd.f32 %v2864_v32, %v7296_v31  ;;  %v2884_v36 = vadd.f32 %v2868_v1, %v7298_v18  ;;  %v2888_v40 = vadd.f32 %v2872_v11, %v7300_v42  ;;  %v2993_v34 = vpop.xlane.xlu0 %2992  ;;  %v4711_v55 = vld [vmem:[%s8020_s11 + $0x30] sm:$0xff]  ;;  %v8492_v42 = vld [vmem:[#allocation22_spill] sm:$0xff] }
 0x407   :  { %v8491_v17 = vcombine.high %v8490_v51, %v8490_v51  ;;  %v2949_v27 = vadd.f32 %v7355_v61, %v2875_v12  ;;  %v2953_v22 = vadd.f32 %v7358_v35, %v2879_v30  ;;  %v2957_v31 = vadd.f32 %v7361_v44, %v2883_v47  ;;  %v4710_v51 = vld [vmem:[%s8020_s11 + $0x28] sm:$0xff]  ;;  %4745 = vperm.xlu1 %5038, %v4711_v55   ;;  %v3002_v57 = vpop.xlane.xlu1 %3001 }
 0x408   :  { %v2961_v18 = vadd.f32 %v7364_v10, %v2887_v20  ;;  %v3003_v1 = vadd.f32 %v2993_v34, %v8492_v42  ;;  %v2950_v46 = vadd.f32 %v7367_v15, %v2876_v60  ;;  %v2861_v61 = vmul.f32 %v2857_v54, %v8486_v6  ;;  %4740 = vperm.xlu0 %5037, %v4710_v51   ;;  %v4712_v20 = vld [vmem:[%s8020_s11 + $0x38] sm:$0xff] }
 0x409   :  { %v2858_v0 = vadd.f32 %v2854_v23, %v8491_v17  ;;  %v2865_v35 = vmul.f32 %v2857_v54, %v8487_v41  ;;  %v2869_v12 = vmul.f32 %v2857_v54, %v8488_v52  ;;  %v2873_v13 = vmul.f32 %v2857_v54, %v8489_v58 }
 0x40a   :  { %v2999_v60 = vpop.xlane.xlu0 %2998  ;;  %v2877_v62 = vadd.f32 %v2861_v61, %v7337_v48  ;;  %v8493_v48 = vld [vmem:[#allocation39_spill] sm:$0xff] }
 0x40b   :  { %v2862_v44 = vmul.f32 %v2858_v0, %v8486_v6  ;;  %v2866_v10 = vmul.f32 %v2858_v0, %v8487_v41  ;;  %v2870_v34 = vmul.f32 %v2858_v0, %v8488_v52  ;;  %v2874_v15 = vmul.f32 %v2858_v0, %v8489_v58  ;;  %v3141_v47 = vpop.xlane.xlu1 %3140 }
 0x40c   :  { %v2881_v59 = vadd.f32 %v2865_v35, %v7339_v7  ;;  %v2885_v50 = vadd.f32 %v2869_v12, %v7341_v28  ;;  %v2889_v45 = vadd.f32 %v2873_v13, %v7343_v26  ;;  %v3007_v32 = vmul.f32 %v3003_v1, %v8493_v48  ;;  %v8494_v7 = vld [vmem:[#allocation40_spill] sm:$0xff]  ;;  %v8495_v28 = vld [vmem:[#allocation41_spill] sm:$0xff]  ;;  %v8496_v26 = vld [vmem:[#allocation43_spill] sm:$0xff]  ;;  %4750 = vperm.xlu0 %5037, %v4712_v20  }
 0x40d   :  { %v2878_v54 = vadd.f32 %v2862_v44, %v7346_v37  ;;  %v2882_v41 = vadd.f32 %v2866_v10, %v7348_v49  ;;  %v2886_v52 = vadd.f32 %v2870_v34, %v7350_v56  ;;  %v2890_v23 = vadd.f32 %v2874_v15, %v7352_v25  ;;  %v8498_v35 = vld [vmem:[#allocation74_spill] sm:$0xff] }
 0x40e   :  { %v3011_v11 = vmul.f32 %v3003_v1, %v8494_v7  ;;  %v3015_v6 = vmul.f32 %v3003_v1, %v8495_v28  ;;  %v3019_v63 = vmul.f32 %v3003_v1, %v8496_v26  ;;  %v2954_v37 = vadd.f32 %v7370_v16, %v2880_v53  ;;  %v3144_v30 = vpop.xlane.xlu0 %3143 }
 0x40f   :  { %v2958_v49 = vadd.f32 %v7373_v9, %v2884_v36  ;;  %v2962_v56 = vadd.f32 %v7376_v5, %v2888_v40  ;;  %v8497_v25 = vcombine.high %v8492_v42, %v8492_v42  ;;  %v3023_v17 = vadd.f32 %v3007_v32, %v2949_v27  ;;  %v7643_v42 = vpop.xlane.xlu1 %3149  ;;  %v8500_v32 = vld [vmem:[#allocation17_spill] sm:$0xff] }
 0x410   :  { %v3027_v0 = vadd.f32 %v3011_v11, %v2953_v22  ;;  %v3031_v55 = vadd.f32 %v3015_v6, %v2957_v31  ;;  %v3035_v51 = vadd.f32 %v3019_v63, %v2961_v18  ;;  %v2951_v5 = vadd.f32 %v7380_v3, %v2877_v62 }
 0x411   :  { %v3004_v58 = vadd.f32 %v2996_v4, %v8497_v25  ;;  %v2955_v36 = vadd.f32 %v7383_v43, %v2881_v59  ;;  %v2959_v4 = vadd.f32 %v7386_v8, %v2885_v50  ;;  %v2963_v53 = vadd.f32 %v7389_v19, %v2889_v45 }
 0x412   :  { %v3147_v18 = vpop.xlane.xlu0 %3146  ;;  %v3005_v12 = vadd.f32 %v2999_v60, %v8498_v35  ;;  %v2952_v13 = vadd.f32 %v7395_v21, %v2878_v54  ;;  %v2956_v44 = vadd.f32 %v7398_v33, %v2882_v41  ;;  %v2960_v3 = vadd.f32 %v7401_v24, %v2886_v52 }
 0x413   :  { %v3008_v61 = vmul.f32 %v3004_v58, %v8493_v48  ;;  %v3012_v1 = vmul.f32 %v3004_v58, %v8494_v7  ;;  %v3016_v16 = vmul.f32 %v3004_v58, %v8495_v28  ;;  %v3020_v9 = vmul.f32 %v3004_v58, %v8496_v26 }
 0x414   :  { %v2964_v43 = vadd.f32 %v7404_v38, %v2890_v23  ;;  %v8499_v8 = vcombine.high %v8498_v35, %v8498_v35  ;;  %v3009_v34 = vmul.f32 %v3005_v12, %v8493_v48  ;;  %v3013_v15 = vmul.f32 %v3005_v12, %v8494_v7 }
 0x415   :  { %v3024_v40 = vadd.f32 %v3008_v61, %v2950_v46  ;;  %v3028_v27 = vadd.f32 %v3012_v1, %v2954_v37  ;;  %v3032_v22 = vadd.f32 %v3016_v16, %v2958_v49  ;;  %v3036_v31 = vadd.f32 %v3020_v9, %v2962_v56  ;;  %v8504_v37 = vld [vmem:[#allocation36_spill] sm:$0xff]  ;;  %v8505_v56 = vld [vmem:[#allocation10_spill] sm:$0xff]  ;;  %v8507_v16 = vld [vmem:[#allocation45_spill] sm:$0xff] }
 0x416   :  { %v3006_v19 = vadd.f32 %v3002_v57, %v8499_v8  ;;  %v3017_v21 = vmul.f32 %v3005_v12, %v8495_v28  ;;  %v3021_v33 = vmul.f32 %v3005_v12, %v8496_v26  ;;  %v7663_v62 = vpop.xlane.xlu0 %3288  ;;  %v3029_v59 = vadd.f32 %v3013_v15, %v2955_v36  ;;  %v8509_v36 = vld [vmem:[#allocation64_spill] sm:$0xff]  ;;  %v8511_v8 = vld [vmem:[#allocation83_spill] sm:$0xff] }
 0x417   :  { %v3098_v46 = vadd.f32 %v7438_v2, %v3024_v40  ;;  %v3102_v10 = vadd.f32 %v7441_v39, %v3028_v27  ;;  %v7665_v2 = vpop.xlane.xlu1 %3291  ;;  %v3025_v39 = vadd.f32 %v3009_v34, %v2951_v5  ;;  %v3106_v20 = vadd.f32 %v7444_v14, %v3032_v22  ;;  %v8506_v14 = vld [vmem:[#allocation44_spill] sm:$0xff]  ;;  %v8508_v5 = vld [vmem:[#allocation57_spill] sm:$0xff]  ;;  %v8512_v34 = vld [vmem:[#allocation18_spill] sm:$0xff] }
 0x418   :  { %v3010_v24 = vmul.f32 %v3006_v19, %v8493_v48  ;;  %v3014_v38 = vmul.f32 %v3006_v19, %v8494_v7  ;;  %v3018_v60 = vmul.f32 %v3006_v19, %v8495_v28  ;;  %v3022_v57 = vmul.f32 %v3006_v19, %v8496_v26  ;;  %v8502_v28 = vld [vmem:[#allocation8_spill] sm:$0xff]  ;;  %v8503_v26 = vld [vmem:[#allocation35_spill] sm:$0xff] }
 0x419   :  { %v3033_v50 = vadd.f32 %v3017_v21, %v2959_v4  ;;  %v3037_v45 = vadd.f32 %v3021_v33, %v2963_v53  ;;  %v3110_v48 = vadd.f32 %v7447_v29, %v3036_v31  ;;  %v8501_v7 = vcombine.high %v8500_v32, %v8500_v32  ;;  %v8513_v21 = vld [vmem:[#allocation94_spill] sm:$0xff] }
 0x41a   :  { %v3026_v54 = vadd.f32 %v3010_v24, %v2952_v13  ;;  %v3030_v41 = vadd.f32 %v3014_v38, %v2956_v44  ;;  %v3034_v52 = vadd.f32 %v3018_v60, %v2960_v3  ;;  %v3038_v23 = vadd.f32 %v3022_v57, %v2964_v43  ;;  %v7677_v61 = vpop.xlane.xlu0 %3294  ;;  %v8510_v3 = vld [vmem:[#allocation13_spill] sm:$0xff]  ;;  %v8516_v60 = vld [vmem:[#allocation84_spill] sm:$0xff] }
 0x41b   :  { %v3152_v11 = vadd.f32 %v3144_v30, %v8501_v7  ;;  %v3097_v6 = vadd.f32 %v8502_v28, %v3023_v17  ;;  %v3101_v63 = vadd.f32 %v8503_v26, %v3027_v0  ;;  %v3105_v49 = vadd.f32 %v8504_v37, %v3031_v55  ;;  %v7679_v1 = vpop.xlane.xlu1 %3297  ;;  %v8515_v24 = vld [vmem:[#allocation65_spill] sm:$0xff] }
 0x41c   :  { %v3109_v25 = vadd.f32 %v8505_v56, %v3035_v51  ;;  %v3151_v58 = vadd.f32 %v3141_v47, %v8500_v32  ;;  %v3099_v43 = vadd.f32 %v8510_v3, %v3025_v39  ;;  %v3103_v19 = vadd.f32 %v8511_v8, %v3029_v59  ;;  %v8518_v32 = vld [vmem:[#allocation85_spill] sm:$0xff] }
 0x41d   :  { %v3156_v29 = vmul.f32 %v3152_v11, %v8506_v14  ;;  %v3160_v9 = vmul.f32 %v3152_v11, %v8507_v16  ;;  %v3164_v30 = vmul.f32 %v3152_v11, %v8508_v5  ;;  %v3168_v17 = vmul.f32 %v3152_v11, %v8509_v36  ;;  %v8520_v59 = vld [vmem:[#allocation9_spill] sm:$0xff] }
 0x41e   :  { %v3155_v0 = vmul.f32 %v3151_v58, %v8506_v14  ;;  %v3159_v55 = vmul.f32 %v3151_v58, %v8507_v16  ;;  %v3163_v51 = vmul.f32 %v3151_v58, %v8508_v5  ;;  %v3167_v47 = vmul.f32 %v3151_v58, %v8509_v36  ;;  %v7689_v13 = vpop.xlane.xlu0 %3362  ;;  %v8527_v3 = vld [vmem:[#allocation73_spill] sm:$0xff] }
 0x41f   :  { %v3172_v4 = vadd.f32 %v3156_v29, %v3098_v46  ;;  %v3176_v53 = vadd.f32 %v3160_v9, %v3102_v10  ;;  %v3180_v40 = vadd.f32 %v3164_v30, %v3106_v20  ;;  %v3184_v27 = vadd.f32 %v3168_v17, %v3110_v48  ;;  %v7691_v44 = vpop.xlane.xlu1 %3365  ;;  %v8514_v46 = vld [vmem:[#allocation19_spill] sm:$0xff]  ;;  %v8517_v20 = vld [vmem:[#allocation82_spill] sm:$0xff]  ;;  %v8528_v8 = vld [vmem:[#allocation93_spill] sm:$0xff] }
 0x420   :  { %v3171_v22 = vadd.f32 %v3155_v0, %v3097_v6  ;;  %v3175_v31 = vadd.f32 %v3159_v55, %v3101_v63  ;;  %v3179_v35 = vadd.f32 %v3163_v51, %v3105_v49  ;;  %v3183_v12 = vadd.f32 %v3167_v47, %v3109_v25  ;;  %v8522_v0 = vld [vmem:[#allocation91_spill] sm:$0xff]  ;;  %v8523_v55 = vld [vmem:[#allocation70_spill] sm:$0xff] }
 0x421   :  { %v3107_v15 = vadd.f32 %v8512_v34, %v3033_v50  ;;  %v3111_v33 = vadd.f32 %v8513_v21, %v3037_v45  ;;  %v3153_v10 = vadd.f32 %v3147_v18, %v8514_v46  ;;  %v3100_v38 = vadd.f32 %v8515_v24, %v3026_v54  ;;  %v8521_v50 = vld [vmem:[#allocation86_spill] sm:$0xff]  ;;  %v8524_v51 = vld [vmem:[#allocation79_spill] sm:$0xff]  ;;  %v8530_v21 = vld [vmem:[#allocation48_spill] sm:$0xff] }
 0x422   :  { %v3104_v57 = vadd.f32 %v8516_v60, %v3030_v41  ;;  %v3108_v48 = vadd.f32 %v8517_v20, %v3034_v52  ;;  %v3112_v7 = vadd.f32 %v8518_v32, %v3038_v23  ;;  %v8519_v11 = vcombine.high %v8514_v46, %v8514_v46  ;;  %v7716_v63 = vpop.xlane.xlu0 %3368  ;;  %v8532_v46 = vld [vmem:[#allocation58_spill] sm:$0xff] }
 0x423   :  { %v3245_v28 = vadd.f32 %v8520_v59, %v3171_v22  ;;  %v3249_v6 = vadd.f32 %v8521_v50, %v3175_v31  ;;  %v3157_v45 = vmul.f32 %v3153_v10, %v8506_v14  ;;  %v3161_v18 = vmul.f32 %v3153_v10, %v8507_v16  ;;  %v7718_v37 = vpop.xlane.xlu1 %3371  ;;  %v8526_v22 = vld [vmem:[#allocation87_spill] sm:$0xff]  ;;  %v8534_v59 = vld [vmem:[#allocation20_spill] sm:$0xff] }
 0x424   :  { %v3154_v39 = vadd.f32 %v7643_v42, %v8519_v11  ;;  %v3165_v54 = vmul.f32 %v3153_v10, %v8508_v5  ;;  %v3169_v41 = vmul.f32 %v3153_v10, %v8509_v36  ;;  %v3250_v31 = vadd.f32 %v8526_v22, %v3176_v53 }
 0x425   :  { %v3173_v49 = vadd.f32 %v3157_v45, %v3099_v43  ;;  %v3177_v56 = vadd.f32 %v3161_v18, %v3103_v19  ;;  %v3254_v43 = vadd.f32 %v8527_v3, %v3180_v40  ;;  %v3258_v19 = vadd.f32 %v8528_v8, %v3184_v27  ;;  %v8535_v45 = vld [vmem:[#allocation90_spill] sm:$0xff] }
 0x426   :  { %v3158_v52 = vmul.f32 %v3154_v39, %v8506_v14  ;;  %v3162_v23 = vmul.f32 %v3154_v39, %v8507_v16  ;;  %v3166_v26 = vmul.f32 %v3154_v39, %v8508_v5  ;;  %v3170_v42 = vmul.f32 %v3154_v39, %v8509_v36  ;;  %v8525_v36 = vld [vmem:[#allocation21_spill] sm:$0xff] }
 0x427   :  { %v3181_v25 = vadd.f32 %v3165_v54, %v3107_v15  ;;  %v3185_v58 = vadd.f32 %v3169_v41, %v3111_v33  ;;  %v3253_v14 = vadd.f32 %v8522_v0, %v3179_v35  ;;  %v3257_v16 = vadd.f32 %v8523_v55, %v3183_v12  ;;  %v8531_v33 = vld [vmem:[#allocation49_spill] sm:$0xff]  ;;  %v3514_v60 = vpop.xlane.xlu1 %3513  ;;  %v8536_v54 = vld [vmem:[#allocation88_spill] sm:$0xff]  ;;  %v8539_v0 = vld [vmem:[#allocation26_spill] sm:$0xff] }
 0x428   :  { %v3174_v29 = vadd.f32 %v3158_v52, %v3100_v38  ;;  %v3178_v9 = vadd.f32 %v3162_v23, %v3104_v57  ;;  %v3182_v30 = vadd.f32 %v3166_v26, %v3108_v48  ;;  %v3186_v17 = vadd.f32 %v3170_v42, %v3112_v7  ;;  %v3511_v38 = vpop.xlane.xlu0 %3510  ;;  %v8537_v52 = vld [vmem:[#allocation92_spill] sm:$0xff]  ;;  %v8541_v55 = vld [vmem:[#allocation7_spill] sm:$0xff] }
 0x429   :  { %v3299_v5 = vadd.f32 %v7663_v62, %v8524_v51  ;;  %v3246_v47 = vadd.f32 %v8525_v36, %v3172_v4  ;;  %v8529_v34 = vcombine.high %v8524_v51, %v8524_v51  ;;  %v8533_v62 = vld [vmem:[#allocation66_spill] sm:$0xff]  ;;  %v3247_v50 = vadd.f32 %v8534_v59, %v3173_v49  ;;  %v8538_v26 = vld [vmem:[#allocation80_spill] sm:$0xff]  ;;  %v8542_v51 = vld [vmem:[#allocation11_spill] sm:$0xff] }
 0x42a   :  { %v3251_v18 = vadd.f32 %v8535_v45, %v3177_v56  ;;  %v3255_v41 = vadd.f32 %v8536_v54, %v3181_v25  ;;  %v3259_v23 = vadd.f32 %v8537_v52, %v3185_v58  ;;  %v3301_v42 = vadd.f32 %v7677_v61, %v8538_v26  ;;  %v8544_v36 = vld [vmem:[#allocation2_spill] sm:$0xff] }
 0x42b   :  { %v3300_v15 = vadd.f32 %v7665_v2, %v8529_v34  ;;  %v3303_v35 = vmul.f32 %v3299_v5, %v8530_v21  ;;  %v3307_v12 = vmul.f32 %v3299_v5, %v8531_v33  ;;  %v3311_v10 = vmul.f32 %v3299_v5, %v8532_v46  ;;  %v3520_v22 = vpop.xlane.xlu1 %3519 }
 0x42c   :  { %v3315_v24 = vmul.f32 %v3299_v5, %v8533_v62  ;;  %v3260_v5 = vadd.f32 %v8542_v51, %v3186_v17  ;;  %v8543_v49 = vcombine.high %v8538_v26, %v8538_v26  ;;  %v3373_v25 = vadd.f32 %v7689_v13, %v8544_v36  ;;  %v8552_v51 = vld [vmem:[#allocation81_spill] sm:$0xff] }
 0x42d   :  { %v3304_v4 = vmul.f32 %v3300_v15, %v8530_v21  ;;  %v3308_v53 = vmul.f32 %v3300_v15, %v8531_v33  ;;  %v3312_v40 = vmul.f32 %v3300_v15, %v8532_v46  ;;  %v3316_v27 = vmul.f32 %v3300_v15, %v8533_v62 }
 0x42e   :  { %v3319_v57 = vadd.f32 %v3303_v35, %v3245_v28  ;;  %v3323_v2 = vadd.f32 %v3307_v12, %v3249_v6  ;;  %v3327_v20 = vadd.f32 %v3311_v10, %v3253_v14  ;;  %v3331_v48 = vadd.f32 %v3315_v24, %v3257_v16  ;;  %v8540_v6 = vld [vmem:[#allocation32_spill] sm:$0xff]  ;;  %v8546_v10 = vld [vmem:[#allocation29_spill] sm:$0xff] }
 0x42f   :  { %v3320_v32 = vadd.f32 %v3304_v4, %v3246_v47  ;;  %v3324_v7 = vadd.f32 %v3308_v53, %v3250_v31  ;;  %v3328_v11 = vadd.f32 %v3312_v40, %v3254_v43  ;;  %v3332_v39 = vadd.f32 %v3316_v27, %v3258_v19  ;;  %v3517_v47 = vpop.xlane.xlu0 %3516  ;;  %v8547_v4 = vld [vmem:[#allocation4_spill] sm:$0xff]  ;;  %v8548_v40 = vld [vmem:[#allocation50_spill] sm:$0xff] }
 0x430   :  { %v3248_v28 = vadd.f32 %v8539_v0, %v3174_v29  ;;  %v3252_v14 = vadd.f32 %v8540_v6, %v3178_v9  ;;  %v3256_v16 = vadd.f32 %v8541_v55, %v3182_v30  ;;  %v3302_v56 = vadd.f32 %v7679_v1, %v8543_v49  ;;  %v8549_v27 = vld [vmem:[#allocation60_spill] sm:$0xff]  ;;  %v8550_v6 = vld [vmem:[#allocation75_spill] sm:$0xff] }
 0x431   :  { %v8545_v58 = vcombine.high %v8544_v36, %v8544_v36  ;;  %v3305_v29 = vmul.f32 %v3301_v42, %v8530_v21  ;;  %v3309_v9 = vmul.f32 %v3301_v42, %v8531_v33  ;;  %v3313_v30 = vmul.f32 %v3301_v42, %v8532_v46 }
 0x432   :  { %v3317_v17 = vmul.f32 %v3301_v42, %v8533_v62  ;;  %v3306_v1 = vmul.f32 %v3302_v56, %v8530_v21  ;;  %v3310_v31 = vmul.f32 %v3302_v56, %v8531_v33  ;;  %v3314_v13 = vmul.f32 %v3302_v56, %v8532_v46 }
 0x433   :  { %v3374_v61 = vadd.f32 %v7691_v44, %v8545_v58  ;;  %v3318_v3 = vmul.f32 %v3302_v56, %v8533_v62  ;;  %v3321_v43 = vadd.f32 %v3305_v29, %v3247_v50  ;;  %v3325_v44 = vadd.f32 %v3309_v9, %v3251_v18  ;;  %v3437_v52 = vpop.xlane.xlu0 %3436 }
 0x434   :  { %v3329_v8 = vadd.f32 %v3313_v30, %v3255_v41  ;;  %v3333_v19 = vadd.f32 %v3317_v17, %v3259_v23  ;;  %v3322_v34 = vadd.f32 %v3306_v1, %v3248_v28  ;;  %v3326_v15 = vadd.f32 %v3310_v31, %v3252_v14  ;;  %v3440_v23 = vpop.xlane.xlu1 %3439 }
 0x435   :  { %v3330_v35 = vadd.f32 %v3314_v13, %v3256_v16  ;;  %v3334_v12 = vadd.f32 %v3318_v3, %v3260_v5  ;;  %v3377_v24 = vmul.f32 %v3373_v25, %v8546_v10  ;;  %v3381_v53 = vmul.f32 %v3373_v25, %v8547_v4  ;;  %v8558_v13 = vld [vmem:[#allocation30_spill] sm:$0xff] }
 0x436   :  { %v3385_v21 = vmul.f32 %v3373_v25, %v8548_v40  ;;  %v3389_v33 = vmul.f32 %v3373_v25, %v8549_v27  ;;  %v3378_v46 = vmul.f32 %v3374_v61, %v8546_v10  ;;  %v3382_v62 = vmul.f32 %v3374_v61, %v8547_v4 }
 0x437   :  { %v3386_v59 = vmul.f32 %v3374_v61, %v8548_v40  ;;  %v3390_v50 = vmul.f32 %v3374_v61, %v8549_v27  ;;  %v3393_v45 = vadd.f32 %v3377_v24, %v3319_v57  ;;  %v3397_v18 = vadd.f32 %v3381_v53, %v3323_v2  ;;  %v8559_v24 = vld [vmem:[#allocation5_spill] sm:$0xff] }
 0x438   :  { %v3401_v54 = vadd.f32 %v3385_v21, %v3327_v20  ;;  %v3405_v41 = vadd.f32 %v3389_v33, %v3331_v48  ;;  %v3394_v26 = vadd.f32 %v3378_v46, %v3320_v32  ;;  %v3398_v42 = vadd.f32 %v3382_v62, %v3324_v7  ;;  %v8554_v20 = vld [vmem:[#allocation31_spill] sm:$0xff]  ;;  %v3443_v46 = vpop.xlane.xlu0 %3442 }
 0x439   :  { %v3402_v0 = vadd.f32 %v3386_v59, %v3328_v11  ;;  %v3406_v28 = vadd.f32 %v3390_v50, %v3332_v39  ;;  %v3375_v14 = vadd.f32 %v7716_v63, %v8550_v6  ;;  %v8551_v55 = vcombine.high %v8550_v6, %v8550_v6  ;;  %v8556_v11 = vld [vmem:[#allocation72_spill] sm:$0xff]  ;;  %v8560_v21 = vld [vmem:[#allocation51_spill] sm:$0xff] }
 0x43a   :  { %v3521_v5 = vadd.f32 %v3511_v38, %v8552_v51  ;;  %v8553_v57 = vcombine.high %v8552_v51, %v8552_v51  ;;  %v3523_v48 = vadd.f32 %v3517_v47, %v8554_v20  ;;  %v8555_v32 = vcombine.high %v8554_v20, %v8554_v20  ;;  %v8561_v33 = vld [vmem:[#allocation63_spill] sm:$0xff]  ;;  %v8562_v50 = vld [vmem:[#allocation52_spill] sm:$0xff] }
 0x43b   :  { %v3376_v16 = vadd.f32 %v7718_v37, %v8551_v55  ;;  %v3447_v39 = vadd.f32 %v3437_v52, %v8556_v11  ;;  %v8557_v63 = vcombine.high %v8556_v11, %v8556_v11  ;;  %v3379_v37 = vmul.f32 %v3375_v14, %v8546_v10 }
 0x43c   :  { %v3522_v2 = vadd.f32 %v3514_v60, %v8553_v57  ;;  %v3524_v7 = vadd.f32 %v3520_v22, %v8555_v32  ;;  %v3383_v38 = vmul.f32 %v3375_v14, %v8547_v4  ;;  %v3387_v56 = vmul.f32 %v3375_v14, %v8548_v40 }
 0x43d   :  { %v3448_v49 = vadd.f32 %v3440_v23, %v8557_v63  ;;  %v3391_v60 = vmul.f32 %v3375_v14, %v8549_v27  ;;  %v3380_v36 = vmul.f32 %v3376_v16, %v8546_v10  ;;  %v3384_v25 = vmul.f32 %v3376_v16, %v8547_v4  ;;  %v8563_v23 = vld [vmem:[#allocation54_spill] sm:$0xff]  ;;  %v8564_v14 = vld [vmem:[#allocation61_spill] sm:$0xff] }
 0x43e   :  { %v3388_v58 = vmul.f32 %v3376_v16, %v8548_v40  ;;  %v3392_v61 = vmul.f32 %v3376_v16, %v8549_v27  ;;  %v3395_v29 = vadd.f32 %v3379_v37, %v3321_v43  ;;  %v3399_v9 = vadd.f32 %v3383_v38, %v3325_v44  ;;  %v8565_v16 = vld [vmem:[#allocation68_spill] sm:$0xff]  ;;  %v3585_v37 = vpop.xlane.xlu0 %3584 }
 0x43f   :  { %v3403_v30 = vadd.f32 %v3387_v56, %v3329_v8  ;;  %v3407_v17 = vadd.f32 %v3391_v60, %v3333_v19  ;;  %v3396_v47 = vadd.f32 %v3380_v36, %v3322_v34  ;;  %v3400_v22 = vadd.f32 %v3384_v25, %v3326_v15  ;;  %v8566_v25 = vld [vmem:[#allocation76_spill] sm:$0xff] }
 0x440   :  { %v3404_v1 = vadd.f32 %v3388_v58, %v3330_v35  ;;  %v3408_v31 = vadd.f32 %v3392_v61, %v3334_v12  ;;  %v3525_v3 = vmul.f32 %v3521_v5, %v8558_v13  ;;  %v3529_v53 = vmul.f32 %v3521_v5, %v8559_v24 }
 0x441   :  { %v3533_v10 = vmul.f32 %v3521_v5, %v8560_v21  ;;  %v3537_v4 = vmul.f32 %v3521_v5, %v8561_v33  ;;  %v3526_v40 = vmul.f32 %v3522_v2, %v8558_v13  ;;  %v3530_v43 = vmul.f32 %v3522_v2, %v8559_v24 }
 0x442   :  { %v3534_v44 = vmul.f32 %v3522_v2, %v8560_v21  ;;  %v3538_v8 = vmul.f32 %v3522_v2, %v8561_v33  ;;  %v7811_v19 = vmul.f32 %v3523_v48, %v8558_v13  ;;  %v7814_v34 = vmul.f32 %v3523_v48, %v8559_v24 }
 0x443   :  { %v7817_v15 = vmul.f32 %v3523_v48, %v8560_v21  ;;  %v7820_v35 = vmul.f32 %v3523_v48, %v8561_v33  ;;  %v7823_v12 = vmul.f32 %v3524_v7, %v8558_v13  ;;  %v7826_v27 = vmul.f32 %v3524_v7, %v8559_v24  ;;  %v3446_v48 = vpop.xlane.xlu1 %3445 }
 0x444   :  { %v7829_v62 = vmul.f32 %v3524_v7, %v8560_v21  ;;  %v7832_v59 = vmul.f32 %v3524_v7, %v8561_v33  ;;  %v3451_v52 = vmul.f32 %v3447_v39, %v8562_v50  ;;  %v3455_v6 = vmul.f32 %v3447_v39, %v8563_v23  ;;  %v8568_v33 = vld [vmem:[#allocation25_spill] sm:$0xff] }
 0x445   :  { %v3459_v55 = vmul.f32 %v3447_v39, %v8564_v14  ;;  %v3463_v51 = vmul.f32 %v3447_v39, %v8565_v16  ;;  %v3452_v5 = vmul.f32 %v3448_v49, %v8562_v50  ;;  %v3456_v57 = vmul.f32 %v3448_v49, %v8563_v23 }
 0x446   :  { %v3460_v2 = vmul.f32 %v3448_v49, %v8564_v14  ;;  %v3464_v20 = vmul.f32 %v3448_v49, %v8565_v16  ;;  %v3467_v32 = vadd.f32 %v3451_v52, %v3393_v45  ;;  %v3471_v7 = vadd.f32 %v3455_v6, %v3397_v18 }
 0x447   :  { %v3475_v11 = vadd.f32 %v3459_v55, %v3401_v54  ;;  %v3479_v63 = vadd.f32 %v3463_v51, %v3405_v41  ;;  %v3468_v38 = vadd.f32 %v3452_v5, %v3394_v26  ;;  %v3472_v56 = vadd.f32 %v3456_v57, %v3398_v42  ;;  %v3588_v52 = vpop.xlane.xlu1 %3587  ;;  %v8569_v57 = vld [vmem:[#allocation55_spill] sm:$0xff] }
 0x448   :  { %v3476_v60 = vadd.f32 %v3460_v2, %v3402_v0  ;;  %v3480_v36 = vadd.f32 %v3464_v20, %v3406_v28  ;;  %v3449_v39 = vadd.f32 %v3443_v46, %v8566_v25  ;;  %v8567_v58 = vcombine.high %v8566_v25, %v8566_v25  ;;  %v8570_v20 = vld [vmem:[#allocation59_spill] sm:$0xff] }
 0x449   :  { %v3541_v13 = vadd.f32 %v3525_v3, %v3467_v32  ;;  %v3545_v24 = vadd.f32 %v3529_v53, %v3471_v7  ;;  %v3549_v21 = vadd.f32 %v3533_v10, %v3475_v11  ;;  %v3553_v49 = vadd.f32 %v3537_v4, %v3479_v63 }
 0x44a   :  { %v3450_v61 = vadd.f32 %v3446_v48, %v8567_v58  ;;  %v3595_v45 = vadd.f32 %v3585_v37, %v8568_v33  ;;  %v3542_v18 = vadd.f32 %v3526_v40, %v3468_v38  ;;  %v3453_v54 = vmul.f32 %v3449_v39, %v8562_v50  ;;  %v3591_v38 = vpop.xlane.xlu0 %3590 }
 0x44b   :  { %v3457_v41 = vmul.f32 %v3449_v39, %v8563_v23  ;;  %v3461_v26 = vmul.f32 %v3449_v39, %v8564_v14  ;;  %v3465_v42 = vmul.f32 %v3449_v39, %v8565_v16  ;;  %v3550_v11 = vadd.f32 %v3534_v44, %v3476_v60  ;;  %v3594_v60 = vpop.xlane.xlu1 %3593 }
 0x44c   :  { %v3454_v0 = vmul.f32 %v3450_v61, %v8562_v50  ;;  %v3458_v28 = vmul.f32 %v3450_v61, %v8563_v23  ;;  %v3462_v3 = vmul.f32 %v3450_v61, %v8564_v14  ;;  %v3466_v53 = vmul.f32 %v3450_v61, %v8565_v16  ;;  %v8571_v50 = vld [vmem:[#allocation62_spill] sm:$0xff]  ;;  %v8572_v23 = vld [vmem:[#allocation69_spill] sm:$0xff] }
 0x44d   :  { %v3469_v10 = vadd.f32 %v3453_v54, %v3395_v29  ;;  %v3473_v4 = vadd.f32 %v3457_v41, %v3399_v9  ;;  %v3477_v46 = vadd.f32 %v3461_v26, %v3403_v30  ;;  %v3481_v40 = vadd.f32 %v3465_v42, %v3407_v17  ;;  %v8574_v61 = vld [vmem:[#allocation6_spill] sm:$0xff] }
 0x44e   :  { %v3470_v6 = vadd.f32 %v3454_v0, %v3396_v47  ;;  %v3474_v55 = vadd.f32 %v3458_v28, %v3400_v22  ;;  %v3478_v51 = vadd.f32 %v3462_v3, %v3404_v1  ;;  %v3482_v5 = vadd.f32 %v3466_v53, %v3408_v31 }
 0x44f   :  { %v3599_v2 = vmul.f32 %v3595_v45, %v8569_v57  ;;  %v3603_v48 = vmul.f32 %v3595_v45, %v8570_v20  ;;  %v3607_v32 = vmul.f32 %v3595_v45, %v8571_v50  ;;  %v3611_v7 = vmul.f32 %v3595_v45, %v8572_v23 }
 0x450   :  { %v3546_v14 = vadd.f32 %v3530_v43, %v3472_v56  ;;  %v3554_v16 = vadd.f32 %v3538_v8, %v3480_v36  ;;  %v8573_v29 = vcombine.high %v8568_v33, %v8568_v33  ;;  %v3543_v43 = vadd.f32 %v7811_v19, %v3469_v10 }
 0x451   :  { %v3615_v30 = vadd.f32 %v3599_v2, %v3541_v13  ;;  %v3619_v17 = vadd.f32 %v3603_v48, %v3545_v24  ;;  %v3623_v47 = vadd.f32 %v3607_v32, %v3549_v21  ;;  %v3627_v22 = vadd.f32 %v3611_v7, %v3553_v49 }
 0x452   :  { %v3596_v9 = vadd.f32 %v3588_v52, %v8573_v29  ;;  %v3547_v44 = vadd.f32 %v7814_v34, %v3473_v4  ;;  %v3551_v8 = vadd.f32 %v7817_v15, %v3477_v46  ;;  %v3555_v56 = vadd.f32 %v7820_v35, %v3481_v40 }
 0x453   :  { %v3597_v13 = vadd.f32 %v3591_v38, %v8574_v61  ;;  %v3544_v24 = vadd.f32 %v7823_v12, %v3470_v6  ;;  %v3548_v21 = vadd.f32 %v7826_v27, %v3474_v55  ;;  %v3552_v49 = vadd.f32 %v7829_v62, %v3478_v51 }
 0x454   :  { %v3600_v1 = vmul.f32 %v3596_v9, %v8569_v57  ;;  %v3604_v31 = vmul.f32 %v3596_v9, %v8570_v20  ;;  %v3608_v63 = vmul.f32 %v3596_v9, %v8571_v50  ;;  %v3612_v37 = vmul.f32 %v3596_v9, %v8572_v23 }
 0x455   :  { %v3556_v34 = vadd.f32 %v7832_v59, %v3482_v5  ;;  %v8575_v15 = vcombine.high %v8574_v61, %v8574_v61  ;;  %v3601_v45 = vmul.f32 %v3597_v13, %v8569_v57  ;;  %v3609_v54 = vmul.f32 %v3597_v13, %v8571_v50  ;;  %v8576_v5 = vld [vmem:[#allocation3_spill] sm:$0xff] }
 0x456   :  { %v3616_v36 = vadd.f32 %v3600_v1, %v3542_v18  ;;  %v3620_v25 = vadd.f32 %v3604_v31, %v3546_v14  ;;  %v3624_v39 = vadd.f32 %v3608_v63, %v3550_v11  ;;  %v3628_v58 = vadd.f32 %v3612_v37, %v3554_v16 }
 0x457   :  { %v3598_v35 = vadd.f32 %v3594_v60, %v8575_v15  ;;  %v3605_v18 = vmul.f32 %v3597_v13, %v8570_v20  ;;  %v3613_v12 = vmul.f32 %v3597_v13, %v8572_v23  ;;  %v3617_v26 = vadd.f32 %v3601_v45, %v3543_v43 }
 0x458   :  { %v3681_v19 = vcombine.low %v3623_v47, %v3624_v39  ;;  %v3698_v33 = vcombine.low %v3627_v22, %v3628_v58  ;;  %v3625_v0 = vadd.f32 %v3609_v54, %v3551_v8  ;;  %v3647_v46 = vcombine.low %v3615_v30, %v3616_v36  ;;  %v4094_v47 = vpop.permute.xlu1 %4093  ;;  %v4090_v22 = vpop.permute.xlu0 %4089 }
 0x459   :  { %v3602_v27 = vmul.f32 %v3598_v35, %v8569_v57  ;;  %v3606_v62 = vmul.f32 %v3598_v35, %v8570_v20  ;;  %v3610_v41 = vmul.f32 %v3598_v35, %v8571_v50  ;;  %v3614_v59 = vmul.f32 %v3598_v35, %v8572_v23 }
 0x45a   :  { %v3621_v42 = vadd.f32 %v3605_v18, %v3547_v44  ;;  %v3629_v28 = vadd.f32 %v3613_v12, %v3555_v56  ;;  %v3664_v40 = vcombine.low %v3619_v17, %v3620_v25  ;;  %v3655_v57 = vrot.slane %v3647_v46, %v8576_v5 }
 0x45b   :  { %v3618_v3 = vadd.f32 %v3602_v27, %v3544_v24  ;;  %v3622_v53 = vadd.f32 %v3606_v62, %v3548_v21  ;;  %v3626_v10 = vadd.f32 %v3610_v41, %v3552_v49  ;;  %v3630_v4 = vadd.f32 %v3614_v59, %v3556_v34 }
 0x45c   :  { %v3672_v2 = vrot.slane %v3664_v40, %v8576_v5  ;;  %v3689_v20 = vrot.slane %v3681_v19, %v8576_v5  ;;  %v3706_v48 = vrot.slane %v3698_v33, %v8576_v5  ;;  %v8577_v17 = vmov 0   ;;  %v4098_v1 = vpop.permute.xlu1 %4097  ;;  %v4102_v31 = vpop.permute.xlu0 %4101 }
 0x45d   :  { %v3682_v52 = vcombine.low %v3625_v0, %v3626_v10  ;;  %v3699_v6 = vcombine.low %v3629_v28, %v3630_v4  ;;  %v3648_v55 = vcombine.low %v3617_v26, %v3618_v3  ;;  %v3665_v51 = vcombine.low %v3621_v42, %v3622_v53 }
 0x45f   :  { %v3662_v50 = vrot.slane %v3648_v55, %v8576_v5  ;;  %v3679_v32 = vrot.slane %v3665_v51, %v8576_v5  ;;  %v3696_v23 = vrot.slane %v3682_v52, %v8576_v5  ;;  %v3713_v7 = vrot.slane %v3699_v6, %v8576_v5 }
 0x460   :  { %v7895_v63 = vpop.permute.xlu1 %4105  ;;  %v7897_v37 = vpop.permute.xlu0 %4109 }
 0x461   :  { %v3663_v14 = vcombine.low %v3655_v57, %v3662_v50  ;;  %v3680_v11 = vcombine.low %v3672_v2, %v3679_v32  ;;  %v3697_v16 = vcombine.low %v3689_v20, %v3696_v23  ;;  %v3714_v29 = vcombine.low %v3706_v48, %v3713_v7 }
 0x463   :  { %v3719_v9 = vpack.c.bf16 %v3680_v11, %v3663_v14  ;;  %v3720_v30 = vpack.c.bf16 %v3714_v29, %v3697_v16 }
 0x464   :  { %v7899_v38 = vpop.permute.xlu1 %4113  ;;  %v7901_v43 = vpop.permute.xlu0 %4117 }
 0x465   :  { %5012 = vmatprep.mubr.bf16.mxu0 %v3719_v9 }
 0x466   :  { %5013 = vmatmul.mubr.bf16.vlgmr.msra.gmra.mrb[32].mxu0 %v3720_v30 }
 0x467   :  { %4664 = vmatprep.mubr.bf16.mxu0 %v8577_v17 }
 0x468   :  { %v4122_v44 = vpop.permute.xlu1 %4121  ;;  %v4126_v8 = vpop.permute.xlu0 %4125 }
 0x46c   :  { %v4130_v56 = vpop.permute.xlu1 %4129  ;;  %v4134_v60 = vpop.permute.xlu0 %4133 }
 0x470   :  { %v4138_v36 = vpop.permute.xlu1 %4137  ;;  %v4142_v25 = vpop.permute.xlu0 %4141 }
 0x474   :  { %v4146_v39 = vpop.permute.xlu1 %4145  ;;  %v4150_v58 = vpop.permute.xlu0 %4149 }
 0x478   :  { %v4336_v61 = vpop.permute.xlu1 %4335  ;;  %v4340_v13 = vpop.permute.xlu0 %4339 }
 0x47c   :  { %v4344_v24 = vpop.permute.xlu1 %4343  ;;  %v4348_v21 = vpop.permute.xlu0 %4347 }
 0x480   :  { %v7903_v49 = vpop.permute.xlu1 %4351  ;;  %v7905_v19 = vpop.permute.xlu0 %4355 }
 0x484   :  { %v7907_v33 = vpop.permute.xlu1 %4359  ;;  %v7909_v34 = vpop.permute.xlu0 %4363 }
 0x488   :  { %v4368_v15 = vpop.permute.xlu1 %4367  ;;  %v4372_v35 = vpop.permute.xlu0 %4371 }
 0x48c   :  { %v4376_v18 = vpop.permute.xlu1 %4375  ;;  %v4380_v62 = vpop.permute.xlu0 %4379 }
 0x490   :  { %v4384_v57 = vpop.permute.xlu1 %4383  ;;  %v4388_v50 = vpop.permute.xlu0 %4387 }
 0x539   :  { %v5014_v45 = vpop.f32.mrb[32].mxu0 }
 0x53a   :  { %v3872_v54 = vcombine.high %v5014_v45, %v5014_v45  ;;  %v3879_v12 = vrot.slane %v5014_v45, %v8576_v5  ;;  %v3819_v27 = vpop.f32.mrb[33].mxu0 }
 0x53b   :  { %v3838_v41 = vcombine.high %v3819_v27, %v3819_v27  ;;  %v3845_v59 = vrot.slane %v3819_v27, %v8576_v5  ;;  %v5015_v26 = vpop.f32.mrb[34].mxu0 }
 0x53c   :  { %v3886_v42 = vrot.slane %v3872_v54, %v8576_v5  ;;  %v3887_v0 = vcombine.high %v3879_v12, %v3879_v12  ;;  %v3822_v28 = vpop.f32.mrb[35].mxu0  ;;  %v4160_v3 = vmul.f32 %v4122_v44, %v3879_v12  ;;  %v3889_v52 = vcombine.high %v5015_v26, %v5015_v26  ;;  %v4392_v12 = vpop.permute.xlu1 %4391 }
 0x53d   :  { %v3852_v53 = vrot.slane %v3838_v41, %v8576_v5  ;;  %v3853_v10 = vcombine.high %v3845_v59, %v3845_v59  ;;  %v4152_v55 = vmul.f32 %v4090_v22, %v3845_v59  ;;  %v3896_v51 = vrot.slane %v5015_v26, %v8576_v5 }
 0x53e   :  { %v3888_v4 = vcombine.high %v3886_v42, %v3886_v42  ;;  %v4161_v46 = vmul.f32 %v4126_v8, %v3887_v0  ;;  %v4162_v40 = vmul.f32 %v4130_v56, %v3886_v42  ;;  %v4406_v32 = vadd.f32 %v4368_v15, %v4160_v3 }
 0x53f   :  { %v3854_v6 = vcombine.high %v3852_v53, %v3852_v53  ;;  %v4153_v23 = vmul.f32 %v4094_v47, %v3853_v10  ;;  %v4154_v11 = vmul.f32 %v4098_v1, %v3852_v53  ;;  %v3903_v16 = vrot.slane %v3889_v52, %v8576_v5  ;;  %v4396_v1 = vpop.permute.xlu0 %4395 }
 0x540   :  { %v4163_v2 = vmul.f32 %v4134_v60, %v3888_v4  ;;  %v4407_v20 = vadd.f32 %v4372_v35, %v4161_v46  ;;  %v4408_v48 = vadd.f32 %v4376_v18, %v4162_v40  ;;  %v4398_v30 = vadd.f32 %v4336_v61, %v4152_v55 }
 0x541   :  { %v4155_v7 = vmul.f32 %v4102_v31, %v3854_v6  ;;  %v3904_v44 = vcombine.high %v3896_v51, %v3896_v51  ;;  %v3905_v56 = vcombine.high %v3903_v16, %v3903_v16  ;;  %v4164_v45 = vmul.f32 %v4138_v36, %v3896_v51 }
 0x542   :  { %v4409_v14 = vadd.f32 %v4380_v62, %v4163_v2  ;;  %v4423_v29 = vmax.f32 %v4407_v20, 0.0  ;;  %v4424_v9 = vmax.f32 %v4408_v48, 0.0  ;;  %v4422_v54 = vmax.f32 %v4406_v32, 0.0 }
 0x543   :  { %v4401_v22 = vadd.f32 %v4348_v21, %v4155_v7  ;;  %v4399_v60 = vadd.f32 %v4340_v13, %v4153_v23  ;;  %v4165_v35 = vmul.f32 %v4142_v25, %v3904_v44  ;;  %v4166_v18 = vmul.f32 %v4146_v39, %v3903_v16  ;;  %v8578_v25 = vld [vmem:[#allocation14_spill] sm:$0xff] }
 0x544   :  { %v4425_v8 = vmax.f32 %v4409_v14, 0.0  ;;  %v4400_v47 = vadd.f32 %v4344_v24, %v4154_v11  ;;  %v4167_v31 = vmul.f32 %v4150_v58, %v3905_v56  ;;  %v4410_v27 = vadd.f32 %v4384_v57, %v4164_v45 }
 0x545   :  { %v4466_v62 = vcombine.low %v4422_v54, %v4423_v29  ;;  %v4414_v41 = vmax.f32 %v4398_v30, 0.0  ;;  %v4411_v59 = vadd.f32 %v4388_v50, %v4165_v35  ;;  %v4412_v26 = vadd.f32 %v4392_v12, %v4166_v18 }
 0x546   :  { %v4475_v15 = vcombine.low %v4424_v9, %v4425_v8  ;;  %v4417_v61 = vmax.f32 %v4401_v22, 0.0  ;;  %v4413_v42 = vadd.f32 %v4396_v1, %v4167_v31  ;;  %v3855_v0 = vcombine.high %v3822_v28, %v3822_v28 }
 0x547   :  { %v3862_v21 = vrot.slane %v3822_v28, %v8576_v5  ;;  %v4426_v36 = vmax.f32 %v4410_v27, 0.0  ;;  %v4427_v3 = vmax.f32 %v4411_v59, 0.0  ;;  %v4428_v13 = vmax.f32 %v4412_v26, 0.0 }
 0x548   :  { %v4482_v39 = vrot.slane %v4475_v15, %v8578_v25  ;;  %v4429_v53 = vmax.f32 %v4413_v42, 0.0  ;;  %v3869_v24 = vrot.slane %v3855_v0, %v8576_v5  ;;  %v4473_v4 = vrot.slane %v4466_v62, %v8578_v25  ;;  %v5063_v42 = vld [vmem:[%s8021_s10 + $0x8] sm:$0xff]   ;;  %v5065_v0 = vld [vmem:[%s8021_s10 + $0x18] sm:$0xff]  }
 0x549   :  { %v3870_v58 = vcombine.high %v3862_v21, %v3862_v21  ;;  %v4156_v10 = vmul.f32 %v7895_v63, %v3862_v21  ;;  %v4415_v46 = vmax.f32 %v4399_v60, 0.0  ;;  %v4416_v40 = vmax.f32 %v4400_v47, 0.0  ;;  %v4716_v21 = vpop.permute.xlu1 %4715 }
 0x54a   :  { %v4484_v52 = vcombine.low %v4426_v36, %v4427_v3  ;;  %v4493_v6 = vcombine.low %v4428_v13, %v4429_v53  ;;  %v3871_v55 = vcombine.high %v3869_v24, %v3869_v24  ;;  %v4158_v51 = vmul.f32 %v7899_v38, %v3869_v24 }
 0x54b   :  { %v4157_v28 = vmul.f32 %v7897_v37, %v3870_v58  ;;  %v4439_v57 = vcombine.low %v4416_v40, %v4417_v61  ;;  %v4402_v20 = vadd.f32 %v7903_v49, %v4156_v10  ;;  %v4968_v48 = vcombine.high %v4473_v4, %v4482_v39  ;;  %v5062_v61 = vld [vmem:[%s8021_s10] sm:$0xff]  }
 0x54c   :  { %v4491_v2 = vrot.slane %v4484_v52, %v8578_v25  ;;  %v4159_v50 = vmul.f32 %v7901_v43, %v3871_v55  ;;  %v4404_v32 = vadd.f32 %v7907_v33, %v4158_v51  ;;  %v4500_v23 = vrot.slane %v4493_v6, %v8578_v25 }
 0x54d   :  { %v4403_v63 = vadd.f32 %v7905_v19, %v4157_v28  ;;  %v4430_v7 = vcombine.low %v4414_v41, %v4415_v46  ;;  %v4527_v14 = vcombine.low %v4473_v4, %v4482_v39  ;;  %v4418_v11 = vmax.f32 %v4402_v20, 0.0  ;;  %v4726_v52 = vpop.permute.xlu1 %4725 }
 0x54e   :  { %v4405_v37 = vadd.f32 %v7909_v34, %v4159_v50  ;;  %v4969_v16 = vcombine.high %v4491_v2, %v4500_v23  ;;  %v4446_v29 = vrot.slane %v4439_v57, %v8578_v25  ;;  %v4579_v49 = vrot.slane %v4968_v48, %v8576_v5 }
 0x54f   :  { %v4419_v38 = vmax.f32 %v4403_v63, 0.0  ;;  %v4528_v9 = vcombine.low %v4491_v2, %v4500_v23  ;;  %v4420_v30 = vmax.f32 %v4404_v32, 0.0  ;;  %v4535_v33 = vrot.slane %v4527_v14, %v8576_v5 }
 0x550   :  { %v4421_v43 = vmax.f32 %v4405_v37, 0.0  ;;  %v4586_v19 = vrot.slane %v4969_v16, %v8576_v5  ;;  %v4437_v22 = vrot.slane %v4430_v7, %v8578_v25 }
 0x551   :  { %v4448_v44 = vcombine.low %v4418_v11, %v4419_v38  ;;  %v4542_v8 = vrot.slane %v4528_v9, %v8576_v5  ;;  %v4736_v14 = vpop.permute.xlu1 %4735 }
 0x552   :  { %v4457_v34 = vcombine.low %v4420_v30, %v4421_v43  ;;  %v4587_v56 = vcombine.low %v4579_v49, %v4586_v19  ;;  %v4966_v35 = vcombine.high %v4437_v22, %v4446_v29  ;;  %v4510_v18 = vcombine.low %v4437_v22, %v4446_v29 }
 0x553   :  { %v4543_v45 = vcombine.low %v4535_v33, %v4542_v8  ;;  %v4455_v54 = vrot.slane %v4448_v44, %v8578_v25 }
 0x554   :  { %v4464_v60 = vrot.slane %v4457_v34, %v8578_v25  ;;  %v4562_v47 = vrot.slane %v4966_v35, %v8576_v5  ;;  %v4518_v27 = vrot.slane %v4510_v18, %v8576_v5  ;;  %v4721_v25 = vpop.permute.xlu0 %4720 }
 0x555   :  { %v4746_v22 = vpop.permute.xlu1 %4745 }
 0x556   :  { %v4967_v12 = vcombine.high %v4455_v54, %v4464_v60  ;;  %v4511_v15 = vcombine.low %v4455_v54, %v4464_v60 }
 0x558   :  { %v4569_v31 = vrot.slane %v4967_v12, %v8576_v5  ;;  %v4525_v1 = vrot.slane %v4511_v15, %v8576_v5  ;;  %v5064_v5 = vld [vmem:[%s8021_s10 + $0x10] sm:$0xff]   ;;  %v4731_v51 = vpop.permute.xlu0 %4730 }
 0x55a   :  { %v4570_v62 = vcombine.low %v4562_v47, %v4569_v31  ;;  %v4526_v41 = vcombine.low %v4518_v27, %v4525_v1 }
 0x55c   :  { %v4591_v59 = vpack.c.bf16 %v4587_v56, %v4570_v62  ;;  %v4590_v26 = vpack.c.bf16 %v4543_v45, %v4526_v41  ;;  %v4741_v16 = vpop.permute.xlu0 %4740 }
 0x55e   :  { %4632 = vmatprep.subr.bf16.mxu0 %v4591_v59 }
 0x55f   :  { %4633 = vmatpush1.bf16.msra.mxu0 %v4590_v26 }
 0x560   :  { %v4751_v54 = vpop.permute.xlu0 %4750 }
 0x562   :  { %4974 = vmatmul.mubr.msk.bf16.vlgmr.msra.gmra.mrb[4].mxu0 %vm315_vm2, %v5062_v61 }
 0x563   :  { %4674 = vmatprep.mubr.bf16.mxu0 %v8577_v17 }
 0x56a   :  { %4975 = vmatmul.mubr.msk.bf16.gmra.mrb[8].mxu0 %vm315_vm2, %v5063_v42 }
 0x56b   :  { %4684 = vmatprep.mubr.bf16.mxu0 %v8577_v17 }
 0x572   :  { %4976 = vmatmul.mubr.msk.bf16.gmra.mrb[12].mxu0 %vm315_vm2, %v5064_v5 }
 0x573   :  { %4694 = vmatprep.mubr.bf16.mxu0 %v8577_v17 }
 0x57a   :  { %4977 = vmatmul.mubr.msk.bf16.gmra.mrb[16].mxu0 %vm315_vm2, %v5065_v0 }
 0x635   :  { %v4666_v36 = vpop.f32.mrb[4].mxu0 }
 0x636   :  { %v4753_v3 = vadd.f32 %v4716_v21, %v4666_v36  ;;  %v4668_v13 = vpop.f32.mrb[5].mxu0 }
 0x637   :  { %v4754_v39 = vadd.f32 %v4716_v21, %v4668_v13  ;;  %v4670_v53 = vpop.f32.mrb[6].mxu0 }
 0x638   :  { %v4769_v24 = vmax.f32 %v4753_v3, 0.0  ;;  %v4755_v58 = vadd.f32 %v4721_v25, %v4670_v53  ;;  %v4672_v10 = vpop.f32.mrb[7].mxu0 }
 0x639   :  { %v4770_v4 = vmax.f32 %v4754_v39, 0.0  ;;  %v4756_v46 = vadd.f32 %v4721_v25, %v4672_v10 }
 0x63a   :  { %4785 = vst [vmem:[%s8022_s12] sm:$0xff] %v4769_v24  ;;  %v4771_v17 = vmax.f32 %v4755_v58, 0.0 }
 0x63b   :  { %4978 = vst [vmem:[%s8022_s12 + $0x40] sm:$0xff] %v4770_v4  ;;  %v4772_v40 = vmax.f32 %v4756_v46, 0.0 }
 0x63c   :  { %4786 = vst [vmem:[%s8022_s12 + $0x8] sm:$0xff] %v4771_v17 }
 0x63d   :  { %4979 = vst [vmem:[%s8022_s12 + $0x48] sm:$0xff] %v4772_v40  ;;  %v4676_v6 = vpop.f32.mrb[8].mxu0 }
 0x63e   :  { %v4757_v55 = vadd.f32 %v4726_v52, %v4676_v6  ;;  %v4678_v28 = vpop.f32.mrb[9].mxu0 }
 0x63f   :  { %v4758_v57 = vadd.f32 %v4726_v52, %v4678_v28  ;;  %v4680_v2 = vpop.f32.mrb[10].mxu0 }
 0x640   :  { %v4773_v20 = vmax.f32 %v4757_v55, 0.0  ;;  %v4759_v48 = vadd.f32 %v4731_v51, %v4680_v2  ;;  %v4682_v50 = vpop.f32.mrb[11].mxu0 }
 0x641   :  { %v4774_v63 = vmax.f32 %v4758_v57, 0.0  ;;  %v4760_v32 = vadd.f32 %v4731_v51, %v4682_v50 }
 0x642   :  { %4787 = vst [vmem:[%s8022_s12 + $0x10] sm:$0xff] %v4773_v20  ;;  %v4775_v23 = vmax.f32 %v4759_v48, 0.0 }
 0x643   :  { %4980 = vst [vmem:[%s8022_s12 + $0x50] sm:$0xff] %v4774_v63  ;;  %v4776_v7 = vmax.f32 %v4760_v32, 0.0 }
 0x644   :  { %4788 = vst [vmem:[%s8022_s12 + $0x18] sm:$0xff] %v4775_v23 }
 0x645   :  { %4981 = vst [vmem:[%s8022_s12 + $0x58] sm:$0xff] %v4776_v7  ;;  %v4686_v37 = vpop.f32.mrb[12].mxu0 }
 0x646   :  { %v4761_v11 = vadd.f32 %v4736_v14, %v4686_v37  ;;  %v4688_v38 = vpop.f32.mrb[13].mxu0 }
 0x647   :  { %v4762_v29 = vadd.f32 %v4736_v14, %v4688_v38  ;;  %v4690_v49 = vpop.f32.mrb[14].mxu0 }
 0x648   :  { %v4777_v9 = vmax.f32 %v4761_v11, 0.0  ;;  %v4763_v30 = vadd.f32 %v4741_v16, %v4690_v49  ;;  %v4692_v43 = vpop.f32.mrb[15].mxu0 }
 0x649   :  { %v4778_v44 = vmax.f32 %v4762_v29, 0.0  ;;  %v4764_v19 = vadd.f32 %v4741_v16, %v4692_v43 }
 0x64a   :  { %4789 = vst [vmem:[%s8022_s12 + $0x20] sm:$0xff] %v4777_v9  ;;  %v4779_v33 = vmax.f32 %v4763_v30, 0.0 }
 0x64b   :  { %4982 = vst [vmem:[%s8022_s12 + $0x60] sm:$0xff] %v4778_v44  ;;  %v4780_v8 = vmax.f32 %v4764_v19, 0.0 }
 0x64c   :  { %4790 = vst [vmem:[%s8022_s12 + $0x28] sm:$0xff] %v4779_v33 }
 0x64d   :  { %4983 = vst [vmem:[%s8022_s12 + $0x68] sm:$0xff] %v4780_v8  ;;  %v4696_v34 = vpop.f32.mrb[16].mxu0 }
 0x64e   :  { %v4765_v56 = vadd.f32 %v4746_v22, %v4696_v34  ;;  %v4698_v45 = vpop.f32.mrb[17].mxu0 }
 0x64f   :  { %v4766_v60 = vadd.f32 %v4746_v22, %v4698_v45  ;;  %v4700_v35 = vpop.f32.mrb[18].mxu0 }
 0x650   :  { %v4781_v18 = vmax.f32 %v4765_v56, 0.0  ;;  %v4767_v12 = vadd.f32 %v4751_v54, %v4700_v35  ;;  %v4702_v15 = vpop.f32.mrb[19].mxu0 }
 0x651   :  { %v4782_v47 = vmax.f32 %v4766_v60, 0.0  ;;  %v4768_v31 = vadd.f32 %v4751_v54, %v4702_v15 }
 0x652   :  { %4791 = vst [vmem:[%s8022_s12 + $0x30] sm:$0xff] %v4781_v18  ;;  %v4783_v27 = vmax.f32 %v4767_v12, 0.0 }
 0x653   :  { %4984 = vst [vmem:[%s8022_s12 + $0x70] sm:$0xff] %v4782_v47  ;;  %v4784_v1 = vmax.f32 %v4768_v31, 0.0 }
 0x654   :  { %4792 = vst [vmem:[%s8022_s12 + $0x38] sm:$0xff] %v4783_v27 }
 0x655   :  { %4985 = vst [vmem:[%s8022_s12 + $0x78] sm:$0xff] %v4784_v1 }

</bundles_post_ra>
